<compile_context>
chip_gen: v5e
topology: v5e:2x2
jax: 0.10.0
libtpu: 0.0.40
codegen_flags: <defaults>
</compile_context>

<pallas_src>
import functools

import jax
import jax.numpy as jnp
from jax.experimental import pallas as pl
from jax.experimental.pallas import tpu as pltpu


def _lane_fold(v, c, ow):
    """v: (1, ow*c) f32.  Returns (1, ow*c) where lane l holds the sum of all
    lanes l' with l' == l (mod c) -- i.e. the per-channel total already
    replicated across the ow lane replicas (no reshape / gather needed).
    Valid because ow*c is the full (circular) lane extent and all shifts are
    multiples of c.  pltpu.roll needs a non-negative axis index."""
    axis = v.ndim - 1
    total = ow * c
    if ow & (ow - 1) == 0:                 # power-of-two ow: log-depth roll tree
        out = v
        span = c
        while span < total:
            out = out + pltpu.roll(out, shift=span, axis=axis)
            span *= 2
        return out
    out = v                                # general fallback: ow-1 rolls
    for m in range(1, ow):
        out = out + pltpu.roll(v, shift=m * c, axis=axis)
    return out


def _conv_bn_relu_kernel(xf_ref, wf_ref, gamma_ref, beta_ref, out_ref, *,
                         n, oh, ow, cin, ocg, kh, kw, eps):
    # xf_ref   : (N, Hp, Wp*Cin)        padded input, W flattened into lanes
    #                                   (lane index = w*Cin + c)
    # wf_ref   : (ocg*kH*kW, OW*Cin)    per-(group, tap) weights tiled over OW
    # gamma_ref: (ocg, OW*Cin)          BN gamma tiled over OW (per group row)
    # beta_ref : (ocg, OW*Cin)          BN beta  tiled over OW
    # out_ref  : (N*ocg, OH, OW*Cin)    fused conv+BN+ReLU output (lane-dense)
    owc = ow * cin
    khkw = kh * kw
    inv_cnt = 1.0 / float(n * oh * ow)

    s1 = [jnp.zeros((1, owc), jnp.float32) for _ in range(ocg)]
    s2 = [jnp.zeros((1, owc), jnp.float32) for _ in range(ocg)]

    # ---- pass 1: depthwise grouped conv (VPU fmas), stats fused in ----
    for b in range(n):
        xb = xf_ref[b]                                   # one (Hp, Wp*Cin) load
        accs = [jnp.zeros((oh, owc), jnp.float32) for _ in range(ocg)]
        for i in range(kh):
            for j in range(kw):
                # static value slice of the already-loaded block (no ref DMA)
                patch = xb[i:i + oh, j * cin:j * cin + owc]
                t = i * kw + j
                for g in range(ocg):
                    # weight row re-read per image on purpose: keeping all
                    # ocg*kh*kw rows live would blow the vreg budget.
                    row = wf_ref[g * khkw + t:g * khkw + t + 1, :]   # (1, owc)
                    accs[g] = accs[g] + patch * row
        for g in range(ocg):
            out_ref[b * ocg + g] = accs[g]               # stage raw conv in VMEM
            s1[g] = s1[g] + jnp.sum(accs[g], axis=0, keepdims=True)
            s2[g] = s2[g] + jnp.sum(accs[g] * accs[g], axis=0, keepdims=True)

    # ---- pass 2: per-group BN stats (biased var), affine + ReLU ----
    for g in range(ocg):
        mean = _lane_fold(s1[g], cin, ow) * inv_cnt      # per-channel, lane-replicated
        var = _lane_fold(s2[g], cin, ow) * inv_cnt - mean * mean
        var = jnp.maximum(var, 0.0)
        inv_std = jax.lax.rsqrt(var + eps)
        scale = gamma_ref[g:g + 1, :] * inv_std          # (1, owc)
        shift = beta_ref[g:g + 1, :] - mean * scale
        for b in range(n):
            idx = b * ocg + g
            y = out_ref[idx] * scale + shift
            out_ref[idx] = jnp.maximum(y, 0.0)


def conv_block_lane_dense(xf, wf, gamma_t, beta_t, *, n, oh, ow, cin, ocg,
                          kh, kw, eps):
    """Core fused kernel on the lane-dense layout.  Use this entry point
    between stacked ConvBlocks to avoid NCHW round-trips."""
    owc = ow * cin
    hp, wpc = xf.shape[1], xf.shape[2]
    kernel = functools.partial(_conv_bn_relu_kernel, n=n, oh=oh, ow=ow,
                               cin=cin, ocg=ocg, kh=kh, kw=kw, eps=eps)
    # TODO(synk): for large H/W/N add a 'parallel' grid axis over OH row tiles
    #             (kh-1 halo) with two-phase BN stats so v7x's second
    #             TensorCore is used and the block fits 64 MiB VMEM.
    return pl.pallas_call(
        kernel,
        out_shape=jax.ShapeDtypeStruct((n * ocg, oh, owc), jnp.float32),
        grid=(1,),
        in_specs=[pl.BlockSpec((n, hp, wpc), lambda i: (0, 0, 0)),
                  pl.BlockSpec((ocg * kh * kw, owc), lambda i: (0, 0)),
                  pl.BlockSpec((ocg, owc), lambda i: (0, 0)),
                  pl.BlockSpec((ocg, owc), lambda i: (0, 0))],
        out_specs=pl.BlockSpec((n * ocg, oh, owc), lambda i: (0, 0, 0)),
        compiler_params=pltpu.CompilerParams(
            dimension_semantics=("arbitrary",)),
    )(xf, wf, gamma_t, beta_t)


def conv_block_forward(x_nchw, weight, gamma, beta, *, stride, padding,
                       groups, eps=1e-5):
    """ConvBlock forward: grouped Conv2d (bias=False) -> BatchNorm2d (training
    batch statistics) -> ReLU.  x_nchw: (N, Cin, H, W) f32; returns NCHW."""
    n, cin, h, w = x_nchw.shape
    cout, icg, kh, kw = weight.shape
    assert cin == groups * icg
    assert icg == 1, "fast depthwise path requires in_channels == groups"
    assert stride == 1, "lane-flat layout implemented for stride == 1"
    # TODO(synk): stride > 1 / in_channels > groups need a strided / grouped
    #             tap gather; not required for this ConvBlock configuration.
    ocg = cout // groups
    oh = (h + 2 * padding - kh) // stride + 1
    ow = (w + 2 * padding - kw) // stride + 1
    hp, wp = h + 2 * padding, w + 2 * padding

    # --- minimal layout glue (XLA): NCHW -> NHWC -> pad -> (N, Hp, Wp*Cin).
    #     No channel repeat; the ocg groups reuse the same input tile in-kernel.
    x = jnp.transpose(x_nchw, (0, 2, 3, 1)).astype(jnp.float32)
    x = jnp.pad(x, ((0, 0), (padding, padding), (padding, padding), (0, 0)))
    xf = x.reshape(n, hp, wp * cin)

    # --- parameter glue (precompute once per network in real use):
    #     output channel co = c*ocg + g reads input channel c.
    w_r = weight[:, 0].astype(jnp.float32).reshape(cin, ocg, kh, kw)
    w_r = jnp.transpose(w_r, (1, 2, 3, 0)).reshape(ocg * kh * kw, cin)
    wf = jnp.tile(w_r, (1, ow))                                 # (ocg*kHkW, OW*Cin)
    gamma_t = jnp.tile(gamma.astype(jnp.float32).reshape(cin, ocg).T, (1, ow))
    beta_t = jnp.tile(beta.astype(jnp.float32).reshape(cin, ocg).T, (1, ow))

    out_flat = conv_block_lane_dense(xf, wf, gamma_t, beta_t, n=n, oh=oh,
                                     ow=ow, cin=cin, ocg=ocg, kh=kh, kw=kw,
                                     eps=eps)

    # --- back to NCHW: out_flat[b*ocg+g, y, w*cin+c] is channel co = c*ocg+g.
    out = out_flat.reshape(n, ocg, oh, ow, cin)
    out = jnp.transpose(out, (0, 4, 1, 2, 3)).reshape(n, cout, oh, ow)
    return out


def _reference(x, weight, gamma, beta, stride, padding, groups):
    """Pure-JAX reference matching PyTorch training-mode forward."""
    y = jax.lax.conv_general_dilated(
        x, weight, window_strides=(stride, stride),
        padding=[(padding, padding), (padding, padding)],
        dimension_numbers=("NCHW", "OIHW", "NCHW"),
        feature_group_count=groups)
    mean = jnp.mean(y, axis=(0, 2, 3), keepdims=True)
    var = jnp.var(y, axis=(0, 2, 3), keepdims=True)          # biased
    yn = (y - mean) / jnp.sqrt(var + 1e-5)
    yn = yn * gamma.reshape(1, -1, 1, 1) + beta.reshape(1, -1, 1, 1)
    return jnp.maximum(yn, 0.0)


if __name__ == "__main__":
    # ConvBlock(in_channels=24, out_channels=48, kernel_size=3, stride=1,
    #           padding=1)  -- groups=24 forces channels to be multiples of 24.
    in_channels, out_channels = 24, 48
    kernel_size, stride, padding, groups = 3, 1, 1, 24
    n, h, w = 2, 16, 16

    key = jax.random.PRNGKey(0)
    k1, k2, k3, k4 = jax.random.split(key, 4)
    x = jax.random.normal(k1, (n, in_channels, h, w), jnp.float32)
    weight = 0.1 * jax.random.normal(
        k2, (out_channels, in_channels // groups, kernel_size, kernel_size),
        jnp.float32)
    gamma = 1.0 + 0.1 * jax.random.normal(k3, (out_channels,), jnp.float32)
    beta = 0.1 * jax.random.normal(k4, (out_channels,), jnp.float32)

    out = conv_block_forward(x, weight, gamma, beta,
                             stride=stride, padding=padding, groups=groups)
    out = jax.block_until_ready(out)

    ref = _reference(x, weight, gamma, beta, stride, padding, groups)
    assert out.shape == ref.shape == (n, out_channels, h, w)
    assert float(jnp.max(jnp.abs(out - ref))) < 2e-3, "mismatch vs reference"

    print("KERNEL_OK")
</pallas_src>

<mosaic_0001>
module attributes {stable_mosaic.version = 11 : i64} {
  func.func @_conv_bn_relu_kernel(%arg0: i32, %arg1: memref<2x18x432xf32, #tpu.memory_space<vmem>>, %arg2: memref<18x384xf32, #tpu.memory_space<vmem>>, %arg3: memref<2x384xf32, #tpu.memory_space<vmem>>, %arg4: memref<2x384xf32, #tpu.memory_space<vmem>>, %arg5: memref<4x16x384xf32, #tpu.memory_space<vmem>>) attributes {dimension_semantics = [#tpu.dimension_semantics<arbitrary>], iteration_bounds = array<i64: 1>, scalar_prefetch = 0 : i64, scratch_operands = 0 : i64, tpu.core_type = #tpu.core_type<tc>, window_params = [{pipeline_mode = #tpu.pipeline_mode<synchronous>, transform_indices = @transform_0, window_bounds = array<i64: 2, 18, 432>}, {pipeline_mode = #tpu.pipeline_mode<synchronous>, transform_indices = @transform_1, window_bounds = array<i64: 18, 384>}, {pipeline_mode = #tpu.pipeline_mode<synchronous>, transform_indices = @transform_2, window_bounds = array<i64: 2, 384>}, {pipeline_mode = #tpu.pipeline_mode<synchronous>, transform_indices = @transform_3, window_bounds = array<i64: 2, 384>}, {pipeline_mode = #tpu.pipeline_mode<synchronous>, transform_indices = @transform_4, window_bounds = array<i64: 4, 16, 384>}]} {
    %cst = arith.constant 0.000000e+00 : f32
    %0 = vector.broadcast %cst : f32 to vector<1x384xf32>
    %cst_0 = arith.constant 0.000000e+00 : f32
    %1 = vector.broadcast %cst_0 : f32 to vector<1x384xf32>
    %cst_1 = arith.constant 0.000000e+00 : f32
    %2 = vector.broadcast %cst_1 : f32 to vector<1x384xf32>
    %cst_2 = arith.constant 0.000000e+00 : f32
    %3 = vector.broadcast %cst_2 : f32 to vector<1x384xf32>
    %c0 = arith.constant 0 : index
    %c0_3 = arith.constant 0 : index
    %c0_4 = arith.constant 0 : index
    %4 = vector.load %arg1[%c0, %c0_3, %c0_4] : memref<2x18x432xf32, #tpu.memory_space<vmem>>, vector<1x18x432xf32>
    %5 = vector.shape_cast %4 : vector<1x18x432xf32> to vector<18x432xf32>
    %cst_5 = arith.constant 0.000000e+00 : f32
    %6 = vector.broadcast %cst_5 : f32 to vector<16x384xf32>
    %cst_6 = arith.constant 0.000000e+00 : f32
    %7 = vector.broadcast %cst_6 : f32 to vector<16x384xf32>
    %8 = vector.extract_strided_slice %5 {offsets = [0, 0], sizes = [16, 384], strides = [1, 1]} : vector<18x432xf32> to vector<16x384xf32>
    %c0_7 = arith.constant 0 : index
    %c0_8 = arith.constant 0 : index
    %9 = vector.load %arg2[%c0_7, %c0_8] : memref<18x384xf32, #tpu.memory_space<vmem>>, vector<1x384xf32>
    %10 = vector.broadcast %9 : vector<1x384xf32> to vector<16x384xf32>
    %11 = arith.mulf %8, %10 : vector<16x384xf32>
    %12 = arith.addf %6, %11 : vector<16x384xf32>
    %c9 = arith.constant 9 : index
    %c0_9 = arith.constant 0 : index
    %13 = vector.load %arg2[%c9, %c0_9] : memref<18x384xf32, #tpu.memory_space<vmem>>, vector<1x384xf32>
    %14 = vector.broadcast %13 : vector<1x384xf32> to vector<16x384xf32>
    %15 = arith.mulf %8, %14 : vector<16x384xf32>
    %16 = arith.addf %7, %15 : vector<16x384xf32>
    %17 = vector.extract_strided_slice %5 {offsets = [0, 24], sizes = [16, 384], strides = [1, 1]} : vector<18x432xf32> to vector<16x384xf32>
    %c1 = arith.constant 1 : index
    %c0_10 = arith.constant 0 : index
    %18 = vector.load %arg2[%c1, %c0_10] : memref<18x384xf32, #tpu.memory_space<vmem>>, vector<1x384xf32>
    %19 = vector.broadcast %18 : vector<1x384xf32> to vector<16x384xf32>
    %20 = arith.mulf %17, %19 : vector<16x384xf32>
    %21 = arith.addf %12, %20 : vector<16x384xf32>
    %c10 = arith.constant 10 : index
    %c0_11 = arith.constant 0 : index
    %22 = vector.load %arg2[%c10, %c0_11] : memref<18x384xf32, #tpu.memory_space<vmem>>, vector<1x384xf32>
    %23 = vector.broadcast %22 : vector<1x384xf32> to vector<16x384xf32>
    %24 = arith.mulf %17, %23 : vector<16x384xf32>
    %25 = arith.addf %16, %24 : vector<16x384xf32>
    %26 = vector.extract_strided_slice %5 {offsets = [0, 48], sizes = [16, 384], strides = [1, 1]} : vector<18x432xf32> to vector<16x384xf32>
    %c2 = arith.constant 2 : index
    %c0_12 = arith.constant 0 : index
    %27 = vector.load %arg2[%c2, %c0_12] : memref<18x384xf32, #tpu.memory_space<vmem>>, vector<1x384xf32>
    %28 = vector.broadcast %27 : vector<1x384xf32> to vector<16x384xf32>
    %29 = arith.mulf %26, %28 : vector<16x384xf32>
    %30 = arith.addf %21, %29 : vector<16x384xf32>
    %c11 = arith.constant 11 : index
    %c0_13 = arith.constant 0 : index
    %31 = vector.load %arg2[%c11, %c0_13] : memref<18x384xf32, #tpu.memory_space<vmem>>, vector<1x384xf32>
    %32 = vector.broadcast %31 : vector<1x384xf32> to vector<16x384xf32>
    %33 = arith.mulf %26, %32 : vector<16x384xf32>
    %34 = arith.addf %25, %33 : vector<16x384xf32>
    %35 = vector.extract_strided_slice %5 {offsets = [1, 0], sizes = [16, 384], strides = [1, 1]} : vector<18x432xf32> to vector<16x384xf32>
    %c3 = arith.constant 3 : index
    %c0_14 = arith.constant 0 : index
    %36 = vector.load %arg2[%c3, %c0_14] : memref<18x384xf32, #tpu.memory_space<vmem>>, vector<1x384xf32>
    %37 = vector.broadcast %36 : vector<1x384xf32> to vector<16x384xf32>
    %38 = arith.mulf %35, %37 : vector<16x384xf32>
    %39 = arith.addf %30, %38 : vector<16x384xf32>
    %c12 = arith.constant 12 : index
    %c0_15 = arith.constant 0 : index
    %40 = vector.load %arg2[%c12, %c0_15] : memref<18x384xf32, #tpu.memory_space<vmem>>, vector<1x384xf32>
    %41 = vector.broadcast %40 : vector<1x384xf32> to vector<16x384xf32>
    %42 = arith.mulf %35, %41 : vector<16x384xf32>
    %43 = arith.addf %34, %42 : vector<16x384xf32>
    %44 = vector.extract_strided_slice %5 {offsets = [1, 24], sizes = [16, 384], strides = [1, 1]} : vector<18x432xf32> to vector<16x384xf32>
    %c4 = arith.constant 4 : index
    %c0_16 = arith.constant 0 : index
    %45 = vector.load %arg2[%c4, %c0_16] : memref<18x384xf32, #tpu.memory_space<vmem>>, vector<1x384xf32>
    %46 = vector.broadcast %45 : vector<1x384xf32> to vector<16x384xf32>
    %47 = arith.mulf %44, %46 : vector<16x384xf32>
    %48 = arith.addf %39, %47 : vector<16x384xf32>
    %c13 = arith.constant 13 : index
    %c0_17 = arith.constant 0 : index
    %49 = vector.load %arg2[%c13, %c0_17] : memref<18x384xf32, #tpu.memory_space<vmem>>, vector<1x384xf32>
    %50 = vector.broadcast %49 : vector<1x384xf32> to vector<16x384xf32>
    %51 = arith.mulf %44, %50 : vector<16x384xf32>
    %52 = arith.addf %43, %51 : vector<16x384xf32>
    %53 = vector.extract_strided_slice %5 {offsets = [1, 48], sizes = [16, 384], strides = [1, 1]} : vector<18x432xf32> to vector<16x384xf32>
    %c5 = arith.constant 5 : index
    %c0_18 = arith.constant 0 : index
    %54 = vector.load %arg2[%c5, %c0_18] : memref<18x384xf32, #tpu.memory_space<vmem>>, vector<1x384xf32>
    %55 = vector.broadcast %54 : vector<1x384xf32> to vector<16x384xf32>
    %56 = arith.mulf %53, %55 : vector<16x384xf32>
    %57 = arith.addf %48, %56 : vector<16x384xf32>
    %c14 = arith.constant 14 : index
    %c0_19 = arith.constant 0 : index
    %58 = vector.load %arg2[%c14, %c0_19] : memref<18x384xf32, #tpu.memory_space<vmem>>, vector<1x384xf32>
    %59 = vector.broadcast %58 : vector<1x384xf32> to vector<16x384xf32>
    %60 = arith.mulf %53, %59 : vector<16x384xf32>
    %61 = arith.addf %52, %60 : vector<16x384xf32>
    %62 = vector.extract_strided_slice %5 {offsets = [2, 0], sizes = [16, 384], strides = [1, 1]} : vector<18x432xf32> to vector<16x384xf32>
    %c6 = arith.constant 6 : index
    %c0_20 = arith.constant 0 : index
    %63 = vector.load %arg2[%c6, %c0_20] : memref<18x384xf32, #tpu.memory_space<vmem>>, vector<1x384xf32>
    %64 = vector.broadcast %63 : vector<1x384xf32> to vector<16x384xf32>
    %65 = arith.mulf %62, %64 : vector<16x384xf32>
    %66 = arith.addf %57, %65 : vector<16x384xf32>
    %c15 = arith.constant 15 : index
    %c0_21 = arith.constant 0 : index
    %67 = vector.load %arg2[%c15, %c0_21] : memref<18x384xf32, #tpu.memory_space<vmem>>, vector<1x384xf32>
    %68 = vector.broadcast %67 : vector<1x384xf32> to vector<16x384xf32>
    %69 = arith.mulf %62, %68 : vector<16x384xf32>
    %70 = arith.addf %61, %69 : vector<16x384xf32>
    %71 = vector.extract_strided_slice %5 {offsets = [2, 24], sizes = [16, 384], strides = [1, 1]} : vector<18x432xf32> to vector<16x384xf32>
    %c7 = arith.constant 7 : index
    %c0_22 = arith.constant 0 : index
    %72 = vector.load %arg2[%c7, %c0_22] : memref<18x384xf32, #tpu.memory_space<vmem>>, vector<1x384xf32>
    %73 = vector.broadcast %72 : vector<1x384xf32> to vector<16x384xf32>
    %74 = arith.mulf %71, %73 : vector<16x384xf32>
    %75 = arith.addf %66, %74 : vector<16x384xf32>
    %c16 = arith.constant 16 : index
    %c0_23 = arith.constant 0 : index
    %76 = vector.load %arg2[%c16, %c0_23] : memref<18x384xf32, #tpu.memory_space<vmem>>, vector<1x384xf32>
    %77 = vector.broadcast %76 : vector<1x384xf32> to vector<16x384xf32>
    %78 = arith.mulf %71, %77 : vector<16x384xf32>
    %79 = arith.addf %70, %78 : vector<16x384xf32>
    %80 = vector.extract_strided_slice %5 {offsets = [2, 48], sizes = [16, 384], strides = [1, 1]} : vector<18x432xf32> to vector<16x384xf32>
    %c8 = arith.constant 8 : index
    %c0_24 = arith.constant 0 : index
    %81 = vector.load %arg2[%c8, %c0_24] : memref<18x384xf32, #tpu.memory_space<vmem>>, vector<1x384xf32>
    %82 = vector.broadcast %81 : vector<1x384xf32> to vector<16x384xf32>
    %83 = arith.mulf %80, %82 : vector<16x384xf32>
    %84 = arith.addf %75, %83 : vector<16x384xf32>
    %c17 = arith.constant 17 : index
    %c0_25 = arith.constant 0 : index
    %85 = vector.load %arg2[%c17, %c0_25] : memref<18x384xf32, #tpu.memory_space<vmem>>, vector<1x384xf32>
    %86 = vector.broadcast %85 : vector<1x384xf32> to vector<16x384xf32>
    %87 = arith.mulf %80, %86 : vector<16x384xf32>
    %88 = arith.addf %79, %87 : vector<16x384xf32>
    %c0_26 = arith.constant 0 : index
    %c0_27 = arith.constant 0 : index
    %c0_28 = arith.constant 0 : index
    %89 = vector.load %arg5[%c0_26, %c0_27, %c0_28] : memref<4x16x384xf32, #tpu.memory_space<vmem>>, vector<1x16x384xf32>
    %90 = vector.shape_cast %89 : vector<1x16x384xf32> to vector<16x384xf32>
    %91 = vector.shape_cast %84 : vector<16x384xf32> to vector<1x16x384xf32>
    tpu.vector_store %arg5[%c0_26, %c0_27, %c0_28], %91 {strides = array<i32>} : memref<4x16x384xf32, #tpu.memory_space<vmem>>, vector<1x16x384xf32>,
    %cst_29 = arith.constant dense<0.000000e+00> : vector<384xf32>
    %92 = vector.multi_reduction <add>, %84, %cst_29 [0] : vector<16x384xf32> to vector<384xf32>
    %93 = vector.shape_cast %92 : vector<384xf32> to vector<1x384xf32>
    %94 = arith.addf %0, %93 : vector<1x384xf32>
    %95 = arith.mulf %84, %84 : vector<16x384xf32>
    %cst_30 = arith.constant dense<0.000000e+00> : vector<384xf32>
    %96 = vector.multi_reduction <add>, %95, %cst_30 [0] : vector<16x384xf32> to vector<384xf32>
    %97 = vector.shape_cast %96 : vector<384xf32> to vector<1x384xf32>
    %98 = arith.addf %2, %97 : vector<1x384xf32>
    %c1_31 = arith.constant 1 : index
    %c0_32 = arith.constant 0 : index
    %c0_33 = arith.constant 0 : index
    %99 = vector.load %arg5[%c1_31, %c0_32, %c0_33] : memref<4x16x384xf32, #tpu.memory_space<vmem>>, vector<1x16x384xf32>
    %100 = vector.shape_cast %99 : vector<1x16x384xf32> to vector<16x384xf32>
    %101 = vector.shape_cast %88 : vector<16x384xf32> to vector<1x16x384xf32>
    tpu.vector_store %arg5[%c1_31, %c0_32, %c0_33], %101 {strides = array<i32>} : memref<4x16x384xf32, #tpu.memory_space<vmem>>, vector<1x16x384xf32>,
    %cst_34 = arith.constant dense<0.000000e+00> : vector<384xf32>
    %102 = vector.multi_reduction <add>, %88, %cst_34 [0] : vector<16x384xf32> to vector<384xf32>
    %103 = vector.shape_cast %102 : vector<384xf32> to vector<1x384xf32>
    %104 = arith.addf %1, %103 : vector<1x384xf32>
    %105 = arith.mulf %88, %88 : vector<16x384xf32>
    %cst_35 = arith.constant dense<0.000000e+00> : vector<384xf32>
    %106 = vector.multi_reduction <add>, %105, %cst_35 [0] : vector<16x384xf32> to vector<384xf32>
    %107 = vector.shape_cast %106 : vector<384xf32> to vector<1x384xf32>
    %108 = arith.addf %3, %107 : vector<1x384xf32>
    %c1_36 = arith.constant 1 : index
    %c0_37 = arith.constant 0 : index
    %c0_38 = arith.constant 0 : index
    %109 = vector.load %arg1[%c1_36, %c0_37, %c0_38] : memref<2x18x432xf32, #tpu.memory_space<vmem>>, vector<1x18x432xf32>
    %110 = vector.shape_cast %109 : vector<1x18x432xf32> to vector<18x432xf32>
    %cst_39 = arith.constant 0.000000e+00 : f32
    %111 = vector.broadcast %cst_39 : f32 to vector<16x384xf32>
    %cst_40 = arith.constant 0.000000e+00 : f32
    %112 = vector.broadcast %cst_40 : f32 to vector<16x384xf32>
    %113 = vector.extract_strided_slice %110 {offsets = [0, 0], sizes = [16, 384], strides = [1, 1]} : vector<18x432xf32> to vector<16x384xf32>
    %c0_41 = arith.constant 0 : index
    %c0_42 = arith.constant 0 : index
    %114 = vector.load %arg2[%c0_41, %c0_42] : memref<18x384xf32, #tpu.memory_space<vmem>>, vector<1x384xf32>
    %115 = vector.broadcast %114 : vector<1x384xf32> to vector<16x384xf32>
    %116 = arith.mulf %113, %115 : vector<16x384xf32>
    %117 = arith.addf %111, %116 : vector<16x384xf32>
    %c9_43 = arith.constant 9 : index
    %c0_44 = arith.constant 0 : index
    %118 = vector.load %arg2[%c9_43, %c0_44] : memref<18x384xf32, #tpu.memory_space<vmem>>, vector<1x384xf32>
    %119 = vector.broadcast %118 : vector<1x384xf32> to vector<16x384xf32>
    %120 = arith.mulf %113, %119 : vector<16x384xf32>
    %121 = arith.addf %112, %120 : vector<16x384xf32>
    %122 = vector.extract_strided_slice %110 {offsets = [0, 24], sizes = [16, 384], strides = [1, 1]} : vector<18x432xf32> to vector<16x384xf32>
    %c1_45 = arith.constant 1 : index
    %c0_46 = arith.constant 0 : index
    %123 = vector.load %arg2[%c1_45, %c0_46] : memref<18x384xf32, #tpu.memory_space<vmem>>, vector<1x384xf32>
    %124 = vector.broadcast %123 : vector<1x384xf32> to vector<16x384xf32>
    %125 = arith.mulf %122, %124 : vector<16x384xf32>
    %126 = arith.addf %117, %125 : vector<16x384xf32>
    %c10_47 = arith.constant 10 : index
    %c0_48 = arith.constant 0 : index
    %127 = vector.load %arg2[%c10_47, %c0_48] : memref<18x384xf32, #tpu.memory_space<vmem>>, vector<1x384xf32>
    %128 = vector.broadcast %127 : vector<1x384xf32> to vector<16x384xf32>
    %129 = arith.mulf %122, %128 : vector<16x384xf32>
    %130 = arith.addf %121, %129 : vector<16x384xf32>
    %131 = vector.extract_strided_slice %110 {offsets = [0, 48], sizes = [16, 384], strides = [1, 1]} : vector<18x432xf32> to vector<16x384xf32>
    %c2_49 = arith.constant 2 : index
    %c0_50 = arith.constant 0 : index
    %132 = vector.load %arg2[%c2_49, %c0_50] : memref<18x384xf32, #tpu.memory_space<vmem>>, vector<1x384xf32>
    %133 = vector.broadcast %132 : vector<1x384xf32> to vector<16x384xf32>
    %134 = arith.mulf %131, %133 : vector<16x384xf32>
    %135 = arith.addf %126, %134 : vector<16x384xf32>
    %c11_51 = arith.constant 11 : index
    %c0_52 = arith.constant 0 : index
    %136 = vector.load %arg2[%c11_51, %c0_52] : memref<18x384xf32, #tpu.memory_space<vmem>>, vector<1x384xf32>
    %137 = vector.broadcast %136 : vector<1x384xf32> to vector<16x384xf32>
    %138 = arith.mulf %131, %137 : vector<16x384xf32>
    %139 = arith.addf %130, %138 : vector<16x384xf32>
    %140 = vector.extract_strided_slice %110 {offsets = [1, 0], sizes = [16, 384], strides = [1, 1]} : vector<18x432xf32> to vector<16x384xf32>
    %c3_53 = arith.constant 3 : index
    %c0_54 = arith.constant 0 : index
    %141 = vector.load %arg2[%c3_53, %c0_54] : memref<18x384xf32, #tpu.memory_space<vmem>>, vector<1x384xf32>
    %142 = vector.broadcast %141 : vector<1x384xf32> to vector<16x384xf32>
    %143 = arith.mulf %140, %142 : vector<16x384xf32>
    %144 = arith.addf %135, %143 : vector<16x384xf32>
    %c12_55 = arith.constant 12 : index
    %c0_56 = arith.constant 0 : index
    %145 = vector.load %arg2[%c12_55, %c0_56] : memref<18x384xf32, #tpu.memory_space<vmem>>, vector<1x384xf32>
    %146 = vector.broadcast %145 : vector<1x384xf32> to vector<16x384xf32>
    %147 = arith.mulf %140, %146 : vector<16x384xf32>
    %148 = arith.addf %139, %147 : vector<16x384xf32>
    %149 = vector.extract_strided_slice %110 {offsets = [1, 24], sizes = [16, 384], strides = [1, 1]} : vector<18x432xf32> to vector<16x384xf32>
    %c4_57 = arith.constant 4 : index
    %c0_58 = arith.constant 0 : index
    %150 = vector.load %arg2[%c4_57, %c0_58] : memref<18x384xf32, #tpu.memory_space<vmem>>, vector<1x384xf32>
    %151 = vector.broadcast %150 : vector<1x384xf32> to vector<16x384xf32>
    %152 = arith.mulf %149, %151 : vector<16x384xf32>
    %153 = arith.addf %144, %152 : vector<16x384xf32>
    %c13_59 = arith.constant 13 : index
    %c0_60 = arith.constant 0 : index
    %154 = vector.load %arg2[%c13_59, %c0_60] : memref<18x384xf32, #tpu.memory_space<vmem>>, vector<1x384xf32>
    %155 = vector.broadcast %154 : vector<1x384xf32> to vector<16x384xf32>
    %156 = arith.mulf %149, %155 : vector<16x384xf32>
    %157 = arith.addf %148, %156 : vector<16x384xf32>
    %158 = vector.extract_strided_slice %110 {offsets = [1, 48], sizes = [16, 384], strides = [1, 1]} : vector<18x432xf32> to vector<16x384xf32>
    %c5_61 = arith.constant 5 : index
    %c0_62 = arith.constant 0 : index
    %159 = vector.load %arg2[%c5_61, %c0_62] : memref<18x384xf32, #tpu.memory_space<vmem>>, vector<1x384xf32>
    %160 = vector.broadcast %159 : vector<1x384xf32> to vector<16x384xf32>
    %161 = arith.mulf %158, %160 : vector<16x384xf32>
    %162 = arith.addf %153, %161 : vector<16x384xf32>
    %c14_63 = arith.constant 14 : index
    %c0_64 = arith.constant 0 : index
    %163 = vector.load %arg2[%c14_63, %c0_64] : memref<18x384xf32, #tpu.memory_space<vmem>>, vector<1x384xf32>
    %164 = vector.broadcast %163 : vector<1x384xf32> to vector<16x384xf32>
    %165 = arith.mulf %158, %164 : vector<16x384xf32>
    %166 = arith.addf %157, %165 : vector<16x384xf32>
    %167 = vector.extract_strided_slice %110 {offsets = [2, 0], sizes = [16, 384], strides = [1, 1]} : vector<18x432xf32> to vector<16x384xf32>
    %c6_65 = arith.constant 6 : index
    %c0_66 = arith.constant 0 : index
    %168 = vector.load %arg2[%c6_65, %c0_66] : memref<18x384xf32, #tpu.memory_space<vmem>>, vector<1x384xf32>
    %169 = vector.broadcast %168 : vector<1x384xf32> to vector<16x384xf32>
    %170 = arith.mulf %167, %169 : vector<16x384xf32>
    %171 = arith.addf %162, %170 : vector<16x384xf32>
    %c15_67 = arith.constant 15 : index
    %c0_68 = arith.constant 0 : index
    %172 = vector.load %arg2[%c15_67, %c0_68] : memref<18x384xf32, #tpu.memory_space<vmem>>, vector<1x384xf32>
    %173 = vector.broadcast %172 : vector<1x384xf32> to vector<16x384xf32>
    %174 = arith.mulf %167, %173 : vector<16x384xf32>
    %175 = arith.addf %166, %174 : vector<16x384xf32>
    %176 = vector.extract_strided_slice %110 {offsets = [2, 24], sizes = [16, 384], strides = [1, 1]} : vector<18x432xf32> to vector<16x384xf32>
    %c7_69 = arith.constant 7 : index
    %c0_70 = arith.constant 0 : index
    %177 = vector.load %arg2[%c7_69, %c0_70] : memref<18x384xf32, #tpu.memory_space<vmem>>, vector<1x384xf32>
    %178 = vector.broadcast %177 : vector<1x384xf32> to vector<16x384xf32>
    %179 = arith.mulf %176, %178 : vector<16x384xf32>
    %180 = arith.addf %171, %179 : vector<16x384xf32>
    %c16_71 = arith.constant 16 : index
    %c0_72 = arith.constant 0 : index
    %181 = vector.load %arg2[%c16_71, %c0_72] : memref<18x384xf32, #tpu.memory_space<vmem>>, vector<1x384xf32>
    %182 = vector.broadcast %181 : vector<1x384xf32> to vector<16x384xf32>
    %183 = arith.mulf %176, %182 : vector<16x384xf32>
    %184 = arith.addf %175, %183 : vector<16x384xf32>
    %185 = vector.extract_strided_slice %110 {offsets = [2, 48], sizes = [16, 384], strides = [1, 1]} : vector<18x432xf32> to vector<16x384xf32>
    %c8_73 = arith.constant 8 : index
    %c0_74 = arith.constant 0 : index
    %186 = vector.load %arg2[%c8_73, %c0_74] : memref<18x384xf32, #tpu.memory_space<vmem>>, vector<1x384xf32>
    %187 = vector.broadcast %186 : vector<1x384xf32> to vector<16x384xf32>
    %188 = arith.mulf %185, %187 : vector<16x384xf32>
    %189 = arith.addf %180, %188 : vector<16x384xf32>
    %c17_75 = arith.constant 17 : index
    %c0_76 = arith.constant 0 : index
    %190 = vector.load %arg2[%c17_75, %c0_76] : memref<18x384xf32, #tpu.memory_space<vmem>>, vector<1x384xf32>
    %191 = vector.broadcast %190 : vector<1x384xf32> to vector<16x384xf32>
    %192 = arith.mulf %185, %191 : vector<16x384xf32>
    %193 = arith.addf %184, %192 : vector<16x384xf32>
    %c2_77 = arith.constant 2 : index
    %c0_78 = arith.constant 0 : index
    %c0_79 = arith.constant 0 : index
    %194 = vector.load %arg5[%c2_77, %c0_78, %c0_79] : memref<4x16x384xf32, #tpu.memory_space<vmem>>, vector<1x16x384xf32>
    %195 = vector.shape_cast %194 : vector<1x16x384xf32> to vector<16x384xf32>
    %196 = vector.shape_cast %189 : vector<16x384xf32> to vector<1x16x384xf32>
    tpu.vector_store %arg5[%c2_77, %c0_78, %c0_79], %196 {strides = array<i32>} : memref<4x16x384xf32, #tpu.memory_space<vmem>>, vector<1x16x384xf32>,
    %cst_80 = arith.constant dense<0.000000e+00> : vector<384xf32>
    %197 = vector.multi_reduction <add>, %189, %cst_80 [0] : vector<16x384xf32> to vector<384xf32>
    %198 = vector.shape_cast %197 : vector<384xf32> to vector<1x384xf32>
    %199 = arith.addf %94, %198 : vector<1x384xf32>
    %200 = arith.mulf %189, %189 : vector<16x384xf32>
    %cst_81 = arith.constant dense<0.000000e+00> : vector<384xf32>
    %201 = vector.multi_reduction <add>, %200, %cst_81 [0] : vector<16x384xf32> to vector<384xf32>
    %202 = vector.shape_cast %201 : vector<384xf32> to vector<1x384xf32>
    %203 = arith.addf %98, %202 : vector<1x384xf32>
    %c3_82 = arith.constant 3 : index
    %c0_83 = arith.constant 0 : index
    %c0_84 = arith.constant 0 : index
    %204 = vector.load %arg5[%c3_82, %c0_83, %c0_84] : memref<4x16x384xf32, #tpu.memory_space<vmem>>, vector<1x16x384xf32>
    %205 = vector.shape_cast %204 : vector<1x16x384xf32> to vector<16x384xf32>
    %206 = vector.shape_cast %193 : vector<16x384xf32> to vector<1x16x384xf32>
    tpu.vector_store %arg5[%c3_82, %c0_83, %c0_84], %206 {strides = array<i32>} : memref<4x16x384xf32, #tpu.memory_space<vmem>>, vector<1x16x384xf32>,
    %cst_85 = arith.constant dense<0.000000e+00> : vector<384xf32>
    %207 = vector.multi_reduction <add>, %193, %cst_85 [0] : vector<16x384xf32> to vector<384xf32>
    %208 = vector.shape_cast %207 : vector<384xf32> to vector<1x384xf32>
    %209 = arith.addf %104, %208 : vector<1x384xf32>
    %210 = arith.mulf %193, %193 : vector<16x384xf32>
    %cst_86 = arith.constant dense<0.000000e+00> : vector<384xf32>
    %211 = vector.multi_reduction <add>, %210, %cst_86 [0] : vector<16x384xf32> to vector<384xf32>
    %212 = vector.shape_cast %211 : vector<384xf32> to vector<1x384xf32>
    %213 = arith.addf %108, %212 : vector<1x384xf32>
    %c24_i32 = arith.constant 24 : i32
    %214 = tpu.dynamic_rotate %199 by %c24_i32 dim 1 : vector<1x384xf32>, i32 -> vector<1x384xf32>
    %215 = arith.addf %199, %214 : vector<1x384xf32>
    %c48_i32 = arith.constant 48 : i32
    %216 = tpu.dynamic_rotate %215 by %c48_i32 dim 1 : vector<1x384xf32>, i32 -> vector<1x384xf32>
    %217 = arith.addf %215, %216 : vector<1x384xf32>
    %c96_i32 = arith.constant 96 : i32
    %218 = tpu.dynamic_rotate %217 by %c96_i32 dim 1 : vector<1x384xf32>, i32 -> vector<1x384xf32>
    %219 = arith.addf %217, %218 : vector<1x384xf32>
    %c192_i32 = arith.constant 192 : i32
    %220 = tpu.dynamic_rotate %219 by %c192_i32 dim 1 : vector<1x384xf32>, i32 -> vector<1x384xf32>
    %221 = arith.addf %219, %220 : vector<1x384xf32>
    %cst_87 = arith.constant 0.001953125 : f32
    %222 = vector.broadcast %cst_87 : f32 to vector<1x384xf32>
    %223 = arith.mulf %221, %222 : vector<1x384xf32>
    %c24_i32_88 = arith.constant 24 : i32
    %224 = tpu.dynamic_rotate %203 by %c24_i32_88 dim 1 : vector<1x384xf32>, i32 -> vector<1x384xf32>
    %225 = arith.addf %203, %224 : vector<1x384xf32>
    %c48_i32_89 = arith.constant 48 : i32
    %226 = tpu.dynamic_rotate %225 by %c48_i32_89 dim 1 : vector<1x384xf32>, i32 -> vector<1x384xf32>
    %227 = arith.addf %225, %226 : vector<1x384xf32>
    %c96_i32_90 = arith.constant 96 : i32
    %228 = tpu.dynamic_rotate %227 by %c96_i32_90 dim 1 : vector<1x384xf32>, i32 -> vector<1x384xf32>
    %229 = arith.addf %227, %228 : vector<1x384xf32>
    %c192_i32_91 = arith.constant 192 : i32
    %230 = tpu.dynamic_rotate %229 by %c192_i32_91 dim 1 : vector<1x384xf32>, i32 -> vector<1x384xf32>
    %231 = arith.addf %229, %230 : vector<1x384xf32>
    %cst_92 = arith.constant 0.001953125 : f32
    %232 = vector.broadcast %cst_92 : f32 to vector<1x384xf32>
    %233 = arith.mulf %231, %232 : vector<1x384xf32>
    %234 = arith.mulf %223, %223 : vector<1x384xf32>
    %235 = arith.subf %233, %234 : vector<1x384xf32>
    %cst_93 = arith.constant 0.000000e+00 : f32
    %236 = vector.broadcast %cst_93 : f32 to vector<1x384xf32>
    %237 = arith.maximumf %235, %236 : vector<1x384xf32>
    %cst_94 = arith.constant 9.99999974E-6 : f32
    %238 = vector.broadcast %cst_94 : f32 to vector<1x384xf32>
    %239 = arith.addf %237, %238 : vector<1x384xf32>
    %240 = math.rsqrt %239 : vector<1x384xf32>
    %c0_95 = arith.constant 0 : index
    %c0_96 = arith.constant 0 : index
    %241 = vector.load %arg3[%c0_95, %c0_96] : memref<2x384xf32, #tpu.memory_space<vmem>>, vector<1x384xf32>
    %242 = arith.mulf %241, %240 : vector<1x384xf32>
    %c0_97 = arith.constant 0 : index
    %c0_98 = arith.constant 0 : index
    %243 = vector.load %arg4[%c0_97, %c0_98] : memref<2x384xf32, #tpu.memory_space<vmem>>, vector<1x384xf32>
    %244 = arith.mulf %223, %242 : vector<1x384xf32>
    %245 = arith.subf %243, %244 : vector<1x384xf32>
    %c0_99 = arith.constant 0 : index
    %c0_100 = arith.constant 0 : index
    %c0_101 = arith.constant 0 : index
    %246 = vector.load %arg5[%c0_99, %c0_100, %c0_101] : memref<4x16x384xf32, #tpu.memory_space<vmem>>, vector<1x16x384xf32>
    %247 = vector.shape_cast %246 : vector<1x16x384xf32> to vector<16x384xf32>
    %248 = vector.broadcast %242 : vector<1x384xf32> to vector<16x384xf32>
    %249 = arith.mulf %247, %248 : vector<16x384xf32>
    %250 = vector.broadcast %245 : vector<1x384xf32> to vector<16x384xf32>
    %251 = arith.addf %249, %250 : vector<16x384xf32>
    %cst_102 = arith.constant 0.000000e+00 : f32
    %252 = vector.broadcast %cst_102 : f32 to vector<16x384xf32>
    %253 = arith.maximumf %251, %252 : vector<16x384xf32>
    %c0_103 = arith.constant 0 : index
    %c0_104 = arith.constant 0 : index
    %c0_105 = arith.constant 0 : index
    %254 = vector.load %arg5[%c0_103, %c0_104, %c0_105] : memref<4x16x384xf32, #tpu.memory_space<vmem>>, vector<1x16x384xf32>
    %255 = vector.shape_cast %254 : vector<1x16x384xf32> to vector<16x384xf32>
    %256 = vector.shape_cast %253 : vector<16x384xf32> to vector<1x16x384xf32>
    tpu.vector_store %arg5[%c0_103, %c0_104, %c0_105], %256 {strides = array<i32>} : memref<4x16x384xf32, #tpu.memory_space<vmem>>, vector<1x16x384xf32>,
    %c2_106 = arith.constant 2 : index
    %c0_107 = arith.constant 0 : index
    %c0_108 = arith.constant 0 : index
    %257 = vector.load %arg5[%c2_106, %c0_107, %c0_108] : memref<4x16x384xf32, #tpu.memory_space<vmem>>, vector<1x16x384xf32>
    %258 = vector.shape_cast %257 : vector<1x16x384xf32> to vector<16x384xf32>
    %259 = vector.broadcast %242 : vector<1x384xf32> to vector<16x384xf32>
    %260 = arith.mulf %258, %259 : vector<16x384xf32>
    %261 = vector.broadcast %245 : vector<1x384xf32> to vector<16x384xf32>
    %262 = arith.addf %260, %261 : vector<16x384xf32>
    %cst_109 = arith.constant 0.000000e+00 : f32
    %263 = vector.broadcast %cst_109 : f32 to vector<16x384xf32>
    %264 = arith.maximumf %262, %263 : vector<16x384xf32>
    %c2_110 = arith.constant 2 : index
    %c0_111 = arith.constant 0 : index
    %c0_112 = arith.constant 0 : index
    %265 = vector.load %arg5[%c2_110, %c0_111, %c0_112] : memref<4x16x384xf32, #tpu.memory_space<vmem>>, vector<1x16x384xf32>
    %266 = vector.shape_cast %265 : vector<1x16x384xf32> to vector<16x384xf32>
    %267 = vector.shape_cast %264 : vector<16x384xf32> to vector<1x16x384xf32>
    tpu.vector_store %arg5[%c2_110, %c0_111, %c0_112], %267 {strides = array<i32>} : memref<4x16x384xf32, #tpu.memory_space<vmem>>, vector<1x16x384xf32>,
    %c24_i32_113 = arith.constant 24 : i32
    %268 = tpu.dynamic_rotate %209 by %c24_i32_113 dim 1 : vector<1x384xf32>, i32 -> vector<1x384xf32>
    %269 = arith.addf %209, %268 : vector<1x384xf32>
    %c48_i32_114 = arith.constant 48 : i32
    %270 = tpu.dynamic_rotate %269 by %c48_i32_114 dim 1 : vector<1x384xf32>, i32 -> vector<1x384xf32>
    %271 = arith.addf %269, %270 : vector<1x384xf32>
    %c96_i32_115 = arith.constant 96 : i32
    %272 = tpu.dynamic_rotate %271 by %c96_i32_115 dim 1 : vector<1x384xf32>, i32 -> vector<1x384xf32>
    %273 = arith.addf %271, %272 : vector<1x384xf32>
    %c192_i32_116 = arith.constant 192 : i32
    %274 = tpu.dynamic_rotate %273 by %c192_i32_116 dim 1 : vector<1x384xf32>, i32 -> vector<1x384xf32>
    %275 = arith.addf %273, %274 : vector<1x384xf32>
    %cst_117 = arith.constant 0.001953125 : f32
    %276 = vector.broadcast %cst_117 : f32 to vector<1x384xf32>
    %277 = arith.mulf %275, %276 : vector<1x384xf32>
    %c24_i32_118 = arith.constant 24 : i32
    %278 = tpu.dynamic_rotate %213 by %c24_i32_118 dim 1 : vector<1x384xf32>, i32 -> vector<1x384xf32>
    %279 = arith.addf %213, %278 : vector<1x384xf32>
    %c48_i32_119 = arith.constant 48 : i32
    %280 = tpu.dynamic_rotate %279 by %c48_i32_119 dim 1 : vector<1x384xf32>, i32 -> vector<1x384xf32>
    %281 = arith.addf %279, %280 : vector<1x384xf32>
    %c96_i32_120 = arith.constant 96 : i32
    %282 = tpu.dynamic_rotate %281 by %c96_i32_120 dim 1 : vector<1x384xf32>, i32 -> vector<1x384xf32>
    %283 = arith.addf %281, %282 : vector<1x384xf32>
    %c192_i32_121 = arith.constant 192 : i32
    %284 = tpu.dynamic_rotate %283 by %c192_i32_121 dim 1 : vector<1x384xf32>, i32 -> vector<1x384xf32>
    %285 = arith.addf %283, %284 : vector<1x384xf32>
    %cst_122 = arith.constant 0.001953125 : f32
    %286 = vector.broadcast %cst_122 : f32 to vector<1x384xf32>
    %287 = arith.mulf %285, %286 : vector<1x384xf32>
    %288 = arith.mulf %277, %277 : vector<1x384xf32>
    %289 = arith.subf %287, %288 : vector<1x384xf32>
    %cst_123 = arith.constant 0.000000e+00 : f32
    %290 = vector.broadcast %cst_123 : f32 to vector<1x384xf32>
    %291 = arith.maximumf %289, %290 : vector<1x384xf32>
    %cst_124 = arith.constant 9.99999974E-6 : f32
    %292 = vector.broadcast %cst_124 : f32 to vector<1x384xf32>
    %293 = arith.addf %291, %292 : vector<1x384xf32>
    %294 = math.rsqrt %293 : vector<1x384xf32>
    %c1_125 = arith.constant 1 : index
    %c0_126 = arith.constant 0 : index
    %295 = vector.load %arg3[%c1_125, %c0_126] : memref<2x384xf32, #tpu.memory_space<vmem>>, vector<1x384xf32>
    %296 = arith.mulf %295, %294 : vector<1x384xf32>
    %c1_127 = arith.constant 1 : index
    %c0_128 = arith.constant 0 : index
    %297 = vector.load %arg4[%c1_127, %c0_128] : memref<2x384xf32, #tpu.memory_space<vmem>>, vector<1x384xf32>
    %298 = arith.mulf %277, %296 : vector<1x384xf32>
    %299 = arith.subf %297, %298 : vector<1x384xf32>
    %c1_129 = arith.constant 1 : index
    %c0_130 = arith.constant 0 : index
    %c0_131 = arith.constant 0 : index
    %300 = vector.load %arg5[%c1_129, %c0_130, %c0_131] : memref<4x16x384xf32, #tpu.memory_space<vmem>>, vector<1x16x384xf32>
    %301 = vector.shape_cast %300 : vector<1x16x384xf32> to vector<16x384xf32>
    %302 = vector.broadcast %296 : vector<1x384xf32> to vector<16x384xf32>
    %303 = arith.mulf %301, %302 : vector<16x384xf32>
    %304 = vector.broadcast %299 : vector<1x384xf32> to vector<16x384xf32>
    %305 = arith.addf %303, %304 : vector<16x384xf32>
    %cst_132 = arith.constant 0.000000e+00 : f32
    %306 = vector.broadcast %cst_132 : f32 to vector<16x384xf32>
    %307 = arith.maximumf %305, %306 : vector<16x384xf32>
    %c1_133 = arith.constant 1 : index
    %c0_134 = arith.constant 0 : index
    %c0_135 = arith.constant 0 : index
    %308 = vector.load %arg5[%c1_133, %c0_134, %c0_135] : memref<4x16x384xf32, #tpu.memory_space<vmem>>, vector<1x16x384xf32>
    %309 = vector.shape_cast %308 : vector<1x16x384xf32> to vector<16x384xf32>
    %310 = vector.shape_cast %307 : vector<16x384xf32> to vector<1x16x384xf32>
    tpu.vector_store %arg5[%c1_133, %c0_134, %c0_135], %310 {strides = array<i32>} : memref<4x16x384xf32, #tpu.memory_space<vmem>>, vector<1x16x384xf32>,
    %c3_136 = arith.constant 3 : index
    %c0_137 = arith.constant 0 : index
    %c0_138 = arith.constant 0 : index
    %311 = vector.load %arg5[%c3_136, %c0_137, %c0_138] : memref<4x16x384xf32, #tpu.memory_space<vmem>>, vector<1x16x384xf32>
    %312 = vector.shape_cast %311 : vector<1x16x384xf32> to vector<16x384xf32>
    %313 = vector.broadcast %296 : vector<1x384xf32> to vector<16x384xf32>
    %314 = arith.mulf %312, %313 : vector<16x384xf32>
    %315 = vector.broadcast %299 : vector<1x384xf32> to vector<16x384xf32>
    %316 = arith.addf %314, %315 : vector<16x384xf32>
    %cst_139 = arith.constant 0.000000e+00 : f32
    %317 = vector.broadcast %cst_139 : f32 to vector<16x384xf32>
    %318 = arith.maximumf %316, %317 : vector<16x384xf32>
    %c3_140 = arith.constant 3 : index
    %c0_141 = arith.constant 0 : index
    %c0_142 = arith.constant 0 : index
    %319 = vector.load %arg5[%c3_140, %c0_141, %c0_142] : memref<4x16x384xf32, #tpu.memory_space<vmem>>, vector<1x16x384xf32>
    %320 = vector.shape_cast %319 : vector<1x16x384xf32> to vector<16x384xf32>
    %321 = vector.shape_cast %318 : vector<16x384xf32> to vector<1x16x384xf32>
    tpu.vector_store %arg5[%c3_140, %c0_141, %c0_142], %321 {strides = array<i32>} : memref<4x16x384xf32, #tpu.memory_space<vmem>>, vector<1x16x384xf32>,
    return
  }
  func.func @transform_0(%arg0: i32) -> (i32, i32, i32) {
    %c0_i32 = arith.constant 0 : i32
    %c0_i32_0 = arith.constant 0 : i32
    %c0_i32_1 = arith.constant 0 : i32
    %c0_i32_2 = arith.constant 0 : i32
    return %c0_i32, %c0_i32_0, %c0_i32_1 : i32, i32, i32
  }
  func.func @transform_1(%arg0: i32) -> (i32, i32) {
    %c0_i32 = arith.constant 0 : i32
    %c0_i32_0 = arith.constant 0 : i32
    %c0_i32_1 = arith.constant 0 : i32
    return %c0_i32, %c0_i32_0 : i32, i32
  }
  func.func @transform_2(%arg0: i32) -> (i32, i32) {
    %c0_i32 = arith.constant 0 : i32
    %c0_i32_0 = arith.constant 0 : i32
    %c0_i32_1 = arith.constant 0 : i32
    return %c0_i32, %c0_i32_0 : i32, i32
  }
  func.func @transform_3(%arg0: i32) -> (i32, i32) {
    %c0_i32 = arith.constant 0 : i32
    %c0_i32_0 = arith.constant 0 : i32
    %c0_i32_1 = arith.constant 0 : i32
    return %c0_i32, %c0_i32_0 : i32, i32
  }
  func.func @transform_4(%arg0: i32) -> (i32, i32, i32) {
    %c0_i32 = arith.constant 0 : i32
    %c0_i32_0 = arith.constant 0 : i32
    %c0_i32_1 = arith.constant 0 : i32
    %c0_i32_2 = arith.constant 0 : i32
    return %c0_i32, %c0_i32_0, %c0_i32_1 : i32, i32, i32
  }
}

</mosaic_0001>

<bundles_post_ra>
// kernel: tpu_custom_call.1
= control target key start
LH: loop header
LB: loop body
LE: loop exit
PB: predicated region body
PF: predicated region fallthrough
CT: control target
= control target key end

     0   :  { %s3497_s19 = smov 24   ;;  %s6065_s0 = inlined_call_operand.vmem [shape: f32[2,18,432], index: 0, kind: input, shape index: {}]   ;;  %s6066_s1 = inlined_call_operand.vmem [shape: f32[18,384], index: 1, kind: input, shape index: {}]   ;;  %s6067_s2 = inlined_call_operand.vmem [shape: f32[2,384], index: 2, kind: input, shape index: {}]   ;;  %s6068_s3 = inlined_call_operand.vmem [shape: f32[2,384], index: 3, kind: input, shape index: {}]   ;;  %s6069_s4 = inlined_call_operand.hbm [shape: f32[4,16,384], index: 4, kind: output, shape index: {}]  }
   0x1   :  { %v3380_v0 = vld [vmem:[%s6066_s1 + $0x1] ss:$8 sm:$0x7]  ;;  %v3381_v3 = vld [vmem:[%s6066_s1 + $0x1a] ss:$8 sm:$0x7] }
   0x2   :  { %v76_v1 = vperm.slane %v3380_v0, 2  ;;  %v74_v2 = vperm.slane %v3380_v0, 0  ;;  %v144_v4 = vperm.slane %v3381_v3, 0 }
   0x4   :  { %81 = vrot.lane.b32.xlu1 %v76_v1, %s3497_s19  ;;  %77 = vrot.lane.b32.xlu0 %v74_v2, %s3497_s19 }
   0x5   :  { %147 = vrot.lane.b32.xlu2 %v144_v4, %s3497_s19 }
   0x6   :  { %9 = vsyncpa [#allocation3], 0  ;;  %v146_v5 = vperm.slane %v3381_v3, 2  ;;  %v75_v6 = vperm.slane %v3380_v0, 1  ;;  %s3498_s22 = smov 48   ;;  %v145_v10 = vperm.slane %v3381_v3, 1 }
   0x7   :  { %v3382_v7 = vld [vmem:[%s6066_s1 + $0x2] ss:$8 sm:$0x7]  ;;  %v3383_v11 = vld [vmem:[%s6066_s1 + $0x1b] ss:$8 sm:$0x7] }
   0x8   :  { %v213_v8 = vperm.slane %v3382_v7, 1  ;;  %v212_v9 = vperm.slane %v3382_v7, 0  ;;  %v284_v12 = vperm.slane %v3383_v11, 2  ;;  %v214_v13 = vperm.slane %v3382_v7, 2  ;;  %v3563_v20 = vld [vmem:[%s6065_s0] sm:$0xff]  ;;  %s3499_s29 = smov 104  }
   0x9   :  { %v283_v14 = vperm.slane %v3383_v11, 1  ;;  %v3386_v15 = vld [vmem:[%s6066_s1 + $0x4] ss:$8 sm:$0x7]  ;;  %v282_v17 = vperm.slane %v3383_v11, 0  ;;  %v3573_v23 = vld [vmem:[%s6065_s0 + $0x18] sm:$0xff] }
   0xa   :  { %v459_v16 = vperm.slane %v3386_v15, 0  ;;  %v461_v18 = vperm.slane %v3386_v15, 2  ;;  %v460_v19 = vperm.slane %v3386_v15, 1  ;;  %v3582_v28 = vld [vmem:[%s6065_s0 + $0x20] sm:$0xff]  ;;  %v3594_v34 = vld [vmem:[%s6065_s0 + $0x38] sm:$0xff]  ;;  %s3500_s10 = smov 80  }
   0xb   :  { %vm83_vm0 = vcmask 195584   ;;  %v3610_v45 = vld [vmem:[%s6065_s0 + $0x8] sm:$0xff]  ;;  %v3622_v52 = vld [vmem:[%s6065_s0 + $0x10] sm:$0xff]  ;;  %vm221_vm1 = vcmask 392192   ;;  %vm374_vm2 = vcmask 1046528   ;;  %vm867_vm3 = vcmask 1045504  }
   0xc   :  { %151 = vrot.lane.b32.xlu1 %v146_v5, %s3497_s19  ;;  %79 = vrot.lane.b32.xlu0 %v75_v6, %s3497_s19  ;;  %v3633_v56 = vld [vmem:[%s6065_s0 + $0x30] sm:$0xff]  ;;  %v3638_v57 = vld [vmem:[%s6065_s0 + $0x28] sm:$0xff]  ;;  %vm122_vm4 = vcmask 850944   ;;  %vm260_vm5 = vcmask 654336   ;;  %vm3025_vm12 = vcmask 1040384   ;;  %vm3027_vm15 = vcmask 1041408  }
   0xd   :  { %217 = vrot.lane.b32.xlu2 %v213_v8, %s3498_s22  ;;  %s3367_s14 = sshll.u32 %s6069_s4, 4  ;;  %s3504_s15 = smov 384   ;;  %s3368_s14 = int_to_ptr.hbm [resolvable:$true] %s3367_s14 }
  0x14   :  { %215 = vrot.lane.b32.xlu1 %v212_v9, %s3498_s22  ;;  %149 = vrot.lane.b32.xlu0 %v145_v10, %s3497_s19 }
  0x15   :  { %289 = vrot.lane.b32.xlu2 %v284_v12, %s3498_s22 }
  0x1c   :  { %219 = vrot.lane.b32.xlu0 %v214_v13, %s3498_s22  ;;  %287 = vrot.lane.b32.xlu1 %v283_v14, %s3498_s22 }
  0x1d   :  { %462 = vrot.lane.b32.xlu2 %v459_v16, %s3497_s19 }
  0x24   :  { %285 = vrot.lane.b32.xlu0 %v282_v17, %s3498_s22  ;;  %466 = vrot.lane.b32.xlu1 %v461_v18, %s3497_s19 }
  0x2c   :  { %464 = vrot.lane.b32.xlu0 %v460_v19, %s3497_s19 }
  0x5f   :  { %v3565_v21 = vpop.permute.xlu2 %147 }
  0x60   :  { %v159_v22 = vmul.f32 %v3565_v21, %v3563_v20  ;;  %v163_v31 = vmul.f32 %v3565_v21, %v3582_v28 }
  0x62   :  { %175 = vrot.lane.b32.xlu2 %v159_v22, %s3499_s29 }
  0x67   :  { %v218_v43 = vpop.permute.xlu2 %217 }
  0x6f   :  { %v290_v50 = vpop.permute.xlu2 %289 }
  0x70   :  { %v300_v53 = vmul.f32 %v290_v50, %v3573_v23  ;;  %v304_v60 = vmul.f32 %v290_v50, %v3594_v34 }
  0x76   :  { %v82_v24 = vpop.permute.xlu1 %81  ;;  %v78_v25 = vpop.permute.xlu0 %77 }
  0x77   :  { %v90_v26 = vmul.f32 %v78_v25, %v3563_v20  ;;  %v93_v27 = vmul.f32 %v82_v24, %v3573_v23  ;;  %v94_v33 = vmul.f32 %v78_v25, %v3582_v28  ;;  %v97_v39 = vmul.f32 %v82_v24, %v3594_v34  ;;  %v463_v12 = vpop.permute.xlu2 %462 }
  0x78   :  { %v478_v22 = vmul.f32 %v463_v12, %v3582_v28 }
  0x79   :  { %106 = vrot.lane.b32.xlu1 %v90_v26, %s3499_s29  ;;  %112 = vrot.lane.b32.xlu0 %v93_v27, %s3499_s29 }
  0x7e   :  { %v152_v29 = vpop.permute.xlu1 %151  ;;  %v80_v30 = vpop.permute.xlu0 %79 }
  0x7f   :  { %v162_v32 = vmul.f32 %v152_v29, %v3573_v23  ;;  %v166_v37 = vmul.f32 %v152_v29, %v3594_v34  ;;  %v84_v44 = vsel %vm83_vm0, %v78_v25, %v80_v30  ;;  %v85_v51 = vsel %vm83_vm0, %v80_v30, %v82_v24 }
  0x80   :  { %v91_v48 = vmul.f32 %v84_v44, %v3610_v45  ;;  %v92_v54 = vmul.f32 %v85_v51, %v3622_v52  ;;  %v96_v58 = vmul.f32 %v85_v51, %v3633_v56  ;;  %v95_v59 = vmul.f32 %v84_v44, %v3638_v57  ;;  %v3710_v51 = vld [vmem:[%s6065_s0 + $0x50] sm:$0x3] }
  0x81   :  { %181 = vrot.lane.b32.xlu2 %v162_v32, %s3499_s29  ;;  %114 = vrot.lane.b32.xlu1 %v94_v33, %s3499_s29  ;;  %v499_v33 = vrot.slane %v478_v22, 1 }
  0x82   :  { %183 = vrot.lane.b32.xlu0 %v163_v31, %s3499_s29 }
  0x86   :  { %v216_v35 = vpop.permute.xlu1 %215  ;;  %v150_v36 = vpop.permute.xlu0 %149 }
  0x87   :  { %v232_v38 = vmul.f32 %v216_v35, %v3582_v28  ;;  %v228_v40 = vmul.f32 %v216_v35, %v3563_v20  ;;  %v153_v61 = vsel %vm83_vm0, %v3565_v21, %v150_v36  ;;  %v154_v62 = vsel %vm83_vm0, %v150_v36, %v152_v29 }
  0x88   :  { %v160_v63 = vmul.f32 %v153_v61, %v3610_v45  ;;  %v165_v0 = vmul.f32 %v154_v62, %v3633_v56  ;;  %v161_v1 = vmul.f32 %v154_v62, %v3622_v52  ;;  %v222_v2 = vsel %vm221_vm1, %v216_v35, %v218_v43 }
  0x89   :  { %252 = vrot.lane.b32.xlu2 %v232_v38, %s3500_s10  ;;  %120 = vrot.lane.b32.xlu1 %v97_v39, %s3499_s29  ;;  %v229_v5 = vmul.f32 %v222_v2, %v3610_v45  ;;  %v164_v6 = vmul.f32 %v153_v61, %v3638_v57  ;;  %v233_v9 = vmul.f32 %v222_v2, %v3638_v57  ;;  %v3693_v38 = vld [vmem:[%s6065_s0 + $0x48] sm:$0x3] }
  0x8a   :  { %189 = vrot.lane.b32.xlu0 %v166_v37, %s3499_s29  ;;  %v474_v21 = vmul.f32 %v463_v12, %v3563_v20  ;;  %v3688_v37 = vld [vmem:[%s6065_s0 + $0x40] sm:$0x3] }
  0x8c   :  { %v498_v32 = vrot.slane %v474_v21, 1 }
  0x8e   :  { %v220_v41 = vpop.permute.xlu0 %219  ;;  %v288_v7 = vpop.permute.xlu1 %287 }
  0x8f   :  { %v235_v42 = vmul.f32 %v220_v41, %v3594_v34  ;;  %v231_v49 = vmul.f32 %v220_v41, %v3573_v23  ;;  %v223_v3 = vsel %vm221_vm1, %v218_v43, %v220_v41  ;;  %v292_v8 = vsel %vm221_vm1, %v288_v7, %v290_v50 }
  0x90   :  { %v230_v4 = vmul.f32 %v223_v3, %v3622_v52  ;;  %v299_v10 = vmul.f32 %v292_v8, %v3622_v52  ;;  %v234_v11 = vmul.f32 %v223_v3, %v3633_v56  ;;  %v303_v24 = vmul.f32 %v292_v8, %v3633_v56 }
  0x91   :  { %258 = vrot.lane.b32.xlu2 %v235_v42, %s3500_s10  ;;  %244 = vrot.lane.b32.xlu1 %v228_v40, %s3500_s10  ;;  %v500_v40 = vsel %vm374_vm2, %v498_v32, %v499_v33  ;;  %v482_v42 = vmul.f32 %v463_v12, %v3688_v37 }
  0x96   :  { %v286_v46 = vpop.permute.xlu0 %285  ;;  %v467_v14 = vpop.permute.xlu1 %466 }
  0x97   :  { %v297_v47 = vmul.f32 %v286_v46, %v3563_v20  ;;  %v301_v55 = vmul.f32 %v286_v46, %v3582_v28  ;;  %v291_v16 = vsel %vm221_vm1, %v286_v46, %v288_v7  ;;  %v477_v43 = vmul.f32 %v467_v14, %v3573_v23 }
  0x98   :  { %v302_v25 = vmul.f32 %v291_v16, %v3638_v57  ;;  %v298_v29 = vmul.f32 %v291_v16, %v3610_v45  ;;  %v481_v44 = vmul.f32 %v467_v14, %v3594_v34 }
  0x99   :  { %313 = vrot.lane.b32.xlu0 %v297_v47, %s3500_s10  ;;  %108 = vrot.lane.b32.xlu2 %v91_v48, %s3499_s29  ;;  %v510_v48 = vrot.slane %v482_v42, 1 }
  0x9a   :  { %250 = vrot.lane.b32.xlu1 %v231_v49, %s3500_s10  ;;  %v507_v49 = vrot.slane %v477_v43, 1  ;;  %v508_v50 = vrot.slane %v481_v44, 1 }
  0x9e   :  { %v465_v13 = vpop.permute.xlu0 %464 }
  0x9f   :  { %v468_v15 = vsel %vm83_vm0, %v463_v12, %v465_v13  ;;  %v469_v17 = vsel %vm83_vm0, %v465_v13, %v467_v14 }
  0xa0   :  { %v475_v18 = vmul.f32 %v468_v15, %v3610_v45  ;;  %v479_v19 = vmul.f32 %v468_v15, %v3638_v57  ;;  %v476_v26 = vmul.f32 %v469_v17, %v3622_v52  ;;  %v480_v27 = vmul.f32 %v469_v17, %v3633_v56 }
  0xa1   :  { %319 = vrot.lane.b32.xlu0 %v300_v53, %s3500_s10  ;;  %110 = vrot.lane.b32.xlu2 %v92_v54, %s3499_s29  ;;  %v483_v46 = vmul.f32 %v468_v15, %v3693_v38  ;;  %v3715_v54 = vld [vmem:[%s6065_s0 + $0x58] sm:$0x3] }
  0xa2   :  { %321 = vrot.lane.b32.xlu1 %v301_v55, %s3500_s10  ;;  %v501_v30 = vrot.slane %v475_v18, 1  ;;  %v502_v31 = vrot.slane %v479_v19, 1  ;;  %v504_v35 = vrot.slane %v476_v26, 1  ;;  %v505_v36 = vrot.slane %v480_v27, 1 }
  0xa3   :  { %v512_v53 = vrot.slane %v483_v46, 1  ;;  %v484_v55 = vmul.f32 %v469_v17, %v3710_v51 }
  0xa4   :  { %v503_v39 = vsel %vm374_vm2, %v501_v30, %v502_v31  ;;  %v506_v41 = vsel %vm374_vm2, %v504_v35, %v505_v36 }
  0xa5   :  { %v513_v61 = vsel %vm374_vm2, %v502_v31, %v512_v53 }
  0xa9   :  { %118 = vrot.lane.b32.xlu0 %v96_v58, %s3499_s29  ;;  %116 = vrot.lane.b32.xlu2 %v95_v59, %s3499_s29  ;;  %v511_v58 = vsel %vm374_vm2, %v499_v33, %v510_v48  ;;  %v509_v59 = vsel %vm374_vm2, %v507_v49, %v508_v50 }
  0xaa   :  { %327 = vrot.lane.b32.xlu1 %v304_v60, %s3500_s10  ;;  %v485_v60 = vmul.f32 %v467_v14, %v3715_v54 }
  0xb1   :  { %177 = vrot.lane.b32.xlu0 %v160_v63, %s3499_s29  ;;  %187 = vrot.lane.b32.xlu2 %v165_v0, %s3499_s29  ;;  %v3387_v63 = vld [vmem:[%s6066_s1 + $0x1d] ss:$8 sm:$0x7]  ;;  %v516_v0 = vrot.slane %v485_v60, 1 }
  0xb2   :  { %179 = vrot.lane.b32.xlu1 %v161_v1, %s3499_s29  ;;  %v514_v1 = vrot.slane %v484_v55, 1  ;;  %v555_v2 = vperm.slane %v3387_v63, 0  ;;  %v556_v7 = vperm.slane %v3387_v63, 1 }
  0xb3   :  { %v517_v3 = vsel %vm374_vm2, %v508_v50, %v516_v0 }
  0xb9   :  { %248 = vrot.lane.b32.xlu0 %v230_v4, %s3500_s10  ;;  %246 = vrot.lane.b32.xlu2 %v229_v5, %s3500_s10  ;;  %v515_v4 = vsel %vm374_vm2, %v505_v36, %v514_v1 }
  0xba   :  { %185 = vrot.lane.b32.xlu1 %v164_v6, %s3499_s29  ;;  %v557_v6 = vperm.slane %v3387_v63, 2 }
  0xbc   :  { %v3704_v47 = vpop.permute.xlu2 %175 }
  0xbd   :  { %6121 = vst [vmem:[#allocation5_spill] sm:$0xff] %v3704_v47 }
  0xc1   :  { %254 = vrot.lane.b32.xlu0 %v233_v9, %s3500_s10  ;;  %317 = vrot.lane.b32.xlu2 %v299_v10, %s3500_s10 }
  0xc2   :  { %256 = vrot.lane.b32.xlu1 %v234_v11, %s3500_s10 }
  0xc9   :  { %325 = vrot.lane.b32.xlu0 %v303_v24, %s3500_s10  ;;  %323 = vrot.lane.b32.xlu2 %v302_v25, %s3500_s10 }
  0xca   :  { %315 = vrot.lane.b32.xlu1 %v298_v29, %s3500_s10 }
  0xd1   :  { %520 = vrot.lane.b32.xlu0 %v503_v39, %s3499_s29  ;;  %518 = vrot.lane.b32.xlu2 %v500_v40, %s3499_s29 }
  0xd2   :  { %522 = vrot.lane.b32.xlu1 %v506_v41, %s3499_s29 }
  0xd9   :  { %526 = vrot.lane.b32.xlu0 %v511_v58, %s3499_s29  ;;  %524 = vrot.lane.b32.xlu2 %v509_v59, %s3499_s29 }
  0xda   :  { %528 = vrot.lane.b32.xlu1 %v513_v61, %s3499_s29 }
  0xdb   :  { %v3725_v62 = vpop.permute.xlu2 %181 }
  0xdc   :  { %6122 = vst [vmem:[#allocation6_spill] sm:$0xff] %v3725_v62 }
  0xe1   :  { %532 = vrot.lane.b32.xlu0 %v517_v3, %s3499_s29  ;;  %530 = vrot.lane.b32.xlu2 %v515_v4, %s3499_s29 }
  0xe2   :  { %558 = vrot.lane.b32.xlu1 %v555_v2, %s3497_s19 }
  0xe3   :  { %v3735_v5 = vpop.permute.xlu2 %252 }
  0xe9   :  { %562 = vrot.lane.b32.xlu0 %v557_v6, %s3497_s19  ;;  %560 = vrot.lane.b32.xlu2 %v556_v7, %s3497_s19 }
  0xeb   :  { %v3739_v8 = vpop.permute.xlu2 %258  ;;  %v3741_v9 = vpop.permute.xlu1 %106 }
  0xec   :  { %v3743_v10 = vpop.permute.xlu0 %112 }
  0xf3   :  { %v3745_v11 = vpop.permute.xlu2 %108  ;;  %v3747_v12 = vpop.permute.xlu1 %114 }
  0xf4   :  { %v3749_v13 = vpop.permute.xlu0 %183 }
  0xf5   :  { %6123 = vst [vmem:[#allocation7_spill] sm:$0xff] %v3749_v13 }
  0xfb   :  { %v3751_v14 = vpop.permute.xlu2 %110  ;;  %v3753_v15 = vpop.permute.xlu1 %120 }
  0xfc   :  { %v3755_v16 = vpop.permute.xlu0 %189 }
  0xfd   :  { %6124 = vst [vmem:[#allocation8_spill] sm:$0xff] %v3755_v16 }
 0x103   :  { %v3757_v17 = vpop.permute.xlu1 %244  ;;  %v3759_v18 = vpop.permute.xlu2 %116 }
 0x10b   :  { %v3761_v19 = vpop.permute.xlu0 %313  ;;  %v3765_v22 = vpop.permute.xlu2 %187 }
 0x10c   :  { %6125 = vst [vmem:[#allocation9_spill] sm:$0xff] %v3761_v19  ;;  %v3763_v21 = vpop.permute.xlu1 %250 }
 0x10d   :  { %6126 = vst [vmem:[#allocation10_spill] sm:$0xff] %v3765_v22 }
 0x113   :  { %v3767_v24 = vpop.permute.xlu0 %319  ;;  %v3771_v26 = vpop.permute.xlu2 %246 }
 0x114   :  { %6127 = vst [vmem:[#allocation11_spill] sm:$0xff] %v3767_v24  ;;  %v3769_v25 = vpop.permute.xlu1 %321 }
 0x115   :  { %6128 = vst [vmem:[#allocation12_spill] sm:$0xff] %v3769_v25 }
 0x11b   :  { %v3773_v27 = vpop.permute.xlu0 %118  ;;  %v3777_v30 = vpop.permute.xlu2 %317 }
 0x11c   :  { %v3775_v29 = vpop.permute.xlu1 %327  ;;  %6130 = vst [vmem:[#allocation14_spill] sm:$0xff] %v3777_v30 }
 0x11d   :  { %6129 = vst [vmem:[#allocation13_spill] sm:$0xff] %v3775_v29 }
 0x123   :  { %v3779_v31 = vpop.permute.xlu0 %177  ;;  %v3785_v35 = vpop.permute.xlu2 %323 }
 0x124   :  { %6131 = vst [vmem:[#allocation15_spill] sm:$0xff] %v3779_v31  ;;  %v3781_v32 = vpop.permute.xlu1 %179 }
 0x125   :  { %6132 = vst [vmem:[#allocation16_spill] sm:$0xff] %v3781_v32 }
 0x126   :  { %6133 = vst [vmem:[#allocation17_spill] sm:$0xff] %v3785_v35 }
 0x12b   :  { %v3783_v33 = vpop.permute.xlu0 %248  ;;  %v3793_v41 = vpop.permute.xlu2 %518 }
 0x12c   :  { %v3787_v36 = vpop.permute.xlu1 %185 }
 0x12d   :  { %6134 = vst [vmem:[#allocation18_spill] sm:$0xff] %v3787_v36 }
 0x133   :  { %v3789_v39 = vpop.permute.xlu0 %254  ;;  %v3799_v44 = vpop.permute.xlu2 %524 }
 0x134   :  { %v3791_v40 = vpop.permute.xlu1 %256 }
 0x13b   :  { %v3795_v42 = vpop.permute.xlu0 %325  ;;  %v3805_v49 = vpop.permute.xlu2 %530 }
 0x13c   :  { %6135 = vst [vmem:[#allocation19_spill] sm:$0xff] %v3795_v42  ;;  %v3797_v43 = vpop.permute.xlu1 %315 }
 0x13d   :  { %6136 = vst [vmem:[#allocation20_spill] sm:$0xff] %v3797_v43 }
 0x143   :  { %v3801_v46 = vpop.permute.xlu0 %520  ;;  %v561_v55 = vpop.permute.xlu2 %560 }
 0x144   :  { %v3803_v48 = vpop.permute.xlu1 %522 }
 0x14b   :  { %v3807_v50 = vpop.permute.xlu0 %526 }
 0x14c   :  { %v3809_v53 = vpop.permute.xlu1 %528 }
 0x153   :  { %v3811_v58 = vpop.permute.xlu0 %532 }
 0x154   :  { %6137 = vst [vmem:[#allocation21_spill] sm:$0xff] %v3811_v58  ;;  %v559_v59 = vpop.permute.xlu1 %558 }
 0x155   :  { %v564_v60 = vsel %vm83_vm0, %v559_v59, %v561_v55  ;;  %v570_v61 = vmul.f32 %v559_v59, %v3563_v20  ;;  %v574_v63 = vmul.f32 %v559_v59, %v3582_v28  ;;  %v578_v42 = vmul.f32 %v559_v59, %v3688_v37 }
 0x156   :  { %v571_v0 = vmul.f32 %v564_v60, %v3610_v45  ;;  %v575_v1 = vmul.f32 %v564_v60, %v3638_v57 }
 0x157   :  { %v594_v2 = vrot.slane %v570_v61, 1  ;;  %v595_v3 = vrot.slane %v574_v63, 1 }
 0x158   :  { %v597_v4 = vrot.slane %v571_v0, 1  ;;  %v598_v6 = vrot.slane %v575_v1, 1 }
 0x159   :  { %v596_v7 = vsel %vm374_vm2, %v594_v2, %v595_v3 }
 0x15a   :  { %614 = vrot.lane.b32.xlu1 %v596_v7, %s3499_s29  ;;  %v599_v29 = vsel %vm374_vm2, %v597_v4, %v598_v6  ;;  %v606_v7 = vrot.slane %v578_v42, 1 }
 0x15b   :  { %616 = vrot.lane.b32.xlu2 %v599_v29, %s3499_s29  ;;  %v563_v25 = vpop.permute.xlu0 %562 }
 0x15c   :  { %v565_v35 = vsel %vm83_vm0, %v561_v55, %v563_v25  ;;  %v573_v13 = vmul.f32 %v563_v25, %v3573_v23  ;;  %v577_v61 = vmul.f32 %v563_v25, %v3594_v34  ;;  %v579_v55 = vmul.f32 %v564_v60, %v3693_v38 }
 0x15d   :  { %v572_v63 = vmul.f32 %v565_v35, %v3622_v52  ;;  %v576_v0 = vmul.f32 %v565_v35, %v3633_v56  ;;  %v580_v30 = vmul.f32 %v565_v35, %v3710_v51  ;;  %v607_v24 = vsel %vm374_vm2, %v595_v3, %v606_v7 }
 0x15e   :  { %v603_v1 = vrot.slane %v573_v13, 1  ;;  %v604_v2 = vrot.slane %v577_v61, 1  ;;  %v581_v13 = vmul.f32 %v563_v25, %v3715_v54  ;;  %v608_v61 = vrot.slane %v579_v55, 1  ;;  %v3388_v25 = vld [vmem:[%s6066_s1 + $0x5] ss:$8 sm:$0x7] }
 0x15f   :  { %v600_v36 = vrot.slane %v572_v63, 1  ;;  %v601_v4 = vrot.slane %v576_v0, 1  ;;  %v610_v42 = vrot.slane %v580_v30, 1  ;;  %v651_v30 = vperm.slane %v3388_v25, 0 }
 0x160   :  { %v605_v59 = vsel %vm374_vm2, %v603_v1, %v604_v2  ;;  %v612_v63 = vrot.slane %v581_v13, 1  ;;  %v653_v60 = vperm.slane %v3388_v25, 2 }
 0x161   :  { %v602_v29 = vsel %vm374_vm2, %v600_v36, %v601_v4  ;;  %v611_v0 = vsel %vm374_vm2, %v601_v4, %v610_v42  ;;  %v609_v36 = vsel %vm374_vm2, %v598_v6, %v608_v61 }
 0x162   :  { %620 = vrot.lane.b32.xlu1 %v605_v59, %s3499_s29  ;;  %618 = vrot.lane.b32.xlu0 %v602_v29, %s3499_s29  ;;  %v613_v35 = vsel %vm374_vm2, %v604_v2, %v612_v63 }
 0x163   :  { %622 = vrot.lane.b32.xlu2 %v607_v24, %s3499_s29  ;;  %v652_v24 = vperm.slane %v3388_v25, 1 }
 0x16a   :  { %626 = vrot.lane.b32.xlu1 %v611_v0, %s3499_s29  ;;  %624 = vrot.lane.b32.xlu0 %v609_v36, %s3499_s29 }
 0x16b   :  { %628 = vrot.lane.b32.xlu2 %v613_v35, %s3499_s29 }
 0x172   :  { %656 = vrot.lane.b32.xlu1 %v652_v24, %s3498_s22  ;;  %654 = vrot.lane.b32.xlu0 %v651_v30, %s3498_s22 }
 0x173   :  { %658 = vrot.lane.b32.xlu2 %v653_v60, %s3498_s22 }
 0x1b5   :  { %v3849_v3 = vpop.permute.xlu2 %616 }
 0x1b6   :  { %6138 = vst [vmem:[#allocation22_spill] sm:$0xff] %v3849_v3 }
 0x1bd   :  { %v3853_v1 = vpop.permute.xlu2 %622 }
 0x1be   :  { %6140 = vst [vmem:[#allocation24_spill] sm:$0xff] %v3853_v1 }
 0x1c5   :  { %v3859_v4 = vpop.permute.xlu2 %628 }
 0x1c6   :  { %6143 = vst [vmem:[#allocation27_spill] sm:$0xff] %v3859_v4 }
 0x1cc   :  { %v3851_v6 = vpop.permute.xlu1 %614 }
 0x1cd   :  { %6139 = vst [vmem:[#allocation23_spill] sm:$0xff] %v3851_v6  ;;  %v659_v55 = vpop.permute.xlu2 %658 }
 0x1ce   :  { %v669_v4 = vmul.f32 %v659_v55, %v3573_v23  ;;  %v673_v1 = vmul.f32 %v659_v55, %v3594_v34 }
 0x1d4   :  { %v3855_v2 = vpop.permute.xlu1 %620  ;;  %v3857_v7 = vpop.permute.xlu0 %618 }
 0x1d5   :  { %6141 = vst [vmem:[#allocation25_spill] sm:$0xff] %v3855_v2 }
 0x1d6   :  { %6142 = vst [vmem:[#allocation26_spill] sm:$0xff] %v3857_v7 }
 0x1dc   :  { %v3861_v59 = vpop.permute.xlu1 %626  ;;  %v3863_v29 = vpop.permute.xlu0 %624 }
 0x1dd   :  { %6144 = vst [vmem:[#allocation28_spill] sm:$0xff] %v3861_v59 }
 0x1de   :  { %6145 = vst [vmem:[#allocation29_spill] sm:$0xff] %v3863_v29 }
 0x1e4   :  { %v657_v13 = vpop.permute.xlu1 %656  ;;  %v655_v42 = vpop.permute.xlu0 %654 }
 0x1e5   :  { %v661_v61 = vsel %vm221_vm1, %v657_v13, %v659_v55  ;;  %v660_v63 = vsel %vm221_vm1, %v655_v42, %v657_v13  ;;  %v666_v0 = vmul.f32 %v655_v42, %v3563_v20  ;;  %v670_v36 = vmul.f32 %v655_v42, %v3582_v28 }
 0x1e6   :  { %v668_v35 = vmul.f32 %v661_v61, %v3622_v52  ;;  %v672_v25 = vmul.f32 %v661_v61, %v3633_v56  ;;  %v667_v24 = vmul.f32 %v660_v63, %v3610_v45  ;;  %v671_v30 = vmul.f32 %v660_v63, %v3638_v57 }
 0x1e7   :  { %v690_v60 = vrot.slane %v666_v0, 1  ;;  %v691_v59 = vrot.slane %v670_v36, 1  ;;  %v675_v43 = vmul.f32 %v660_v63, %v3693_v38  ;;  %v674_v0 = vmul.f32 %v655_v42, %v3688_v37 }
 0x1e8   :  { %v696_v29 = vrot.slane %v668_v35, 1  ;;  %v697_v13 = vrot.slane %v672_v25, 1  ;;  %v693_v2 = vrot.slane %v667_v24, 1  ;;  %v694_v7 = vrot.slane %v671_v30, 1 }
 0x1e9   :  { %v692_v6 = vsel %vm374_vm2, %v690_v60, %v691_v59  ;;  %v699_v36 = vrot.slane %v669_v4, 1  ;;  %v700_v35 = vrot.slane %v673_v1, 1  ;;  %v704_v25 = vrot.slane %v675_v43, 1  ;;  %v3389_v43 = vld [vmem:[%s6066_s1 + $0x1e] ss:$8 sm:$0x7] }
 0x1ea   :  { %710 = vrot.lane.b32.xlu0 %v692_v6, %s3500_s10  ;;  %v698_v3 = vsel %vm374_vm2, %v696_v29, %v697_v13  ;;  %v695_v19 = vsel %vm374_vm2, %v693_v2, %v694_v7  ;;  %v702_v24 = vrot.slane %v674_v0, 1  ;;  %v676_v6 = vmul.f32 %v661_v61, %v3710_v51 }
 0x1eb   :  { %714 = vrot.lane.b32.xlu2 %v698_v3, %s3500_s10  ;;  %712 = vrot.lane.b32.xlu1 %v695_v19, %s3500_s10  ;;  %v701_v30 = vsel %vm374_vm2, %v699_v36, %v700_v35  ;;  %v705_v2 = vsel %vm374_vm2, %v694_v7, %v704_v25  ;;  %v677_v42 = vmul.f32 %v659_v55, %v3715_v54  ;;  %v747_v1 = vperm.slane %v3389_v43, 0 }
 0x1ec   :  { %v703_v29 = vsel %vm374_vm2, %v691_v59, %v702_v24  ;;  %v706_v19 = vrot.slane %v676_v6, 1  ;;  %v748_v59 = vperm.slane %v3389_v43, 1  ;;  %v749_v55 = vperm.slane %v3389_v43, 2 }
 0x1ed   :  { %v708_v3 = vrot.slane %v677_v42, 1 }
 0x1ee   :  { %v707_v4 = vsel %vm374_vm2, %v697_v13, %v706_v19 }
 0x1ef   :  { %v709_v7 = vsel %vm374_vm2, %v700_v35, %v708_v3 }
 0x1f2   :  { %716 = vrot.lane.b32.xlu0 %v701_v30, %s3500_s10 }
 0x1f3   :  { %720 = vrot.lane.b32.xlu2 %v705_v2, %s3500_s10  ;;  %718 = vrot.lane.b32.xlu1 %v703_v29, %s3500_s10 }
 0x1fa   :  { %722 = vrot.lane.b32.xlu0 %v707_v4, %s3500_s10 }
 0x1fb   :  { %724 = vrot.lane.b32.xlu1 %v709_v7, %s3500_s10  ;;  %750 = vrot.lane.b32.xlu2 %v747_v1, %s3498_s22 }
 0x202   :  { %752 = vrot.lane.b32.xlu0 %v748_v59, %s3498_s22 }
 0x203   :  { %754 = vrot.lane.b32.xlu1 %v749_v55, %s3498_s22 }
 0x245   :  { %v3901_v61 = vpop.permute.xlu2 %714 }
 0x24d   :  { %v3903_v63 = vpop.permute.xlu2 %720 }
 0x24e   :  { %6146 = vst [vmem:[#allocation30_spill] sm:$0xff] %v3903_v63 }
 0x255   :  { %v751_v60 = vpop.permute.xlu2 %750 }
 0x256   :  { %v762_v13 = vmul.f32 %v751_v60, %v3563_v20  ;;  %v766_v0 = vmul.f32 %v751_v60, %v3582_v28  ;;  %v770_v31 = vmul.f32 %v751_v60, %v3688_v37 }
 0x258   :  { %v786_v36 = vrot.slane %v762_v13, 1  ;;  %v787_v35 = vrot.slane %v766_v0, 1 }
 0x25a   :  { %v788_v25 = vsel %vm374_vm2, %v786_v36, %v787_v35 }
 0x25b   :  { %806 = vrot.lane.b32.xlu2 %v788_v25, %s3500_s10 }
 0x25c   :  { %v3909_v24 = vpop.permute.xlu0 %710 }
 0x25d   :  { %v3911_v30 = vpop.permute.xlu1 %712 }
 0x264   :  { %v3913_v6 = vpop.permute.xlu0 %716 }
 0x265   :  { %v3915_v2 = vpop.permute.xlu1 %718 }
 0x266   :  { %6147 = vst [vmem:[#allocation31_spill] sm:$0xff] %v3915_v2 }
 0x26c   :  { %v3917_v29 = vpop.permute.xlu0 %722 }
 0x26d   :  { %6148 = vst [vmem:[#allocation32_spill] sm:$0xff] %v3917_v29  ;;  %v3919_v42 = vpop.permute.xlu1 %724 }
 0x26e   :  { %6149 = vst [vmem:[#allocation33_spill] sm:$0xff] %v3919_v42 }
 0x274   :  { %v753_v19 = vpop.permute.xlu0 %752 }
 0x275   :  { %v756_v3 = vsel %vm221_vm1, %v751_v60, %v753_v19  ;;  %v755_v43 = vpop.permute.xlu1 %754 }
 0x276   :  { %v763_v1 = vmul.f32 %v756_v3, %v3610_v45  ;;  %v767_v4 = vmul.f32 %v756_v3, %v3638_v57  ;;  %v757_v7 = vsel %vm221_vm1, %v753_v19, %v755_v43  ;;  %v765_v59 = vmul.f32 %v755_v43, %v3573_v23 }
 0x277   :  { %v769_v55 = vmul.f32 %v755_v43, %v3594_v34  ;;  %v764_v13 = vmul.f32 %v757_v7, %v3622_v52  ;;  %v768_v0 = vmul.f32 %v757_v7, %v3633_v56  ;;  %v771_v19 = vmul.f32 %v756_v3, %v3693_v38 }
 0x278   :  { %v789_v36 = vrot.slane %v763_v1, 1  ;;  %v790_v25 = vrot.slane %v767_v4, 1  ;;  %v795_v32 = vrot.slane %v765_v59, 1  ;;  %v772_v29 = vmul.f32 %v757_v7, %v3710_v51 }
 0x279   :  { %v796_v62 = vrot.slane %v769_v55, 1  ;;  %v792_v22 = vrot.slane %v764_v13, 1  ;;  %v793_v16 = vrot.slane %v768_v0, 1  ;;  %v798_v1 = vrot.slane %v770_v31, 1 }
 0x27a   :  { %v791_v47 = vsel %vm374_vm2, %v789_v36, %v790_v25  ;;  %v802_v4 = vrot.slane %v772_v29, 1  ;;  %v800_v59 = vrot.slane %v771_v19, 1  ;;  %v773_v60 = vmul.f32 %v755_v43, %v3715_v54 }
 0x27b   :  { %v797_v42 = vsel %vm374_vm2, %v795_v32, %v796_v62  ;;  %808 = vrot.lane.b32.xlu0 %v791_v47, %s3500_s10  ;;  %v794_v58 = vsel %vm374_vm2, %v792_v22, %v793_v16  ;;  %v799_v55 = vsel %vm374_vm2, %v787_v35, %v798_v1  ;;  %v3392_v22 = vld [vmem:[%s6066_s1 + $0x7] ss:$8 sm:$0x7] }
 0x27c   :  { %812 = vrot.lane.b32.xlu2 %v797_v42, %s3500_s10  ;;  %810 = vrot.lane.b32.xlu1 %v794_v58, %s3500_s10  ;;  %v803_v3 = vsel %vm374_vm2, %v793_v16, %v802_v4  ;;  %v801_v47 = vsel %vm374_vm2, %v790_v25, %v800_v59  ;;  %v804_v31 = vrot.slane %v773_v60, 1  ;;  %v952_v32 = vperm.slane %v3392_v22, 0 }
 0x27d   :  { %v953_v58 = vperm.slane %v3392_v22, 1  ;;  %v954_v16 = vperm.slane %v3392_v22, 2 }
 0x27e   :  { %v805_v35 = vsel %vm374_vm2, %v796_v62, %v804_v31 }
 0x283   :  { %814 = vrot.lane.b32.xlu0 %v799_v55, %s3500_s10 }
 0x284   :  { %818 = vrot.lane.b32.xlu2 %v803_v3, %s3500_s10  ;;  %816 = vrot.lane.b32.xlu1 %v801_v47, %s3500_s10 }
 0x28b   :  { %820 = vrot.lane.b32.xlu0 %v805_v35, %s3500_s10 }
 0x28c   :  { %955 = vrot.lane.b32.xlu1 %v952_v32, %s3497_s19  ;;  %957 = vrot.lane.b32.xlu2 %v953_v58, %s3497_s19 }
 0x293   :  { %959 = vrot.lane.b32.xlu0 %v954_v16, %s3497_s19 }
 0x2b5   :  { %v3953_v29 = vpop.permute.xlu2 %806 }
 0x2b6   :  { %6150 = vst [vmem:[#allocation34_spill] sm:$0xff] %v3953_v29 }
 0x2d6   :  { %v3955_v42 = vpop.permute.xlu2 %812 }
 0x2d7   :  { %6151 = vst [vmem:[#allocation35_spill] sm:$0xff] %v3955_v42 }
 0x2de   :  { %v3961_v13 = vpop.permute.xlu2 %818 }
 0x2df   :  { %6154 = vst [vmem:[#allocation38_spill] sm:$0xff] %v3961_v13 }
 0x2e6   :  { %v958_v36 = vpop.permute.xlu2 %957 }
 0x2ed   :  { %v3957_v43 = vpop.permute.xlu0 %808 }
 0x2ee   :  { %6152 = vst [vmem:[#allocation36_spill] sm:$0xff] %v3957_v43  ;;  %v3959_v7 = vpop.permute.xlu1 %810 }
 0x2ef   :  { %6153 = vst [vmem:[#allocation37_spill] sm:$0xff] %v3959_v7 }
 0x2f5   :  { %v3963_v62 = vpop.permute.xlu0 %814 }
 0x2f6   :  { %6155 = vst [vmem:[#allocation39_spill] sm:$0xff] %v3963_v62  ;;  %v3965_v0 = vpop.permute.xlu1 %816 }
 0x2f7   :  { %6156 = vst [vmem:[#allocation40_spill] sm:$0xff] %v3965_v0 }
 0x2fd   :  { %v3967_v25 = vpop.permute.xlu0 %820 }
 0x2fe   :  { %6157 = vst [vmem:[#allocation41_spill] sm:$0xff] %v3967_v25  ;;  %v956_v19 = vpop.permute.xlu1 %955 }
 0x2ff   :  { %v961_v1 = vsel %vm83_vm0, %v956_v19, %v958_v36  ;;  %v967_v4 = vmul.f32 %v956_v19, %v3563_v20  ;;  %v971_v59 = vmul.f32 %v956_v19, %v3582_v28  ;;  %v975_v35 = vmul.f32 %v956_v19, %v3688_v37 }
 0x300   :  { %v968_v55 = vmul.f32 %v961_v1, %v3610_v45  ;;  %v972_v60 = vmul.f32 %v961_v1, %v3638_v57 }
 0x301   :  { %v991_v3 = vrot.slane %v967_v4, 2  ;;  %v992_v47 = vrot.slane %v971_v59, 2 }
 0x302   :  { %v994_v22 = vrot.slane %v968_v55, 2  ;;  %v995_v31 = vrot.slane %v972_v60, 2 }
 0x303   :  { %v993_v32 = vsel %vm867_vm3, %v991_v3, %v992_v47 }
 0x304   :  { %1011 = vrot.lane.b32.xlu1 %v993_v32, %s3499_s29  ;;  %v996_v58 = vsel %vm867_vm3, %v994_v22, %v995_v31  ;;  %v1003_v32 = vrot.slane %v975_v35, 2 }
 0x305   :  { %1013 = vrot.lane.b32.xlu2 %v996_v58, %s3499_s29  ;;  %v960_v16 = vpop.permute.xlu0 %959 }
 0x306   :  { %v962_v25 = vsel %vm83_vm0, %v958_v36, %v960_v16  ;;  %v970_v13 = vmul.f32 %v960_v16, %v3573_v23  ;;  %v974_v4 = vmul.f32 %v960_v16, %v3594_v34  ;;  %v976_v36 = vmul.f32 %v961_v1, %v3693_v38  ;;  %v3393_v1 = vld [vmem:[%s6066_s1 + $0x30] ss:$8 sm:$0x7] }
 0x307   :  { %v969_v59 = vmul.f32 %v962_v25, %v3622_v52  ;;  %v973_v55 = vmul.f32 %v962_v25, %v3633_v56  ;;  %v977_v0 = vmul.f32 %v962_v25, %v3710_v51  ;;  %v1004_v42 = vsel %vm867_vm3, %v992_v47, %v1003_v32 }
 0x308   :  { %v1000_v60 = vrot.slane %v970_v13, 2  ;;  %v1001_v3 = vrot.slane %v974_v4, 2  ;;  %v978_v13 = vmul.f32 %v960_v16, %v3715_v54  ;;  %v1005_v4 = vrot.slane %v976_v36, 2 }
 0x309   :  { %v997_v62 = vrot.slane %v969_v59, 2  ;;  %v998_v22 = vrot.slane %v973_v55, 2  ;;  %v1007_v35 = vrot.slane %v977_v0, 2  ;;  %v1048_v0 = vperm.slane %v3393_v1, 0 }
 0x30a   :  { %v1002_v19 = vsel %vm867_vm3, %v1000_v60, %v1001_v3  ;;  %v1009_v59 = vrot.slane %v978_v13, 2  ;;  %v1050_v47 = vperm.slane %v3393_v1, 2 }
 0x30b   :  { %v999_v58 = vsel %vm867_vm3, %v997_v62, %v998_v22  ;;  %v1008_v55 = vsel %vm867_vm3, %v998_v22, %v1007_v35  ;;  %v1006_v62 = vsel %vm867_vm3, %v995_v31, %v1005_v4 }
 0x30c   :  { %1017 = vrot.lane.b32.xlu1 %v1002_v19, %s3499_s29  ;;  %1015 = vrot.lane.b32.xlu0 %v999_v58, %s3499_s29  ;;  %v1010_v25 = vsel %vm867_vm3, %v1001_v3, %v1009_v59 }
 0x30d   :  { %1019 = vrot.lane.b32.xlu2 %v1004_v42, %s3499_s29  ;;  %v1049_v42 = vperm.slane %v3393_v1, 1 }
 0x314   :  { %1023 = vrot.lane.b32.xlu1 %v1008_v55, %s3499_s29  ;;  %1021 = vrot.lane.b32.xlu0 %v1006_v62, %s3499_s29 }
 0x315   :  { %1025 = vrot.lane.b32.xlu2 %v1010_v25, %s3499_s29 }
 0x31c   :  { %1053 = vrot.lane.b32.xlu1 %v1049_v42, %s3497_s19  ;;  %1051 = vrot.lane.b32.xlu0 %v1048_v0, %s3497_s19 }
 0x31d   :  { %1055 = vrot.lane.b32.xlu2 %v1050_v47, %s3497_s19 }
 0x35f   :  { %v4005_v31 = vpop.permute.xlu2 %1013 }
 0x367   :  { %v4009_v60 = vpop.permute.xlu2 %1019 }
 0x368   :  { %6158 = vst [vmem:[#allocation42_spill] sm:$0xff] %v4009_v60 }
 0x36f   :  { %v4015_v22 = vpop.permute.xlu2 %1025 }
 0x370   :  { %6161 = vst [vmem:[#allocation45_spill] sm:$0xff] %v4015_v22 }
 0x376   :  { %v4007_v16 = vpop.permute.xlu1 %1011 }
 0x377   :  { %v1056_v36 = vpop.permute.xlu2 %1055 }
 0x378   :  { %v1066_v0 = vmul.f32 %v1056_v36, %v3573_v23  ;;  %v1070_v43 = vmul.f32 %v1056_v36, %v3594_v34 }
 0x37e   :  { %v4011_v3 = vpop.permute.xlu1 %1017  ;;  %v4013_v32 = vpop.permute.xlu0 %1015 }
 0x37f   :  { %6159 = vst [vmem:[#allocation43_spill] sm:$0xff] %v4011_v3  ;;  %v1097_v3 = vrot.slane %v1070_v43, 2  ;;  %v1074_v43 = vmul.f32 %v1056_v36, %v3715_v54 }
 0x380   :  { %6160 = vst [vmem:[#allocation44_spill] sm:$0xff] %v4013_v32 }
 0x386   :  { %v4017_v19 = vpop.permute.xlu1 %1023  ;;  %v4019_v58 = vpop.permute.xlu0 %1021 }
 0x387   :  { %6162 = vst [vmem:[#allocation46_spill] sm:$0xff] %v4017_v19 }
 0x388   :  { %6163 = vst [vmem:[#allocation47_spill] sm:$0xff] %v4019_v58 }
 0x38e   :  { %v1054_v13 = vpop.permute.xlu1 %1053  ;;  %v1052_v35 = vpop.permute.xlu0 %1051 }
 0x38f   :  { %v1058_v4 = vsel %vm83_vm0, %v1054_v13, %v1056_v36  ;;  %v1057_v59 = vsel %vm83_vm0, %v1052_v35, %v1054_v13  ;;  %v1063_v55 = vmul.f32 %v1052_v35, %v3563_v20  ;;  %v1067_v62 = vmul.f32 %v1052_v35, %v3582_v28 }
 0x390   :  { %v1065_v25 = vmul.f32 %v1058_v4, %v3622_v52  ;;  %v1069_v1 = vmul.f32 %v1058_v4, %v3633_v56  ;;  %v1064_v42 = vmul.f32 %v1057_v59, %v3610_v45  ;;  %v1068_v29 = vmul.f32 %v1057_v59, %v3638_v57 }
 0x391   :  { %v1087_v47 = vrot.slane %v1063_v55, 2  ;;  %v1088_v7 = vrot.slane %v1067_v62, 2  ;;  %v1072_v63 = vmul.f32 %v1057_v59, %v3693_v38  ;;  %v1096_v62 = vrot.slane %v1066_v0, 2 }
 0x392   :  { %v1093_v22 = vrot.slane %v1065_v25, 2  ;;  %v1094_v13 = vrot.slane %v1069_v1, 2  ;;  %v1090_v19 = vrot.slane %v1064_v42, 2  ;;  %v1091_v58 = vrot.slane %v1068_v29, 2 }
 0x393   :  { %v1089_v60 = vsel %vm867_vm3, %v1087_v47, %v1088_v7  ;;  %v1071_v32 = vmul.f32 %v1052_v35, %v3688_v37  ;;  %v1101_v25 = vrot.slane %v1072_v63, 2  ;;  %v1098_v1 = vsel %vm867_vm3, %v1096_v62, %v1097_v3  ;;  %v3394_v63 = vld [vmem:[%s6066_s1 + $0x18] ss:$8 sm:$0x7] }
 0x394   :  { %1107 = vrot.lane.b32.xlu0 %v1089_v60, %s3499_s29  ;;  %v1095_v2 = vsel %vm867_vm3, %v1093_v22, %v1094_v13  ;;  %v1092_v55 = vsel %vm867_vm3, %v1090_v19, %v1091_v58  ;;  %v1073_v60 = vmul.f32 %v1058_v4, %v3710_v51  ;;  %v1144_v35 = vperm.slane %v3394_v63, 0 }
 0x395   :  { %1111 = vrot.lane.b32.xlu2 %v1095_v2, %s3499_s29  ;;  %1109 = vrot.lane.b32.xlu1 %v1092_v55, %s3499_s29  ;;  %v1099_v29 = vrot.slane %v1071_v32, 2  ;;  %v1102_v22 = vsel %vm867_vm3, %v1091_v58, %v1101_v25  ;;  %v1105_v32 = vrot.slane %v1074_v43, 2  ;;  %v1146_v36 = vperm.slane %v3394_v63, 2 }
 0x396   :  { %v1103_v19 = vrot.slane %v1073_v60, 2 }
 0x397   :  { %v1100_v2 = vsel %vm867_vm3, %v1088_v7, %v1099_v29  ;;  %v1106_v58 = vsel %vm867_vm3, %v1097_v3, %v1105_v32  ;;  %v1145_v7 = vperm.slane %v3394_v63, 1 }
 0x398   :  { %v1104_v4 = vsel %vm867_vm3, %v1094_v13, %v1103_v19 }
 0x39c   :  { %1113 = vrot.lane.b32.xlu0 %v1098_v1, %s3499_s29 }
 0x39d   :  { %1117 = vrot.lane.b32.xlu2 %v1102_v22, %s3499_s29  ;;  %1115 = vrot.lane.b32.xlu1 %v1100_v2, %s3499_s29 }
 0x3a4   :  { %1119 = vrot.lane.b32.xlu0 %v1104_v4, %s3499_s29 }
 0x3a5   :  { %1147 = vrot.lane.b32.xlu2 %v1144_v35, %s3498_s22  ;;  %1121 = vrot.lane.b32.xlu1 %v1106_v58, %s3499_s29 }
 0x3ac   :  { %1149 = vrot.lane.b32.xlu0 %v1145_v7, %s3498_s22 }
 0x3ad   :  { %1151 = vrot.lane.b32.xlu1 %v1146_v36, %s3498_s22 }
 0x3ef   :  { %v4057_v59 = vpop.permute.xlu2 %1111 }
 0x3f7   :  { %v4059_v42 = vpop.permute.xlu2 %1117 }
 0x3f8   :  { %6164 = vst [vmem:[#allocation48_spill] sm:$0xff] %v4059_v42 }
 0x3ff   :  { %v1148_v0 = vpop.permute.xlu2 %1147 }
 0x400   :  { %v1159_v47 = vmul.f32 %v1148_v0, %v3563_v20  ;;  %v1163_v13 = vmul.f32 %v1148_v0, %v3582_v28 }
 0x402   :  { %v1183_v3 = vrot.slane %v1159_v47, 2  ;;  %v1184_v55 = vrot.slane %v1163_v13, 2 }
 0x404   :  { %v1185_v62 = vsel %vm867_vm3, %v1183_v3, %v1184_v55 }
 0x405   :  { %1203 = vrot.lane.b32.xlu2 %v1185_v62, %s3500_s10 }
 0x406   :  { %v4065_v25 = vpop.permute.xlu0 %1107 }
 0x407   :  { %v4067_v1 = vpop.permute.xlu1 %1109 }
 0x40e   :  { %v4069_v29 = vpop.permute.xlu0 %1113 }
 0x40f   :  { %6165 = vst [vmem:[#allocation49_spill] sm:$0xff] %v4069_v29  ;;  %v4071_v60 = vpop.permute.xlu1 %1115 }
 0x410   :  { %6166 = vst [vmem:[#allocation50_spill] sm:$0xff] %v4071_v60  ;;  %v4156_v60 = vld [vmem:[%s6065_s0 + $0x28] sm:$0xff] }
 0x416   :  { %v4073_v22 = vpop.permute.xlu0 %1119 }
 0x417   :  { %6167 = vst [vmem:[#allocation51_spill] sm:$0xff] %v4073_v22  ;;  %v4075_v2 = vpop.permute.xlu1 %1121  ;;  %v1167_v22 = vmul.f32 %v1148_v0, %v3688_v37 }
 0x418   :  { %6168 = vst [vmem:[#allocation52_spill] sm:$0xff] %v4075_v2 }
 0x41e   :  { %v1150_v20 = vpop.permute.xlu0 %1149 }
 0x41f   :  { %v1153_v28 = vsel %vm221_vm1, %v1148_v0, %v1150_v20  ;;  %v1152_v63 = vpop.permute.xlu1 %1151 }
 0x420   :  { %v1160_v43 = vmul.f32 %v1153_v28, %v3610_v45  ;;  %v1164_v19 = vmul.f32 %v1153_v28, %v3638_v57  ;;  %v1154_v32 = vsel %vm221_vm1, %v1150_v20, %v1152_v63  ;;  %v1162_v35 = vmul.f32 %v1152_v63, %v3573_v23 }
 0x421   :  { %v1166_v4 = vmul.f32 %v1152_v63, %v3594_v34  ;;  %v1161_v36 = vmul.f32 %v1154_v32, %v3622_v52  ;;  %v1165_v47 = vmul.f32 %v1154_v32, %v3633_v56  ;;  %v1169_v34 = vmul.f32 %v1154_v32, %v3710_v51 }
 0x422   :  { %v1186_v58 = vrot.slane %v1160_v43, 2  ;;  %v1187_v7 = vrot.slane %v1164_v19, 2  ;;  %v1192_v13 = vrot.slane %v1162_v35, 2  ;;  %v1168_v20 = vmul.f32 %v1153_v28, %v3693_v38 }
 0x423   :  { %v1193_v3 = vrot.slane %v1166_v4, 2  ;;  %v1189_v45 = vrot.slane %v1161_v36, 2  ;;  %v1190_v2 = vrot.slane %v1165_v47, 2  ;;  %v1195_v43 = vrot.slane %v1167_v22, 2 }
 0x424   :  { %v1188_v62 = vsel %vm867_vm3, %v1186_v58, %v1187_v7  ;;  %v1199_v19 = vrot.slane %v1169_v34, 2  ;;  %v1197_v35 = vrot.slane %v1168_v20, 2  ;;  %v1170_v0 = vmul.f32 %v1152_v63, %v3715_v54  ;;  %v3395_v22 = vld [vmem:[%s6066_s1 + $0x31] ss:$8 sm:$0x7] }
 0x425   :  { %1205 = vrot.lane.b32.xlu0 %v1188_v62, %s3500_s10  ;;  %v1194_v23 = vsel %vm867_vm3, %v1192_v13, %v1193_v3  ;;  %v1191_v52 = vsel %vm867_vm3, %v1189_v45, %v1190_v2  ;;  %v1196_v4 = vsel %vm867_vm3, %v1184_v55, %v1195_v43  ;;  %v1241_v36 = vperm.slane %v3395_v22, 1  ;;  %v30_v63 = vld [vmem:[%s6066_s1] ss:$8 sm:$0x7] }
 0x426   :  { %1209 = vrot.lane.b32.xlu2 %v1194_v23, %s3500_s10  ;;  %1207 = vrot.lane.b32.xlu1 %v1191_v52, %s3500_s10  ;;  %v1200_v58 = vsel %vm867_vm3, %v1190_v2, %v1199_v19  ;;  %v1198_v28 = vsel %vm867_vm3, %v1187_v7, %v1197_v35  ;;  %v1201_v32 = vrot.slane %v1170_v0, 2  ;;  %v1240_v47 = vperm.slane %v3395_v22, 0  ;;  %v3384_v2 = vld [vmem:[%s6066_s1 + $0x3] ss:$8 sm:$0x7] }
 0x427   :  { %v1242_v54 = vperm.slane %v3395_v22, 2  ;;  %v350_v7 = vperm.slane %v3384_v2, 0  ;;  %v32_v13 = vperm.slane %v30_v63, 0  ;;  %v351_v62 = vperm.slane %v3384_v2, 1  ;;  %v4118_v34 = vld [vmem:[%s6065_s0] sm:$0xff] }
 0x428   :  { %v1202_v55 = vsel %vm867_vm3, %v1193_v3, %v1201_v32  ;;  %v33_v3 = vperm.slane %v30_v63, 1  ;;  %v352_v45 = vperm.slane %v3384_v2, 2  ;;  %v34_v23 = vperm.slane %v30_v63, 2  ;;  %v4124_v52 = vld [vmem:[%s6065_s0 + $0x20] sm:$0xff] }
 0x429   :  { %v356_v20 = vmul.f32 %v4118_v34, %v350_v7  ;;  %v359_v43 = vmul.f32 %v4124_v52, %v350_v7  ;;  %v38_v19 = vmul.f32 %v4118_v34, %v32_v13  ;;  %v123_v35 = vsel %vm122_vm4, %v3741_v9, %v3745_v11 }
 0x42a   :  { %v360_v22 = vmul.f32 %v351_v62, %v3638_v57  ;;  %v4146_v9 = vmul.f32 %v352_v45, %v3633_v56  ;;  %v261_v63 = vsel %vm260_vm5, %v3757_v17, %v3771_v26  ;;  %v42_v57 = vmul.f32 %v4156_v60, %v33_v3 }
 0x42b   :  { %v135_v2 = vadd.f32 %v123_v35, %v38_v19  ;;  %v362_v56 = vmul.f32 %v350_v7, %v3688_v37  ;;  %v126_v17 = vsel %vm122_vm4, %v3747_v12, %v3759_v18  ;;  %v364_v12 = vmul.f32 %v352_v45, %v3710_v51 }
 0x42c   :  { %v379_v37 = vrot.slane %v360_v22, 1  ;;  %v382_v35 = vrot.slane %v4146_v9, 1 }
 0x42d   :  { %1211 = vrot.lane.b32.xlu0 %v1196_v4, %s3500_s10  ;;  %v4134_v4 = vld [vmem:[%s6065_s0 + $0x8] sm:$0xff] }
 0x42e   :  { %1215 = vrot.lane.b32.xlu2 %v1200_v58, %s3500_s10  ;;  %1213 = vrot.lane.b32.xlu1 %v1198_v28, %s3500_s10  ;;  %v39_v0 = vmul.f32 %v4134_v4, %v33_v3  ;;  %v357_v58 = vmul.f32 %v4134_v4, %v351_v62  ;;  %v4141_v28 = vld [vmem:[%s6065_s0 + $0x10] sm:$0xff] }
 0x42f   :  { %v358_v32 = vmul.f32 %v4141_v28, %v352_v45  ;;  %v3390_v3 = vld [vmem:[%s6066_s1 + $0x6] ss:$8 sm:$0x7] }
 0x430   :  { %v378_v19 = vrot.slane %v357_v58, 1  ;;  %v262_v58 = vsel %vm260_vm5, %v3771_v26, %v3783_v33  ;;  %v843_v22 = vperm.slane %v3390_v3, 0  ;;  %v844_v42 = vperm.slane %v3390_v3, 1 }
 0x431   :  { %v381_v7 = vrot.slane %v358_v32, 1  ;;  %v384_v32 = vrot.slane %v362_v56, 1  ;;  %v4192_v51 = vperm.slane %v3390_v3, 2  ;;  %v127_v26 = vsel %vm122_vm4, %v3759_v18, %v3773_v27 }
 0x432   :  { %v380_v29 = vsel %vm374_vm2, %v378_v19, %v379_v37  ;;  %v4208_v18 = vmul.f32 %v4156_v60, %v844_v42  ;;  %v139_v3 = vadd.f32 %v127_v26, %v42_v57  ;;  %v535_v57 = vsel %vm122_vm4, %v3801_v46, %v3803_v48 }
 0x435   :  { %1217 = vrot.lane.b32.xlu0 %v1202_v55, %s3500_s10  ;;  %v375_v55 = vrot.slane %v356_v20, 1  ;;  %v125_v20 = vsel %vm122_vm4, %v3751_v14, %v3743_v10  ;;  %v4177_v10 = vld [vmem:[%s6065_s0 + $0x30] sm:$0xff] }
 0x436   :  { %1245 = vrot.lane.b32.xlu2 %v1241_v36, %s3498_s22  ;;  %1243 = vrot.lane.b32.xlu1 %v1240_v47, %s3498_s22  ;;  %v40_v36 = vmul.f32 %v4141_v28, %v34_v23  ;;  %v41_v47 = vmul.f32 %v4124_v52, %v32_v13  ;;  %v124_v13 = vsel %vm122_vm4, %v3745_v11, %v3751_v14 }
 0x437   :  { %v273_v11 = vadd.f32 %v261_v63, %v135_v2  ;;  %v4180_v14 = vmul.f32 %v4177_v10, %v34_v23  ;;  %v263_v23 = vsel %vm260_vm5, %v3783_v33, %v3763_v21  ;;  %v4202_v21 = vmul.f32 %v4124_v52, %v843_v22 }
 0x438   :  { %v137_v9 = vadd.f32 %v125_v20, %v40_v36  ;;  %v138_v2 = vadd.f32 %v126_v17, %v41_v47  ;;  %v388_v36 = vrot.slane %v364_v12, 1  ;;  %v264_v47 = vsel %vm260_vm5, %v3735_v5, %v3789_v39 }
 0x439   :  { %v849_v33 = vmul.f32 %v4118_v34, %v843_v22  ;;  %v850_v17 = vmul.f32 %v4134_v4, %v844_v42  ;;  %v534_v5 = vsel %vm122_vm4, %v3793_v41, %v3801_v46  ;;  %v4217_v19 = vmul.f32 %v4177_v10, %v4192_v51 }
 0x43a   :  { %v536_v41 = vsel %vm122_vm4, %v3803_v48, %v3799_v44  ;;  %v869_v12 = vrot.slane %v4202_v21, 2  ;;  %v727_v46 = vsel %vm260_vm5, %v3911_v30, %v3901_v61  ;;  %v728_v44 = vsel %vm260_vm5, %v3901_v61, %v3913_v6  ;;  %v4251_v61 = vld [vmem:[%s6065_s0 + $0x40] sm:$0x3] }
 0x43b   :  { %v855_v6 = vmul.f32 %v4251_v61, %v843_v22  ;;  %v266_v22 = vsel %vm260_vm5, %v3791_v40, %v3739_v8 }
 0x43d   :  { %1247 = vrot.lane.b32.xlu0 %v1242_v54, %s3498_s22  ;;  %v376_v54 = vrot.slane %v359_v43, 1  ;;  %v363_v43 = vmul.f32 %v351_v62, %v3693_v38  ;;  %v136_v62 = vadd.f32 %v124_v13, %v39_v0  ;;  %v275_v13 = vadd.f32 %v263_v23, %v137_v9 }
 0x43e   :  { %v871_v9 = vrot.slane %v850_v17, 2 }
 0x43f   :  { %v377_v38 = vsel %vm374_vm2, %v375_v55, %v376_v54  ;;  %v386_v63 = vrot.slane %v363_v43, 1  ;;  %v383_v55 = vsel %vm374_vm2, %v381_v7, %v382_v35  ;;  %v274_v45 = vadd.f32 %v262_v58, %v136_v62 }
 0x440   :  { %v396_v0 = vadd.f32 %v377_v38, %v273_v11  ;;  %v385_v56 = vsel %vm374_vm2, %v376_v54, %v384_v32  ;;  %v851_v54 = vmul.f32 %v4141_v28, %v4192_v51  ;;  %v276_v7 = vadd.f32 %v264_v47, %v138_v2 }
 0x441   :  { %v387_v20 = vsel %vm374_vm2, %v379_v37, %v386_v63  ;;  %v265_v37 = vsel %vm260_vm5, %v3789_v39, %v3791_v40  ;;  %v397_v11 = vadd.f32 %v380_v29, %v274_v45  ;;  %v726_v38 = vsel %vm260_vm5, %v3909_v24, %v3911_v30 }
 0x442   :  { %v868_v62 = vrot.slane %v849_v33, 2  ;;  %v546_v58 = vadd.f32 %v534_v5, %v396_v0  ;;  %v398_v32 = vadd.f32 %v383_v55, %v275_v13  ;;  %v872_v39 = vrot.slane %v4208_v18, 2 }
 0x443   :  { %v874_v29 = vrot.slane %v851_v54, 2  ;;  %v875_v2 = vrot.slane %v4217_v19, 2  ;;  %v277_v48 = vadd.f32 %v265_v37, %v139_v3  ;;  %v547_v24 = vadd.f32 %v535_v57, %v397_v11  ;;  %v6169_v3 = vld [vmem:[#allocation44_spill] sm:$0xff]  ;;  %v6170_v54 = vld [vmem:[#allocation43_spill] sm:$0xff] }
 0x444   :  { %v548_v63 = vadd.f32 %v536_v41, %v398_v32  ;;  %v738_v23 = vadd.f32 %v726_v38, %v546_v58  ;;  %v128_v55 = vsel %vm122_vm4, %v3773_v27, %v3753_v15  ;;  %v399_v26 = vadd.f32 %v385_v56, %v276_v7  ;;  %v6172_v11 = vld [vmem:[#allocation31_spill] sm:$0xff]  ;;  %v6173_v41 = vld [vmem:[#allocation32_spill] sm:$0xff] }
 0x445   :  { %v389_v45 = vsel %vm374_vm2, %v382_v35, %v388_v36  ;;  %v870_v30 = vsel %vm867_vm3, %v868_v62, %v869_v12  ;;  %v537_v0 = vsel %vm122_vm4, %v3807_v50, %v3809_v53  ;;  %v739_v47 = vadd.f32 %v727_v46, %v547_v24  ;;  %v4264_v50 = vld [vmem:[%s6065_s0 + $0x48] sm:$0x3] }
 0x446   :  { %v740_v21 = vadd.f32 %v728_v44, %v548_v63  ;;  %v876_v15 = vsel %vm867_vm3, %v874_v29, %v875_v2  ;;  %v1027_v27 = vsel %vm122_vm4, %v4007_v16, %v4005_v31  ;;  %v873_v35 = vsel %vm867_vm3, %v871_v9, %v872_v39  ;;  %v4290_v44 = vld [vmem:[%s6065_s0 + $0x50] sm:$0x3] }
 0x447   :  { %v856_v36 = vmul.f32 %v4264_v50, %v844_v42  ;;  %v140_v56 = vadd.f32 %v128_v55, %v4180_v14  ;;  %v400_v33 = vadd.f32 %v387_v20, %v277_v48  ;;  %v889_v13 = vadd.f32 %v870_v30, %v738_v23  ;;  %v6171_v20 = vld [vmem:[#allocation30_spill] sm:$0xff] }
 0x448   :  { %v538_v16 = vsel %vm122_vm4, %v3809_v53, %v3805_v49  ;;  %v549_v18 = vadd.f32 %v537_v0, %v399_v26  ;;  %v1028_v5 = vsel %vm122_vm4, %v4005_v31, %v6169_v3  ;;  %v1029_v42 = vsel %vm122_vm4, %v6169_v3, %v6170_v54 }
 0x449   :  { %v891_v14 = vadd.f32 %v876_v15, %v740_v21  ;;  %v877_v7 = vrot.slane %v855_v6, 2  ;;  %v1039_v37 = vadd.f32 %v1027_v27, %v889_v13  ;;  %v890_v8 = vadd.f32 %v873_v35, %v739_v47  ;;  %v6174_v47 = vld [vmem:[#allocation21_spill] sm:$0xff]  ;;  %v6176_v15 = vld [vmem:[#allocation42_spill] sm:$0xff] }
 0x44a   :  { %v729_v57 = vsel %vm260_vm5, %v6172_v11, %v6171_v20  ;;  %v730_v53 = vsel %vm260_vm5, %v6171_v20, %v6173_v41  ;;  %v879_v38 = vrot.slane %v856_v36, 2  ;;  %v550_v62 = vadd.f32 %v538_v16, %v400_v33  ;;  %v6177_v35 = vld [vmem:[#allocation46_spill] sm:$0xff] }
 0x44b   :  { %v1040_v58 = vadd.f32 %v1028_v5, %v890_v8  ;;  %v1041_v32 = vadd.f32 %v1029_v42, %v891_v14  ;;  %v278_v29 = vadd.f32 %v266_v22, %v140_v56  ;;  %v857_v48 = vmul.f32 %v4290_v44, %v4192_v51  ;;  %v6175_v51 = vld [vmem:[#allocation47_spill] sm:$0xff] }
 0x44c   :  { %v741_v23 = vadd.f32 %v729_v57, %v549_v18  ;;  %v878_v30 = vsel %vm867_vm3, %v869_v12, %v877_v7  ;;  %v880_v0 = vsel %vm867_vm3, %v872_v39, %v879_v38  ;;  %v539_v21 = vsel %vm122_vm4, %v3805_v49, %v6174_v47  ;;  %v6178_v12 = vld [vmem:[#allocation33_spill] sm:$0xff] }
 0x44d   :  { %v401_v6 = vadd.f32 %v389_v45, %v278_v29  ;;  %v1030_v27 = vsel %vm122_vm4, %v6176_v15, %v6175_v51  ;;  %v1031_v36 = vsel %vm122_vm4, %v6175_v51, %v6177_v35  ;;  %v881_v22 = vrot.slane %v857_v48, 2 }
 0x44e   :  { %v892_v56 = vadd.f32 %v878_v30, %v741_v23  ;;  %v731_v39 = vsel %vm260_vm5, %v6173_v41, %v6178_v12 }
 0x44f   :  { %v882_v42 = vsel %vm867_vm3, %v875_v2, %v881_v22 }
 0x450   :  { %v1042_v45 = vadd.f32 %v1030_v27, %v892_v56 }
 0x45f   :  { %v1204_v43 = vpop.permute.xlu2 %1203 }
 0x480   :  { %v1210_v17 = vpop.permute.xlu2 %1209 }
 0x488   :  { %v1216_v13 = vpop.permute.xlu2 %1215 }
 0x497   :  { %v1206_v40 = vpop.permute.xlu0 %1205 }
 0x498   :  { %v1219_v31 = vsel %vm260_vm5, %v1204_v43, %v1206_v40  ;;  %v1208_v46 = vpop.permute.xlu1 %1207  ;;  %v742_v43 = vadd.f32 %v730_v53, %v550_v62  ;;  %v1246_v62 = vpop.permute.xlu2 %1245 }
 0x499   :  { %v1231_v9 = vadd.f32 %v1219_v31, %v1039_v37  ;;  %v1220_v24 = vsel %vm260_vm5, %v1206_v40, %v1208_v46  ;;  %v1221_v63 = vsel %vm260_vm5, %v1208_v46, %v1210_v17  ;;  %v551_v17 = vadd.f32 %v539_v21, %v401_v6  ;;  %v6179_v37 = vld [vmem:[#allocation45_spill] sm:$0xff] }
 0x49a   :  { %v1232_v55 = vadd.f32 %v1220_v24, %v1040_v58  ;;  %v1233_v26 = vadd.f32 %v1221_v63, %v1041_v32  ;;  %v893_v33 = vadd.f32 %v880_v0, %v742_v43  ;;  %v1032_v8 = vsel %vm122_vm4, %v6177_v35, %v6179_v37  ;;  %v3458_v37 = vld [vmem:[%s6065_s0 + $0x58] sm:$0x3] }
 0x49b   :  { %1333 = vst [vmem:[#allocation2] sm:$0xff] %v1231_v9  ;;  %v743_v3 = vadd.f32 %v731_v39, %v551_v17  ;;  %v1363_v40 = vmul.f32 %v1231_v9, %v1231_v9 }
 0x49c   :  { %1334 = vst [vmem:[#allocation2 + $0x8] sm:$0xff] %v1232_v55  ;;  %v1043_v16 = vadd.f32 %v1031_v36, %v893_v33  ;;  %v1364_v20 = vmul.f32 %v1232_v55, %v1232_v55  ;;  %v1365_v63 = vmul.f32 %v1233_v26, %v1233_v26  ;;  %v3457_v33 = vld [vmem:[%s6065_s0 + $0x38] sm:$0xff] }
 0x49d   :  { %1335 = vst [vmem:[#allocation2 + $0x10] sm:$0xff] %v1233_v26  ;;  %v894_v38 = vadd.f32 %v882_v42, %v743_v3 }
 0x49f   :  { %v1212_v49 = vpop.permute.xlu0 %1211  ;;  %v1044_v58 = vadd.f32 %v1032_v8, %v894_v38  ;;  %v3409_v38 = vld [vmem:[%s6066_s1 + $0x1] ss:$8 sm:$0x7] }
 0x4a0   :  { %v1214_v18 = vpop.permute.xlu1 %1213 }
 0x4a1   :  { %v1222_v5 = vsel %vm260_vm5, %v1212_v49, %v1214_v18  ;;  %v1223_v54 = vsel %vm260_vm5, %v1214_v18, %v1216_v13 }
 0x4a2   :  { %v1234_v14 = vadd.f32 %v1222_v5, %v1042_v45  ;;  %v1235_v7 = vadd.f32 %v1223_v54, %v1043_v16 }
 0x4a4   :  { %1336 = vst [vmem:[#allocation2 + $0x18] sm:$0xff] %v1234_v14  ;;  %v4318_v11 = vadd.f32 %v1234_v14, %v1231_v9  ;;  %v4320_v57 = vadd.f32 %v1235_v7, %v1232_v55  ;;  %v1366_v41 = vmul.f32 %v1234_v14, %v1234_v14  ;;  %v1367_v53 = vmul.f32 %v1235_v7, %v1235_v7 }
 0x4a5   :  { %1337 = vst [vmem:[#allocation2 + $0x20] sm:$0xff] %v1235_v7 }
 0x4a6   :  { %6180 = vst [vmem:[#allocation44_spill] sm:$0xff] %v4318_v11  ;;  %v4322_v19 = vadd.f32 %v1366_v41, %v1363_v40  ;;  %v4324_v2 = vadd.f32 %v1367_v53, %v1364_v20 }
 0x4a7   :  { %6181 = vst [vmem:[#allocation43_spill] sm:$0xff] %v4320_v57  ;;  %v1218_v31 = vpop.permute.xlu0 %1217 }
 0x4a8   :  { %6182 = vst [vmem:[#allocation30_spill] sm:$0xff] %v4322_v19  ;;  %v1224_v32 = vsel %vm260_vm5, %v1216_v13, %v1218_v31  ;;  %v1244_v46 = vpop.permute.xlu1 %1243 }
 0x4a9   :  { %6183 = vst [vmem:[#allocation31_spill] sm:$0xff] %v4324_v2  ;;  %v1236_v29 = vadd.f32 %v1224_v32, %v1044_v58  ;;  %v1249_v9 = vsel %vm221_vm1, %v1244_v46, %v1246_v62  ;;  %v1255_v48 = vmul.f32 %v4118_v34, %v1244_v46  ;;  %v1259_v24 = vmul.f32 %v4124_v52, %v1244_v46 }
 0x4aa   :  { %v1256_v0 = vmul.f32 %v4134_v4, %v1249_v9  ;;  %v1260_v47 = vmul.f32 %v4156_v60, %v1249_v9  ;;  %v1263_v56 = vmul.f32 %v4251_v61, %v1244_v46  ;;  %v1264_v54 = vmul.f32 %v4264_v50, %v1249_v9  ;;  %v3385_v46 = vld [vmem:[%s6066_s1 + $0x1c] ss:$8 sm:$0x7]  ;;  %v3379_v9 = vld [vmem:[%s6066_s1 + $0x19] ss:$8 sm:$0x7] }
 0x4ab   :  { %1338 = vst [vmem:[#allocation2 + $0x28] sm:$0xff] %v1236_v29  ;;  %v4330_v23 = vadd.f32 %v1236_v29, %v1233_v26  ;;  %v1368_v43 = vmul.f32 %v1236_v29, %v1236_v29  ;;  %v1279_v55 = vrot.slane %v1255_v48, 2  ;;  %v1280_v30 = vrot.slane %v1259_v24, 2  ;;  %v3456_v26 = vld [vmem:[%s6065_s0 + $0x18] sm:$0xff] }
 0x4ac   :  { %v1282_v15 = vrot.slane %v1256_v0, 2  ;;  %v1283_v27 = vrot.slane %v1260_v47, 2  ;;  %v1291_v5 = vrot.slane %v1263_v56, 2  ;;  %v1293_v7 = vrot.slane %v1264_v54, 2  ;;  %v6193_v54 = vld [vmem:[#allocation9_spill] sm:$0xff] }
 0x4ad   :  { %6184 = vst [vmem:[#allocation32_spill] sm:$0xff] %v4330_v23  ;;  %v4334_v21 = vadd.f32 %v1368_v43, %v1365_v63  ;;  %v1281_v6 = vsel %vm867_vm3, %v1279_v55, %v1280_v30  ;;  %v1510_v58 = vperm.slane %v3409_v38, 1  ;;  %v1511_v32 = vperm.slane %v3409_v38, 2 }
 0x4ae   :  { %1299 = vrot.lane.b32.xlu1 %v1281_v6, %s3500_s10  ;;  %v1284_v22 = vsel %vm867_vm3, %v1282_v15, %v1283_v27  ;;  %v1292_v14 = vsel %vm867_vm3, %v1280_v30, %v1291_v5  ;;  %v1294_v20 = vsel %vm867_vm3, %v1283_v27, %v1293_v7  ;;  %v407_v29 = vperm.slane %v3385_v46, 2  ;;  %v3391_v27 = vld [vmem:[%s6066_s1 + $0x1f] ss:$8 sm:$0x7] }
 0x4af   :  { %6185 = vst [vmem:[#allocation21_spill] sm:$0xff] %v4334_v21  ;;  %v1248_v51 = vpop.permute.xlu0 %1247  ;;  %1301 = vrot.lane.b32.xlu2 %v1284_v22, %s3500_s10  ;;  %v53_v63 = vperm.slane %v3379_v9, 0  ;;  %v55_v43 = vperm.slane %v3379_v9, 2  ;;  %v54_v55 = vperm.slane %v3379_v9, 1  ;;  %v405_v30 = vperm.slane %v3385_v46, 0  ;;  %v6192_v5 = vld [vmem:[#allocation20_spill] sm:$0xff] }
 0x4b0   :  { %v1250_v35 = vsel %vm221_vm1, %v1246_v62, %v1248_v51  ;;  %v1258_v36 = vmul.f32 %v3456_v26, %v1248_v51  ;;  %v1262_v13 = vmul.f32 %v3457_v33, %v1248_v51  ;;  %v1266_v8 = vmul.f32 %v3458_v37, %v1248_v51  ;;  %v6186_v26 = vld [vmem:[#allocation15_spill] sm:$0xff]  ;;  %v6189_v33 = vld [vmem:[#allocation10_spill] sm:$0xff] }
 0x4b1   :  { %v1257_v12 = vmul.f32 %v4141_v28, %v1250_v35  ;;  %v1261_v39 = vmul.f32 %v4177_v10, %v1250_v35  ;;  %v1265_v42 = vmul.f32 %v4290_v44, %v1250_v35  ;;  %v1509_v62 = vperm.slane %v3409_v38, 0 }
 0x4b2   :  { %v1288_v49 = vrot.slane %v1258_v36, 2  ;;  %v1289_v16 = vrot.slane %v1262_v13, 2  ;;  %v1297_v41 = vrot.slane %v1266_v8, 2  ;;  %v413_v48 = vmul.f32 %v4141_v28, %v407_v29  ;;  %v6187_v36 = vld [vmem:[#allocation5_spill] sm:$0xff] }
 0x4b3   :  { %v1285_v17 = vrot.slane %v1257_v12, 2  ;;  %v1286_v45 = vrot.slane %v1261_v39, 2  ;;  %v1295_v40 = vrot.slane %v1265_v42, 2  ;;  %v416_v24 = vmul.f32 %v4177_v10, %v407_v29  ;;  %v6188_v39 = vld [vmem:[#allocation8_spill] sm:$0xff] }
 0x4b4   :  { %v1290_v3 = vsel %vm867_vm3, %v1288_v49, %v1289_v16  ;;  %v1298_v31 = vsel %vm867_vm3, %v1289_v16, %v1297_v41  ;;  %v435_v0 = vrot.slane %v413_v48, 1  ;;  %v411_v6 = vmul.f32 %v4118_v34, %v405_v30  ;;  %v6190_v16 = vld [vmem:[#allocation6_spill] sm:$0xff] }
 0x4b5   :  { %v1287_v18 = vsel %vm867_vm3, %v1285_v17, %v1286_v45  ;;  %v1296_v53 = vsel %vm867_vm3, %v1286_v45, %v1295_v40  ;;  %v436_v47 = vrot.slane %v416_v24, 1  ;;  %v59_v51 = vmul.f32 %v4118_v34, %v53_v63 }
 0x4b6   :  { %1303 = vrot.lane.b32.xlu0 %v1287_v18, %s3500_s10  ;;  %1305 = vrot.lane.b32.xlu1 %v1290_v3, %s3500_s10  ;;  %v406_v15 = vperm.slane %v3385_v46, 1  ;;  %v64_v35 = vmul.f32 %v4177_v10, %v55_v43  ;;  %v191_v56 = vsel %vm122_vm4, %v6187_v36, %v6186_v26  ;;  %v60_v22 = vmul.f32 %v4134_v4, %v54_v55  ;;  %v6191_v18 = vld [vmem:[#allocation16_spill] sm:$0xff] }
 0x4b7   :  { %1307 = vrot.lane.b32.xlu2 %v1292_v14, %s3500_s10  ;;  %v414_v12 = vmul.f32 %v4124_v52, %v405_v30  ;;  %v196_v13 = vsel %vm122_vm4, %v6189_v33, %v6188_v39  ;;  %v61_v49 = vmul.f32 %v4141_v28, %v55_v43  ;;  %v437_v17 = vsel %vm374_vm2, %v435_v0, %v436_v47  ;;  %v6195_v43 = vld [vmem:[#allocation14_spill] sm:$0xff]  ;;  %v6199_v39 = vld [vmem:[#allocation7_spill] sm:$0xff] }
 0x4b8   :  { %v417_v45 = vmul.f32 %v4251_v61, %v405_v30  ;;  %v193_v3 = vsel %vm122_vm4, %v6191_v18, %v6190_v16  ;;  %v329_v42 = vsel %vm260_vm5, %v6193_v54, %v6192_v5  ;;  %v429_v14 = vrot.slane %v411_v6, 1  ;;  %v6201_v16 = vld [vmem:[#allocation34_spill] sm:$0xff] }
 0x4b9   :  { %v4404_v7 = vperm.slane %v3391_v27, 0  ;;  %v203_v37 = vadd.f32 %v191_v56, %v59_v51  ;;  %v412_v8 = vmul.f32 %v4134_v4, %v406_v15  ;;  %v415_v40 = vmul.f32 %v4156_v60, %v406_v15 }
 0x4ba   :  { %v62_v41 = vmul.f32 %v4124_v52, %v53_v63  ;;  %v430_v38 = vrot.slane %v414_v12, 1  ;;  %v438_v46 = vrot.slane %v417_v45, 1  ;;  %v192_v9 = vsel %vm122_vm4, %v6186_v26, %v6191_v18  ;;  %v6194_v63 = vld [vmem:[#allocation11_spill] sm:$0xff]  ;;  %v6198_v12 = vld [vmem:[#allocation18_spill] sm:$0xff]  ;;  %v6200_v45 = vld [vmem:[#allocation36_spill] sm:$0xff] }
 0x4bb   :  { %v4420_v24 = vmul.f32 %v4124_v52, %v4404_v7  ;;  %v432_v30 = vrot.slane %v412_v8, 1  ;;  %v433_v0 = vrot.slane %v415_v40, 1  ;;  %v330_v51 = vsel %vm260_vm5, %v6192_v5, %v6195_v43 }
 0x4bc   :  { %v431_v48 = vsel %vm374_vm2, %v429_v14, %v430_v38  ;;  %v899_v36 = vperm.slane %v3391_v27, 1  ;;  %v204_v56 = vadd.f32 %v192_v9, %v60_v22  ;;  %v822_v18 = vsel %vm260_vm5, %v6201_v16, %v6200_v45 }
 0x4bd   :  { %v923_v5 = vrot.slane %v4420_v24, 2  ;;  %v900_v54 = vperm.slane %v3391_v27, 2  ;;  %v439_v22 = vsel %vm374_vm2, %v430_v38, %v438_v46  ;;  %v195_v38 = vsel %vm122_vm4, %v6198_v12, %v6189_v33  ;;  %v6204_v46 = vld [vmem:[#allocation19_spill] sm:$0xff] }
 0x4be   :  { %1309 = vrot.lane.b32.xlu0 %v1294_v20, %s3500_s10  ;;  %1311 = vrot.lane.b32.xlu1 %v1296_v53, %s3500_s10  ;;  %v419_v20 = vmul.f32 %v4290_v44, %v407_v29  ;;  %v63_v53 = vmul.f32 %v4156_v60, %v54_v55  ;;  %v904_v29 = vmul.f32 %v4118_v34, %v4404_v7 }
 0x4bf   :  { %1313 = vrot.lane.b32.xlu2 %v1298_v31, %s3500_s10  ;;  %v418_v31 = vmul.f32 %v4264_v50, %v406_v15  ;;  %v331_v55 = vsel %vm260_vm5, %v6195_v43, %v6194_v63  ;;  %v6196_v15 = vld [vmem:[#allocation22_spill] sm:$0xff] }
 0x4c0   :  { %v442_v6 = vrot.slane %v419_v20, 1  ;;  %v905_v20 = vmul.f32 %v4134_v4, %v899_v36  ;;  %v906_v4 = vmul.f32 %v4141_v28, %v900_v54 }
 0x4c1   :  { %v440_v34 = vrot.slane %v418_v31, 1  ;;  %v4444_v31 = vmul.f32 %v4156_v60, %v899_v36  ;;  %v4457_v60 = vmul.f32 %v4177_v10, %v900_v54 }
 0x4c2   :  { %v443_v8 = vsel %vm374_vm2, %v436_v47, %v442_v6  ;;  %v925_v10 = vrot.slane %v905_v20, 2 }
 0x4c3   :  { %v441_v40 = vsel %vm374_vm2, %v433_v0, %v440_v34  ;;  %v926_v6 = vrot.slane %v4444_v31, 2  ;;  %v6208_v34 = vld [vmem:[#allocation37_spill] sm:$0xff] }
 0x4c6   :  { %1512 = vrot.lane.b32.xlu0 %v1509_v62, %s3497_s19  ;;  %1514 = vrot.lane.b32.xlu1 %v1510_v58, %s3497_s19  ;;  %v208_v62 = vadd.f32 %v196_v13, %v64_v35  ;;  %v205_v58 = vadd.f32 %v193_v3, %v61_v49  ;;  %v6197_v35 = vld [vmem:[#allocation23_spill] sm:$0xff]  ;;  %v194_v13 = vsel %vm122_vm4, %v6199_v39, %v6198_v12  ;;  %v922_v3 = vrot.slane %v904_v29, 2 }
 0x4c7   :  { %1516 = vrot.lane.b32.xlu2 %v1511_v32, %s3497_s19  ;;  %v341_v32 = vadd.f32 %v329_v42, %v203_v37  ;;  %v630_v26 = vsel %vm122_vm4, %v6197_v35, %v6196_v15  ;;  %v342_v42 = vadd.f32 %v330_v51, %v204_v56  ;;  %v434_v37 = vsel %vm374_vm2, %v432_v30, %v433_v0  ;;  %v6207_v0 = vld [vmem:[#allocation25_spill] sm:$0xff]  ;;  %v6209_v12 = vld [vmem:[#allocation35_spill] sm:$0xff] }
 0x4c8   :  { %v343_v52 = vadd.f32 %v331_v55, %v205_v58  ;;  %v6202_v58 = vld [vmem:[#allocation17_spill] sm:$0xff]  ;;  %v206_v27 = vadd.f32 %v194_v13, %v62_v41  ;;  %v924_v47 = vsel %vm867_vm3, %v922_v3, %v923_v5  ;;  %v6206_v55 = vld [vmem:[#allocation26_spill] sm:$0xff]  ;;  %v1123_v51 = vsel %vm122_vm4, %v4065_v25, %v4067_v1 }
 0x4c9   :  { %v450_v49 = vadd.f32 %v431_v48, %v341_v32  ;;  %v6203_v32 = vld [vmem:[#allocation12_spill] sm:$0xff]  ;;  %v333_v63 = vsel %vm260_vm5, %v6202_v58, %v6204_v46  ;;  %v6205_v41 = vld [vmem:[#allocation13_spill] sm:$0xff]  ;;  %v451_v43 = vadd.f32 %v434_v37, %v342_v42  ;;  %v631_v33 = vsel %vm122_vm4, %v6196_v15, %v6206_v55 }
 0x4ca   :  { %v332_v9 = vsel %vm260_vm5, %v6203_v32, %v6202_v58  ;;  %v452_v48 = vadd.f32 %v437_v17, %v343_v52  ;;  %v334_v17 = vsel %vm260_vm5, %v6204_v46, %v6205_v41  ;;  %v632_v28 = vsel %vm122_vm4, %v6206_v55, %v6207_v0 }
 0x4cb   :  { %v642_v14 = vadd.f32 %v630_v26, %v450_v49  ;;  %v207_v35 = vadd.f32 %v195_v38, %v63_v53  ;;  %v344_v26 = vadd.f32 %v332_v9, %v206_v27  ;;  %v823_v56 = vsel %vm260_vm5, %v6200_v45, %v6208_v34  ;;  %v6210_v53 = vld [vmem:[#allocation29_spill] sm:$0xff] }
 0x4cc   :  { %v643_v15 = vadd.f32 %v631_v33, %v451_v43  ;;  %v824_v39 = vsel %vm260_vm5, %v6208_v34, %v6209_v12  ;;  %v928_v13 = vrot.slane %v906_v4, 2  ;;  %v929_v49 = vrot.slane %v4457_v60, 2  ;;  %v6213_v4 = vld [vmem:[#allocation28_spill] sm:$0xff]  ;;  %v6218_v33 = vld [vmem:[#allocation41_spill] sm:$0xff] }
 0x4cd   :  { %v834_v29 = vadd.f32 %v822_v18, %v642_v14  ;;  %v345_v16 = vadd.f32 %v333_v63, %v207_v35  ;;  %v346_v18 = vadd.f32 %v334_v17, %v208_v62  ;;  %v644_v3 = vadd.f32 %v632_v28, %v452_v48  ;;  %v6211_v14 = vld [vmem:[#allocation24_spill] sm:$0xff] }
 0x4ce   :  { %v633_v37 = vsel %vm122_vm4, %v6211_v14, %v6210_v53  ;;  %v835_v20 = vadd.f32 %v823_v56, %v643_v15  ;;  %v927_v45 = vsel %vm867_vm3, %v925_v10, %v926_v6  ;;  %v910_v32 = vmul.f32 %v4251_v61, %v4404_v7 }
 0x4cf   :  { %v943_v52 = vadd.f32 %v924_v47, %v834_v29  ;;  %v836_v58 = vadd.f32 %v824_v39, %v644_v3  ;;  %v911_v9 = vmul.f32 %v4264_v50, %v899_v36  ;;  %v453_v62 = vadd.f32 %v439_v22, %v344_v26  ;;  %v6212_v47 = vld [vmem:[#allocation27_spill] sm:$0xff]  ;;  %v6214_v36 = vld [vmem:[#allocation49_spill] sm:$0xff] }
 0x4d0   :  { %v930_v48 = vsel %vm867_vm3, %v928_v13, %v929_v49  ;;  %v912_v29 = vmul.f32 %v4290_v44, %v900_v54  ;;  %v455_v38 = vadd.f32 %v443_v8, %v346_v18  ;;  %v635_v60 = vsel %vm122_vm4, %v6213_v4, %v6212_v47  ;;  %v6215_v54 = vld [vmem:[#allocation40_spill] sm:$0xff]  ;;  %v6216_v22 = vld [vmem:[#allocation39_spill] sm:$0xff] }
 0x4d1   :  { %v1135_v42 = vadd.f32 %v1123_v51, %v943_v52  ;;  %v454_v46 = vadd.f32 %v441_v40, %v345_v16  ;;  %v1124_v63 = vsel %vm122_vm4, %v4067_v1, %v4057_v59  ;;  %v634_v61 = vsel %vm122_vm4, %v6210_v53, %v6213_v4  ;;  %v6217_v1 = vld [vmem:[#allocation38_spill] sm:$0xff] }
 0x4d2   :  { %v645_v50 = vadd.f32 %v633_v37, %v453_v62  ;;  %v944_v7 = vadd.f32 %v927_v45, %v835_v20  ;;  %v1125_v44 = vsel %vm122_vm4, %v4057_v59, %v6214_v36  ;;  %v825_v8 = vsel %vm260_vm5, %v6216_v22, %v6215_v54  ;;  %v6220_v53 = vld [vmem:[#allocation50_spill] sm:$0xff]  ;;  %v6221_v37 = vld [vmem:[#allocation51_spill] sm:$0xff]  ;;  %v6222_v45 = vld [vmem:[#allocation52_spill] sm:$0xff] }
 0x4d3   :  { %v945_v40 = vadd.f32 %v930_v48, %v836_v58  ;;  %v931_v41 = vrot.slane %v910_v32, 2  ;;  %v933_v17 = vrot.slane %v911_v9, 2  ;;  %v826_v55 = vsel %vm260_vm5, %v6215_v54, %v6217_v1 }
 0x4d4   :  { %v827_v0 = vsel %vm260_vm5, %v6217_v1, %v6218_v33  ;;  %v1136_v28 = vadd.f32 %v1124_v63, %v944_v7  ;;  %v935_v10 = vrot.slane %v912_v29, 2  ;;  %v647_v59 = vadd.f32 %v635_v60, %v455_v38 }
 0x4d5   :  { %v646_v35 = vadd.f32 %v634_v61, %v454_v46  ;;  %v1137_v26 = vadd.f32 %v1125_v44, %v945_v40  ;;  %v837_v52 = vadd.f32 %v825_v8, %v645_v50  ;;  %v932_v16 = vsel %vm867_vm3, %v923_v5, %v931_v41 }
 0x4d6   :  { %v839_v13 = vadd.f32 %v827_v0, %v647_v59  ;;  %v934_v3 = vsel %vm867_vm3, %v926_v6, %v933_v17  ;;  %v1128_v24 = vsel %vm122_vm4, %v6221_v37, %v6222_v45 }
 0x4d7   :  { %v838_v39 = vadd.f32 %v826_v55, %v646_v35  ;;  %v946_v14 = vadd.f32 %v932_v16, %v837_v52  ;;  %v4552_v55 = vld [vmem:[%s6065_s0 + $0x68] sm:$0xff]  ;;  %v4568_v35 = vld [vmem:[%s6065_s0 + $0x78] sm:$0xff] }
 0x4d8   :  { %v3410_v16 = vld [vmem:[%s6066_s1 + $0x1a] ss:$8 sm:$0x7] }
 0x4d9   :  { %v947_v5 = vadd.f32 %v934_v3, %v838_v39  ;;  %v4596_v39 = vld [vmem:[%s6065_s0 + $0x98] sm:$0xff] }
 0x509   :  { %v1302_v30 = vpop.permute.xlu2 %1301 }
 0x511   :  { %v1308_v43 = vpop.permute.xlu2 %1307 }
 0x519   :  { %v1314_v9 = vpop.permute.xlu2 %1313 }
 0x520   :  { %v1300_v25 = vpop.permute.xlu1 %1299 }
 0x521   :  { %v1315_v31 = vsel %vm260_vm5, %v1300_v25, %v1302_v30  ;;  %v6219_v25 = vld [vmem:[#allocation48_spill] sm:$0xff]  ;;  %v1517_v1 = vpop.permute.xlu2 %1516 }
 0x522   :  { %v1327_v27 = vadd.f32 %v1315_v31, %v1135_v42  ;;  %v936_v42 = vsel %vm867_vm3, %v929_v49, %v935_v10  ;;  %v1127_v20 = vsel %vm122_vm4, %v6219_v25, %v6221_v37  ;;  %v1531_v3 = vmul.f32 %v4596_v39, %v1517_v1 }
 0x523   :  { %v948_v31 = vadd.f32 %v936_v42, %v839_v13  ;;  %v1139_v49 = vadd.f32 %v1127_v20, %v947_v5  ;;  %v1577_v42 = vperm.slane %v3410_v16, 1 }
 0x524   :  { %1394 = vst [vmem:[#allocation2 + $0x30] sm:$0xff] %v1327_v27  ;;  %v1424_v4 = vmul.f32 %v1327_v27, %v1327_v27 }
 0x525   :  { %v1140_v32 = vadd.f32 %v1128_v24, %v948_v31 }
 0x528   :  { %v1304_v51 = vpop.permute.xlu0 %1303  ;;  %v1306_v56 = vpop.permute.xlu1 %1305 }
 0x529   :  { %v1316_v34 = vsel %vm260_vm5, %v1302_v30, %v1304_v51  ;;  %v1317_v12 = vsel %vm260_vm5, %v1304_v51, %v1306_v56  ;;  %v1126_v30 = vsel %vm122_vm4, %v6220_v53, %v6219_v25  ;;  %v4581_v56 = vld [vmem:[%s6065_s0 + $0x88] sm:$0xff]  ;;  %v1578_v25 = vperm.slane %v3410_v16, 2 }
 0x52a   :  { %v1328_v15 = vadd.f32 %v1316_v34, %v1136_v28  ;;  %v1329_v18 = vadd.f32 %v1317_v12, %v1137_v26  ;;  %v1138_v6 = vadd.f32 %v1126_v30, %v946_v14  ;;  %v4559_v28 = vld [vmem:[%s6065_s0 + $0x70] sm:$0xff]  ;;  %v1527_v26 = vmul.f32 %v4568_v35, %v1517_v1  ;;  %v4576_v34 = vld [vmem:[%s6065_s0 + $0x80] sm:$0xff] }
 0x52b   :  { %v4591_v12 = vld [vmem:[%s6065_s0 + $0x90] sm:$0xff] }
 0x52c   :  { %1395 = vst [vmem:[#allocation2 + $0x38] sm:$0xff] %v1328_v15  ;;  %v1425_v63 = vmul.f32 %v1328_v15, %v1328_v15  ;;  %v1426_v61 = vmul.f32 %v1329_v18, %v1329_v18 }
 0x52d   :  { %1396 = vst [vmem:[#allocation2 + $0x40] sm:$0xff] %v1329_v18 }
 0x530   :  { %v1310_v58 = vpop.permute.xlu0 %1309  ;;  %v1312_v62 = vpop.permute.xlu1 %1311 }
 0x531   :  { %v1318_v48 = vsel %vm260_vm5, %v1308_v43, %v1310_v58  ;;  %v1320_v29 = vsel %vm260_vm5, %v1312_v62, %v1314_v9  ;;  %v1319_v38 = vsel %vm260_vm5, %v1310_v58, %v1312_v62 }
 0x532   :  { %v1330_v47 = vadd.f32 %v1318_v48, %v1138_v6  ;;  %v1332_v60 = vadd.f32 %v1320_v29, %v1140_v32  ;;  %v1331_v46 = vadd.f32 %v1319_v38, %v1139_v49 }
 0x534   :  { %1397 = vst [vmem:[#allocation2 + $0x48] sm:$0xff] %v1330_v47  ;;  %v4532_v50 = vadd.f32 %v1330_v47, %v1327_v27  ;;  %v1427_v7 = vmul.f32 %v1330_v47, %v1330_v47  ;;  %v4534_v36 = vadd.f32 %v1332_v60, %v1329_v18  ;;  %v1429_v44 = vmul.f32 %v1332_v60, %v1332_v60  ;;  %v4547_v27 = vld [vmem:[%s6065_s0 + $0x60] sm:$0xff] }
 0x535   :  { %1399 = vst [vmem:[#allocation2 + $0x58] sm:$0xff] %v1332_v60  ;;  %v4536_v54 = vadd.f32 %v1331_v46, %v1328_v15  ;;  %v1428_v22 = vmul.f32 %v1331_v46, %v1331_v46  ;;  %v1576_v18 = vperm.slane %v3410_v16, 0  ;;  %v3411_v60 = vld [vmem:[%s6066_s1 + $0x2] ss:$8 sm:$0x7] }
 0x536   :  { %6223 = vst [vmem:[#allocation47_spill] sm:$0xff] %v4532_v50  ;;  %v4538_v8 = vadd.f32 %v1427_v7, %v1424_v4  ;;  %v4540_v40 = vadd.f32 %v1429_v44, %v1426_v61  ;;  %v1643_v61 = vperm.slane %v3411_v60, 0  ;;  %v1645_v7 = vperm.slane %v3411_v60, 2 }
 0x537   :  { %6224 = vst [vmem:[#allocation42_spill] sm:$0xff] %v4534_v36  ;;  %v4542_v41 = vadd.f32 %v1428_v22, %v1425_v63 }
 0x538   :  { %6225 = vst [vmem:[#allocation46_spill] sm:$0xff] %v4536_v54  ;;  %v1513_v17 = vpop.permute.xlu0 %1512  ;;  %v1515_v43 = vpop.permute.xlu1 %1514 }
 0x539   :  { %1398 = vst [vmem:[#allocation2 + $0x50] sm:$0xff] %v1331_v46  ;;  %v1524_v33 = vmul.f32 %v4547_v27, %v1513_v17  ;;  %v1518_v0 = vsel %vm83_vm0, %v1513_v17, %v1515_v43  ;;  %v1519_v51 = vsel %vm83_vm0, %v1515_v43, %v1517_v1  ;;  %v1528_v52 = vmul.f32 %v4576_v34, %v1513_v17 }
 0x53a   :  { %6226 = vst [vmem:[#allocation33_spill] sm:$0xff] %v4538_v8  ;;  %v1525_v10 = vmul.f32 %v4552_v55, %v1518_v0  ;;  %v1526_v59 = vmul.f32 %v4559_v28, %v1519_v51  ;;  %v1529_v15 = vmul.f32 %v4581_v56, %v1518_v0  ;;  %v1530_v13 = vmul.f32 %v4591_v12, %v1519_v51 }
 0x53b   :  { %6227 = vst [vmem:[#allocation45_spill] sm:$0xff] %v4540_v40  ;;  %1540 = vrot.lane.b32.xlu0 %v1524_v33, %s3499_s29  ;;  %v1644_v46 = vperm.slane %v3411_v60, 1 }
 0x53c   :  { %6228 = vst [vmem:[#allocation15_spill] sm:$0xff] %v4542_v41  ;;  %1542 = vrot.lane.b32.xlu1 %v1525_v10, %s3499_s29  ;;  %1544 = vrot.lane.b32.xlu2 %v1526_v59, %s3499_s29 }
 0x543   :  { %1546 = vrot.lane.b32.xlu0 %v1527_v26, %s3499_s29 }
 0x544   :  { %1548 = vrot.lane.b32.xlu1 %v1528_v52, %s3499_s29  ;;  %1550 = vrot.lane.b32.xlu2 %v1529_v15, %s3499_s29 }
 0x54b   :  { %1552 = vrot.lane.b32.xlu0 %v1530_v13, %s3499_s29 }
 0x54c   :  { %1554 = vrot.lane.b32.xlu1 %v1531_v3, %s3499_s29  ;;  %1579 = vrot.lane.b32.xlu2 %v1576_v18, %s3497_s19 }
 0x553   :  { %1581 = vrot.lane.b32.xlu0 %v1577_v42, %s3497_s19 }
 0x554   :  { %1583 = vrot.lane.b32.xlu1 %v1578_v25, %s3497_s19 }
 0x596   :  { %v4608_v53 = vpop.permute.xlu2 %1544 }
 0x59e   :  { %v4610_v30 = vpop.permute.xlu2 %1550 }
 0x59f   :  { %6229 = vst [vmem:[#allocation5_spill] sm:$0xff] %v4610_v30 }
 0x5a6   :  { %v1580_v14 = vpop.permute.xlu2 %1579 }
 0x5a7   :  { %v1591_v37 = vmul.f32 %v4547_v27, %v1580_v14  ;;  %v1595_v38 = vmul.f32 %v4576_v34, %v1580_v14 }
 0x5a9   :  { %1607 = vrot.lane.b32.xlu2 %v1591_v37, %s3499_s29 }
 0x5ad   :  { %v4614_v20 = vpop.permute.xlu0 %1540 }
 0x5ae   :  { %v4616_v45 = vpop.permute.xlu1 %1542 }
 0x5b5   :  { %v4618_v24 = vpop.permute.xlu0 %1546 }
 0x5b6   :  { %6230 = vst [vmem:[#allocation8_spill] sm:$0xff] %v4618_v24  ;;  %v4620_v5 = vpop.permute.xlu1 %1548 }
 0x5b7   :  { %6231 = vst [vmem:[#allocation10_spill] sm:$0xff] %v4620_v5 }
 0x5bd   :  { %v4622_v31 = vpop.permute.xlu0 %1552 }
 0x5be   :  { %6232 = vst [vmem:[#allocation6_spill] sm:$0xff] %v4622_v31  ;;  %v4624_v6 = vpop.permute.xlu1 %1554 }
 0x5bf   :  { %6233 = vst [vmem:[#allocation16_spill] sm:$0xff] %v4624_v6 }
 0x5c5   :  { %v1582_v58 = vpop.permute.xlu0 %1581 }
 0x5c6   :  { %v1585_v49 = vsel %vm83_vm0, %v1580_v14, %v1582_v58  ;;  %v1584_v9 = vpop.permute.xlu1 %1583 }
 0x5c7   :  { %v1592_v32 = vmul.f32 %v4552_v55, %v1585_v49  ;;  %v1586_v62 = vsel %vm83_vm0, %v1582_v58, %v1584_v9  ;;  %v1594_v48 = vmul.f32 %v4568_v35, %v1584_v9  ;;  %v1596_v4 = vmul.f32 %v4581_v56, %v1585_v49  ;;  %v3412_v58 = vld [vmem:[%s6066_s1 + $0x1b] ss:$8 sm:$0x7] }
 0x5c8   :  { %v1593_v29 = vmul.f32 %v4559_v28, %v1586_v62  ;;  %v1597_v47 = vmul.f32 %v4591_v12, %v1586_v62  ;;  %v1598_v63 = vmul.f32 %v4596_v39, %v1584_v9  ;;  %v1710_v49 = vperm.slane %v3412_v58, 0 }
 0x5c9   :  { %1609 = vrot.lane.b32.xlu0 %v1592_v32, %s3499_s29  ;;  %1613 = vrot.lane.b32.xlu2 %v1594_v48, %s3499_s29  ;;  %v1711_v32 = vperm.slane %v3412_v58, 1  ;;  %v1712_v9 = vperm.slane %v3412_v58, 2 }
 0x5ca   :  { %1611 = vrot.lane.b32.xlu1 %v1593_v29, %s3499_s29 }
 0x5d1   :  { %1615 = vrot.lane.b32.xlu0 %v1595_v38, %s3499_s29  ;;  %1619 = vrot.lane.b32.xlu2 %v1597_v47, %s3499_s29 }
 0x5d2   :  { %1617 = vrot.lane.b32.xlu1 %v1596_v4, %s3499_s29 }
 0x5d9   :  { %1621 = vrot.lane.b32.xlu0 %v1598_v63, %s3499_s29  ;;  %1648 = vrot.lane.b32.xlu2 %v1644_v46, %s3498_s22 }
 0x5da   :  { %1646 = vrot.lane.b32.xlu1 %v1643_v61, %s3498_s22 }
 0x5e1   :  { %1650 = vrot.lane.b32.xlu0 %v1645_v7, %s3498_s22 }
 0x603   :  { %v4648_v44 = vpop.permute.xlu2 %1607 }
 0x623   :  { %v4650_v22 = vpop.permute.xlu2 %1613 }
 0x62b   :  { %v4656_v1 = vpop.permute.xlu2 %1619 }
 0x633   :  { %v1649_v51 = vpop.permute.xlu2 %1648 }
 0x63b   :  { %v4652_v17 = vpop.permute.xlu0 %1609 }
 0x63c   :  { %v4654_v43 = vpop.permute.xlu1 %1611 }
 0x643   :  { %v4658_v33 = vpop.permute.xlu0 %1615 }
 0x644   :  { %v4660_v0 = vpop.permute.xlu1 %1617 }
 0x64b   :  { %v4662_v10 = vpop.permute.xlu0 %1621 }
 0x64c   :  { %v1647_v59 = vpop.permute.xlu1 %1646 }
 0x64d   :  { %v1652_v26 = vsel %vm221_vm1, %v1647_v59, %v1649_v51  ;;  %v1658_v52 = vmul.f32 %v4547_v27, %v1647_v59  ;;  %v1662_v42 = vmul.f32 %v4576_v34, %v1647_v59 }
 0x64e   :  { %v1659_v15 = vmul.f32 %v4552_v55, %v1652_v26  ;;  %v1663_v25 = vmul.f32 %v4581_v56, %v1652_v26 }
 0x64f   :  { %1674 = vrot.lane.b32.xlu1 %v1658_v52, %s3500_s10 }
 0x650   :  { %1676 = vrot.lane.b32.xlu2 %v1659_v15, %s3500_s10 }
 0x653   :  { %v1651_v13 = vpop.permute.xlu0 %1650 }
 0x654   :  { %v1653_v16 = vsel %vm221_vm1, %v1649_v51, %v1651_v13  ;;  %v1661_v18 = vmul.f32 %v4568_v35, %v1651_v13  ;;  %v1665_v37 = vmul.f32 %v4596_v39, %v1651_v13 }
 0x655   :  { %v1660_v3 = vmul.f32 %v4559_v28, %v1653_v16  ;;  %v1664_v14 = vmul.f32 %v4591_v12, %v1653_v16 }
 0x657   :  { %1678 = vrot.lane.b32.xlu0 %v1660_v3, %s3500_s10  ;;  %1680 = vrot.lane.b32.xlu1 %v1661_v18, %s3500_s10  ;;  %v3415_v3 = vld [vmem:[%s6066_s1 + $0x4] ss:$8 sm:$0x7] }
 0x658   :  { %1682 = vrot.lane.b32.xlu2 %v1662_v42, %s3500_s10  ;;  %v1885_v58 = vperm.slane %v3415_v3, 2 }
 0x65f   :  { %1684 = vrot.lane.b32.xlu0 %v1663_v25, %s3500_s10  ;;  %1686 = vrot.lane.b32.xlu1 %v1664_v14, %s3500_s10  ;;  %v1883_v25 = vperm.slane %v3415_v3, 0 }
 0x660   :  { %1688 = vrot.lane.b32.xlu2 %v1665_v37, %s3500_s10  ;;  %v1884_v37 = vperm.slane %v3415_v3, 1 }
 0x667   :  { %1713 = vrot.lane.b32.xlu0 %v1710_v49, %s3498_s22  ;;  %1715 = vrot.lane.b32.xlu1 %v1711_v32, %s3498_s22 }
 0x668   :  { %1717 = vrot.lane.b32.xlu2 %v1712_v9, %s3498_s22 }
 0x6aa   :  { %v4688_v62 = vpop.permute.xlu2 %1676 }
 0x6b2   :  { %v4692_v29 = vpop.permute.xlu2 %1682 }
 0x6b3   :  { %6234 = vst [vmem:[#allocation20_spill] sm:$0xff] %v4692_v29 }
 0x6ba   :  { %v4698_v4 = vpop.permute.xlu2 %1688 }
 0x6bb   :  { %6237 = vst [vmem:[#allocation14_spill] sm:$0xff] %v4698_v4 }
 0x6c1   :  { %v4690_v48 = vpop.permute.xlu1 %1674 }
 0x6c2   :  { %v1718_v63 = vpop.permute.xlu2 %1717 }
 0x6c3   :  { %v1728_v13 = vmul.f32 %v4568_v35, %v1718_v63  ;;  %v1732_v14 = vmul.f32 %v4596_v39, %v1718_v63 }
 0x6c9   :  { %v4694_v38 = vpop.permute.xlu0 %1678  ;;  %v4696_v47 = vpop.permute.xlu1 %1680 }
 0x6ca   :  { %6235 = vst [vmem:[#allocation9_spill] sm:$0xff] %v4694_v38 }
 0x6cb   :  { %6236 = vst [vmem:[#allocation11_spill] sm:$0xff] %v4696_v47 }
 0x6d1   :  { %v4700_v60 = vpop.permute.xlu0 %1684  ;;  %v4702_v46 = vpop.permute.xlu1 %1686 }
 0x6d2   :  { %6238 = vst [vmem:[#allocation22_spill] sm:$0xff] %v4700_v60 }
 0x6d3   :  { %6239 = vst [vmem:[#allocation23_spill] sm:$0xff] %v4702_v46 }
 0x6d9   :  { %v1714_v61 = vpop.permute.xlu0 %1713  ;;  %v1716_v7 = vpop.permute.xlu1 %1715 }
 0x6da   :  { %v1725_v51 = vmul.f32 %v4547_v27, %v1714_v61  ;;  %v1720_v59 = vsel %vm221_vm1, %v1716_v7, %v1718_v63  ;;  %v1719_v26 = vsel %vm221_vm1, %v1714_v61, %v1716_v7  ;;  %v1729_v16 = vmul.f32 %v4576_v34, %v1714_v61 }
 0x6db   :  { %v1727_v52 = vmul.f32 %v4559_v28, %v1720_v59  ;;  %v1726_v15 = vmul.f32 %v4552_v55, %v1719_v26  ;;  %v1730_v18 = vmul.f32 %v4581_v56, %v1719_v26  ;;  %v1731_v42 = vmul.f32 %v4591_v12, %v1720_v59 }
 0x6dc   :  { %1741 = vrot.lane.b32.xlu0 %v1725_v51, %s3500_s10 }
 0x6dd   :  { %1745 = vrot.lane.b32.xlu2 %v1727_v52, %s3500_s10  ;;  %1743 = vrot.lane.b32.xlu1 %v1726_v15, %s3500_s10 }
 0x6e4   :  { %1747 = vrot.lane.b32.xlu0 %v1728_v13, %s3500_s10 }
 0x6e5   :  { %1751 = vrot.lane.b32.xlu2 %v1730_v18, %s3500_s10  ;;  %1749 = vrot.lane.b32.xlu1 %v1729_v16, %s3500_s10 }
 0x6ec   :  { %1753 = vrot.lane.b32.xlu0 %v1731_v42, %s3500_s10 }
 0x6ed   :  { %1755 = vrot.lane.b32.xlu1 %v1732_v14, %s3500_s10  ;;  %1886 = vrot.lane.b32.xlu2 %v1883_v25, %s3497_s19 }
 0x6f4   :  { %1888 = vrot.lane.b32.xlu0 %v1884_v37, %s3497_s19 }
 0x6f5   :  { %1890 = vrot.lane.b32.xlu1 %v1885_v58, %s3497_s19 }
 0x737   :  { %v1746_v49 = vpop.permute.xlu2 %1745 }
 0x73f   :  { %v1752_v32 = vpop.permute.xlu2 %1751 }
 0x747   :  { %v1887_v9 = vpop.permute.xlu2 %1886 }
 0x748   :  { %v1898_v61 = vmul.f32 %v4547_v27, %v1887_v9  ;;  %v1902_v7 = vmul.f32 %v4576_v34, %v1887_v9 }
 0x74a   :  { %v1922_v63 = vrot.slane %v1898_v61, 1  ;;  %v1923_v51 = vrot.slane %v1902_v7, 1 }
 0x74c   :  { %v1924_v59 = vsel %vm374_vm2, %v1922_v63, %v1923_v51 }
 0x74d   :  { %1942 = vrot.lane.b32.xlu2 %v1924_v59, %s3499_s29 }
 0x74e   :  { %v1742_v26 = vpop.permute.xlu0 %1741 }
 0x74f   :  { %v1744_v52 = vpop.permute.xlu1 %1743 }
 0x750   :  { %v4733_v15 = vsel %vm260_vm5, %v1742_v26, %v1744_v52  ;;  %v4736_v13 = vsel %vm260_vm5, %v1744_v52, %v1746_v49 }
 0x756   :  { %v1748_v16 = vpop.permute.xlu0 %1747 }
 0x757   :  { %v4739_v18 = vsel %vm260_vm5, %v1746_v49, %v1748_v16  ;;  %v1750_v3 = vpop.permute.xlu1 %1749 }
 0x758   :  { %v4742_v42 = vsel %vm260_vm5, %v1750_v3, %v1752_v32 }
 0x75e   :  { %v1754_v25 = vpop.permute.xlu0 %1753 }
 0x75f   :  { %v4745_v14 = vsel %vm260_vm5, %v1752_v32, %v1754_v25  ;;  %v1756_v37 = vpop.permute.xlu1 %1755 }
 0x760   :  { %v4748_v58 = vsel %vm260_vm5, %v1754_v25, %v1756_v37  ;;  %v4760_v25 = vld [vmem:[%s6065_s0 + $0xa0] sm:$0x3] }
 0x761   :  { %v1906_v54 = vmul.f32 %v4760_v25, %v1887_v9 }
 0x766   :  { %v1889_v61 = vpop.permute.xlu0 %1888 }
 0x767   :  { %v1892_v7 = vsel %vm83_vm0, %v1887_v9, %v1889_v61  ;;  %v1891_v59 = vpop.permute.xlu1 %1890 }
 0x768   :  { %v1899_v63 = vmul.f32 %v4552_v55, %v1892_v7  ;;  %v1903_v49 = vmul.f32 %v4581_v56, %v1892_v7  ;;  %v1893_v26 = vsel %vm83_vm0, %v1889_v61, %v1891_v59  ;;  %v1901_v52 = vmul.f32 %v4568_v35, %v1891_v59  ;;  %v4767_v61 = vld [vmem:[%s6065_s0 + $0xb0] sm:$0x3] }
 0x769   :  { %v1905_v16 = vmul.f32 %v4596_v39, %v1891_v59  ;;  %v1900_v41 = vmul.f32 %v4559_v28, %v1893_v26  ;;  %v1904_v37 = vmul.f32 %v4591_v12, %v1893_v26  ;;  %v1908_v36 = vmul.f32 %v4767_v61, %v1893_v26 }
 0x76a   :  { %v1925_v32 = vrot.slane %v1899_v63, 1  ;;  %v1926_v3 = vrot.slane %v1903_v49, 1  ;;  %v1931_v40 = vrot.slane %v1901_v52, 1  ;;  %v4776_v52 = vld [vmem:[%s6065_s0 + $0xa8] sm:$0x3] }
 0x76b   :  { %v1932_v8 = vrot.slane %v1905_v16, 1  ;;  %v1928_v49 = vrot.slane %v1900_v41, 1  ;;  %v1929_v4 = vrot.slane %v1904_v37, 1  ;;  %v1907_v9 = vmul.f32 %v4776_v52, %v1892_v7  ;;  %v4785_v41 = vld [vmem:[%s6065_s0 + $0xb8] sm:$0x3] }
 0x76c   :  { %v1927_v63 = vsel %vm374_vm2, %v1925_v32, %v1926_v3  ;;  %v1934_v32 = vrot.slane %v1906_v54, 1  ;;  %v1909_v37 = vmul.f32 %v4785_v41, %v1891_v59 }
 0x76d   :  { %1944 = vrot.lane.b32.xlu0 %v1927_v63, %s3499_s29  ;;  %v1933_v50 = vsel %vm374_vm2, %v1931_v40, %v1932_v8  ;;  %v1930_v16 = vsel %vm374_vm2, %v1928_v49, %v1929_v4  ;;  %v1938_v40 = vrot.slane %v1908_v36, 1  ;;  %v1936_v26 = vrot.slane %v1907_v9, 1  ;;  %v3416_v36 = vld [vmem:[%s6066_s1 + $0x1d] ss:$8 sm:$0x7] }
 0x76e   :  { %1948 = vrot.lane.b32.xlu2 %v1933_v50, %s3499_s29  ;;  %1946 = vrot.lane.b32.xlu1 %v1930_v16, %s3499_s29  ;;  %v1935_v63 = vsel %vm374_vm2, %v1923_v51, %v1934_v32  ;;  %v1940_v7 = vrot.slane %v1909_v37, 1  ;;  %v1979_v49 = vperm.slane %v3416_v36, 1  ;;  %v1978_v9 = vperm.slane %v3416_v36, 0 }
 0x76f   :  { %v1939_v50 = vsel %vm374_vm2, %v1929_v4, %v1938_v40  ;;  %v1937_v54 = vsel %vm374_vm2, %v1926_v3, %v1936_v26  ;;  %v1980_v4 = vperm.slane %v3416_v36, 2 }
 0x770   :  { %v1941_v59 = vsel %vm374_vm2, %v1932_v8, %v1940_v7 }
 0x775   :  { %1950 = vrot.lane.b32.xlu0 %v1935_v63, %s3499_s29 }
 0x776   :  { %1954 = vrot.lane.b32.xlu2 %v1939_v50, %s3499_s29  ;;  %1952 = vrot.lane.b32.xlu1 %v1937_v54, %s3499_s29 }
 0x77d   :  { %1956 = vrot.lane.b32.xlu0 %v1941_v59, %s3499_s29 }
 0x77e   :  { %1983 = vrot.lane.b32.xlu2 %v1979_v49, %s3497_s19  ;;  %1981 = vrot.lane.b32.xlu1 %v1978_v9, %s3497_s19 }
 0x785   :  { %1985 = vrot.lane.b32.xlu0 %v1980_v4, %s3497_s19 }
 0x7a7   :  { %v1943_v51 = vpop.permute.xlu2 %1942 }
 0x7c8   :  { %v1949_v3 = vpop.permute.xlu2 %1948 }
 0x7d0   :  { %v1955_v63 = vpop.permute.xlu2 %1954 }
 0x7d8   :  { %v1984_v59 = vpop.permute.xlu2 %1983 }
 0x7df   :  { %v1945_v16 = vpop.permute.xlu0 %1944 }
 0x7e0   :  { %v4803_v32 = vsel %vm122_vm4, %v1943_v51, %v1945_v16  ;;  %v1947_v40 = vpop.permute.xlu1 %1946 }
 0x7e1   :  { %6240 = vst [vmem:[#allocation18_spill] sm:$0xff] %v4803_v32  ;;  %v4806_v26 = vsel %vm122_vm4, %v1945_v16, %v1947_v40  ;;  %v4809_v8 = vsel %vm122_vm4, %v1947_v40, %v1949_v3 }
 0x7e2   :  { %6241 = vst [vmem:[#allocation7_spill] sm:$0xff] %v4806_v26 }
 0x7e3   :  { %6242 = vst [vmem:[#allocation36_spill] sm:$0xff] %v4809_v8 }
 0x7e7   :  { %v1951_v37 = vpop.permute.xlu0 %1950 }
 0x7e8   :  { %v1953_v50 = vpop.permute.xlu1 %1952 }
 0x7e9   :  { %v4812_v54 = vsel %vm122_vm4, %v1951_v37, %v1953_v50  ;;  %v4815_v7 = vsel %vm122_vm4, %v1953_v50, %v1955_v63 }
 0x7ea   :  { %6243 = vst [vmem:[#allocation34_spill] sm:$0xff] %v4812_v54 }
 0x7eb   :  { %6244 = vst [vmem:[#allocation17_spill] sm:$0xff] %v4815_v7 }
 0x7ef   :  { %v1957_v36 = vpop.permute.xlu0 %1956 }
 0x7f0   :  { %v4818_v49 = vsel %vm122_vm4, %v1955_v63, %v1957_v36  ;;  %v1982_v9 = vpop.permute.xlu1 %1981 }
 0x7f1   :  { %6245 = vst [vmem:[#allocation12_spill] sm:$0xff] %v4818_v49  ;;  %v1987_v4 = vsel %vm83_vm0, %v1982_v9, %v1984_v59  ;;  %v1993_v51 = vmul.f32 %v4547_v27, %v1982_v9  ;;  %v1997_v3 = vmul.f32 %v4576_v34, %v1982_v9  ;;  %v2001_v11 = vmul.f32 %v4760_v25, %v1982_v9 }
 0x7f2   :  { %v1994_v16 = vmul.f32 %v4552_v55, %v1987_v4  ;;  %v1998_v40 = vmul.f32 %v4581_v56, %v1987_v4 }
 0x7f3   :  { %v2017_v37 = vrot.slane %v1993_v51, 1  ;;  %v2018_v6 = vrot.slane %v1997_v3, 1  ;;  %v2029_v57 = vrot.slane %v2001_v11, 1 }
 0x7f4   :  { %v2020_v50 = vrot.slane %v1994_v16, 1  ;;  %v2021_v2 = vrot.slane %v1998_v40, 1 }
 0x7f5   :  { %v2019_v19 = vsel %vm374_vm2, %v2017_v37, %v2018_v6 }
 0x7f6   :  { %2037 = vrot.lane.b32.xlu1 %v2019_v19, %s3499_s29  ;;  %v2022_v3 = vsel %vm374_vm2, %v2020_v50, %v2021_v2 }
 0x7f7   :  { %v1986_v63 = vpop.permute.xlu0 %1985  ;;  %2039 = vrot.lane.b32.xlu2 %v2022_v3, %s3499_s29  ;;  %v4866_v3 = vld [vmem:[%s6066_s1 + $0x7] ss:$8 sm:$0x7] }
 0x7f8   :  { %v1988_v36 = vsel %vm83_vm0, %v1984_v59, %v1986_v63  ;;  %v1996_v49 = vmul.f32 %v4568_v35, %v1986_v63  ;;  %v2000_v21 = vmul.f32 %v4596_v39, %v1986_v63  ;;  %v2002_v59 = vmul.f32 %v4776_v52, %v1987_v4 }
 0x7f9   :  { %v1995_v23 = vmul.f32 %v4559_v28, %v1988_v36  ;;  %v1999_v51 = vmul.f32 %v4591_v12, %v1988_v36  ;;  %v2003_v9 = vmul.f32 %v4767_v61, %v1988_v36 }
 0x7fa   :  { %v2026_v16 = vrot.slane %v1996_v49, 1  ;;  %v2027_v40 = vrot.slane %v2000_v21, 1  ;;  %v2004_v49 = vmul.f32 %v4785_v41, %v1986_v63  ;;  %v2030_v21 = vsel %vm374_vm2, %v2018_v6, %v2029_v57 }
 0x7fb   :  { %v2023_v37 = vrot.slane %v1995_v23, 1  ;;  %v2024_v19 = vrot.slane %v1999_v51, 1  ;;  %v2031_v50 = vrot.slane %v2002_v59, 1  ;;  %v2033_v23 = vrot.slane %v2003_v9, 1 }
 0x7fc   :  { %v2028_v54 = vsel %vm374_vm2, %v2026_v16, %v2027_v40  ;;  %v2035_v4 = vrot.slane %v2004_v49, 1  ;;  %v2369_v16 = vperm.slane %v4866_v3, 0  ;;  %v3414_v9 = vld [vmem:[%s6066_s1 + $0x1c] ss:$8 sm:$0x7] }
 0x7fd   :  { %v2025_v7 = vsel %vm374_vm2, %v2023_v37, %v2024_v19  ;;  %v2032_v11 = vsel %vm374_vm2, %v2021_v2, %v2031_v50  ;;  %v2034_v51 = vsel %vm374_vm2, %v2024_v19, %v2033_v23  ;;  %v4859_v2 = vld [vmem:[%s6066_s1 + $0x1e] ss:$8 sm:$0x7]  ;;  %v4880_v19 = vld [vmem:[%s6066_s1 + $0x18] ss:$8 sm:$0x7] }
 0x7fe   :  { %2041 = vrot.lane.b32.xlu0 %v2025_v7, %s3499_s29  ;;  %2043 = vrot.lane.b32.xlu1 %v2028_v54, %s3499_s29  ;;  %v3417_v7 = vld [vmem:[%s6066_s1 + $0x5] ss:$8 sm:$0x7]  ;;  %v2036_v54 = vsel %vm374_vm2, %v2027_v40, %v2035_v4  ;;  %v2168_v36 = vperm.slane %v4859_v2, 0  ;;  %v2559_v59 = vperm.slane %v4880_v19, 0 }
 0x7ff   :  { %2045 = vrot.lane.b32.xlu2 %v2030_v21, %s3499_s29  ;;  %v2073_v57 = vperm.slane %v3417_v7, 0  ;;  %v2074_v6 = vperm.slane %v3417_v7, 1  ;;  %v2075_v63 = vperm.slane %v3417_v7, 2  ;;  %v4873_v40 = vld [vmem:[%s6066_s1 + $0x30] ss:$8 sm:$0x7] }
 0x800   :  { %v2464_v37 = vperm.slane %v4873_v40, 0  ;;  %v3408_v49 = vld [vmem:[%s6066_s1 + $0x19] ss:$8 sm:$0x7]  ;;  %v1830_v21 = vperm.slane %v3414_v9, 0 }
 0x801   :  { %v1489_v50 = vperm.slane %v3408_v49, 0  ;;  %v4893_v23 = vld [vmem:[%s6066_s1 + $0x31] ss:$8 sm:$0x7] }
 0x802   :  { %v2654_v4 = vperm.slane %v4893_v23, 0  ;;  %v1842_v38 = vmul.f32 %v4760_v25, %v1830_v21 }
 0x803   :  { %v1495_v7 = vmul.f32 %v4547_v27, %v1489_v50 }
 0x806   :  { %2047 = vrot.lane.b32.xlu0 %v2032_v11, %s3499_s29  ;;  %2049 = vrot.lane.b32.xlu1 %v2034_v51, %s3499_s29  ;;  %v1836_v11 = vmul.f32 %v4547_v27, %v1830_v21  ;;  %v4898_v51 = vmul.f32 %v4576_v34, %v1830_v21 }
 0x807   :  { %2051 = vrot.lane.b32.xlu2 %v2036_v54, %s3499_s29  ;;  %v1623_v54 = vsel %vm122_vm4, %v4648_v44, %v4652_v17  ;;  %v1624_v44 = vsel %vm122_vm4, %v4652_v17, %v4654_v43 }
 0x80e   :  { %2076 = vrot.lane.b32.xlu0 %v2073_v57, %s3498_s22  ;;  %2078 = vrot.lane.b32.xlu1 %v2074_v6, %s3498_s22  ;;  %v1831_v57 = vperm.slane %v3414_v9, 1  ;;  %v1490_v6 = vperm.slane %v3408_v49, 1 }
 0x80f   :  { %2080 = vrot.lane.b32.xlu2 %v2075_v63, %s3498_s22  ;;  %v1854_v63 = vrot.slane %v1836_v11, 1 }
 0x810   :  { %v1837_v46 = vmul.f32 %v4552_v55, %v1831_v57  ;;  %v1840_v31 = vmul.f32 %v4581_v56, %v1831_v57 }
 0x812   :  { %v1858_v60 = vrot.slane %v1840_v31, 1 }
 0x817   :  { %2171 = vrot.lane.b32.xlu2 %v2168_v36, %s3498_s22  ;;  %v1855_v36 = vrot.slane %v4898_v51, 1 }
 0x819   :  { %v1856_v11 = vsel %vm374_vm2, %v1854_v63, %v1855_v36 }
 0x81f   :  { %2372 = vrot.lane.b32.xlu2 %v2369_v16, %s3497_s19  ;;  %v1832_v16 = vperm.slane %v3414_v9, 2 }
 0x821   :  { %v1838_v51 = vmul.f32 %v4559_v28, %v1832_v16  ;;  %v1841_v9 = vmul.f32 %v4591_v12, %v1832_v16 }
 0x823   :  { %v1860_v17 = vrot.slane %v1838_v51, 1  ;;  %v1861_v30 = vrot.slane %v1841_v9, 1 }
 0x827   :  { %2467 = vrot.lane.b32.xlu2 %v2464_v37, %s3497_s19  ;;  %v1635_v37 = vadd.f32 %v1623_v54, %v1495_v7  ;;  %v1625_v7 = vsel %vm122_vm4, %v4654_v43, %v4650_v22  ;;  %v1857_v54 = vrot.slane %v1837_v46, 1  ;;  %v1498_v22 = vmul.f32 %v4576_v34, %v1489_v50 }
 0x828   :  { %v1626_v43 = vsel %vm122_vm4, %v4658_v33, %v4660_v0  ;;  %v1862_v46 = vsel %vm374_vm2, %v1860_v17, %v1861_v30  ;;  %v1628_v33 = vsel %vm122_vm4, %v4656_v1, %v4662_v10 }
 0x829   :  { %v1769_v29 = vadd.f32 %v4733_v15, %v1635_v37  ;;  %v1859_v32 = vsel %vm374_vm2, %v1857_v54, %v1858_v60 }
 0x82b   :  { %v1875_v15 = vadd.f32 %v1856_v11, %v1769_v29  ;;  %v1863_v11 = vrot.slane %v1842_v38, 1 }
 0x82f   :  { %2562 = vrot.lane.b32.xlu2 %v2559_v59, %s3498_s22  ;;  %v1491_v59 = vperm.slane %v3408_v49, 2 }
 0x831   :  { %v1497_v49 = vmul.f32 %v4559_v28, %v1491_v59 }
 0x833   :  { %v1637_v63 = vadd.f32 %v1625_v7, %v1497_v49 }
 0x835   :  { %v1771_v31 = vadd.f32 %v4739_v18, %v1637_v63  ;;  %v1627_v18 = vsel %vm122_vm4, %v4660_v0, %v4656_v1  ;;  %v1864_v1 = vsel %vm374_vm2, %v1855_v36, %v1863_v11 }
 0x837   :  { %2657 = vrot.lane.b32.xlu2 %v2654_v4, %s3498_s22  ;;  %v1496_v4 = vmul.f32 %v4552_v55, %v1490_v6 }
 0x839   :  { %v1636_v47 = vadd.f32 %v1624_v44, %v1496_v4  ;;  %v1844_v4 = vmul.f32 %v4767_v61, %v1832_v16  ;;  %v1638_v16 = vadd.f32 %v1626_v43, %v1498_v22 }
 0x83b   :  { %v1770_v24 = vadd.f32 %v4736_v13, %v1636_v47  ;;  %v1499_v47 = vmul.f32 %v4581_v56, %v1490_v6  ;;  %v1500_v13 = vmul.f32 %v4591_v12, %v1491_v59  ;;  %v1772_v0 = vadd.f32 %v4742_v42, %v1638_v16 }
 0x83d   :  { %v1876_v21 = vadd.f32 %v1859_v32, %v1770_v24  ;;  %v1867_v24 = vrot.slane %v1844_v4, 1  ;;  %v1639_v9 = vadd.f32 %v1627_v18, %v1499_v47  ;;  %v1640_v49 = vadd.f32 %v1628_v33, %v1500_v13 }
 0x83f   :  { %v1773_v10 = vadd.f32 %v4745_v14, %v1639_v9  ;;  %v1774_v38 = vadd.f32 %v4748_v58, %v1640_v49 }
 0x851   :  { %v2040_v8 = vpop.permute.xlu2 %2039 }
 0x859   :  { %v2046_v29 = vpop.permute.xlu2 %2045 }
 0x861   :  { %v2052_v17 = vpop.permute.xlu2 %2051 }
 0x868   :  { %v2038_v37 = vpop.permute.xlu1 %2037 }
 0x869   :  { %v2053_v5 = vsel %vm122_vm4, %v2038_v37, %v2040_v8 }
 0x86a   :  { %v4922_v26 = vadd.f32 %v2053_v5, %v1875_v15  ;;  %v1843_v5 = vmul.f32 %v4776_v52, %v1831_v57  ;;  %v1877_v57 = vadd.f32 %v1862_v46, %v1771_v31  ;;  %v1878_v15 = vadd.f32 %v1864_v1, %v1772_v0 }
 0x86b   :  { %v2169_v0 = vperm.slane %v4859_v2, 1  ;;  %v2170_v1 = vperm.slane %v4859_v2, 2  ;;  %v2466_v2 = vperm.slane %v4873_v40, 2 }
 0x86c   :  { %v1865_v32 = vrot.slane %v1843_v5, 1  ;;  %v2081_v5 = vpop.permute.xlu2 %2080 }
 0x86e   :  { %v1866_v54 = vsel %vm374_vm2, %v1858_v60, %v1865_v32 }
 0x86f   :  { %v1879_v42 = vadd.f32 %v1866_v54, %v1773_v10  ;;  %v2371_v54 = vperm.slane %v4866_v3, 2 }
 0x870   :  { %v2042_v44 = vpop.permute.xlu0 %2041  ;;  %v2044_v6 = vpop.permute.xlu1 %2043 }
 0x871   :  { %v2054_v50 = vsel %vm122_vm4, %v2040_v8, %v2042_v44  ;;  %v2055_v59 = vsel %vm122_vm4, %v2042_v44, %v2044_v6  ;;  %v1868_v8 = vsel %vm374_vm2, %v1861_v30, %v1867_v24 }
 0x872   :  { %v4943_v51 = vadd.f32 %v2054_v50, %v1876_v21  ;;  %v4947_v7 = vadd.f32 %v2055_v59, %v1877_v57  ;;  %v1880_v22 = vadd.f32 %v1868_v8, %v1774_v38  ;;  %v2370_v8 = vperm.slane %v4866_v3, 1 }
 0x873   :  { %v2655_v3 = vperm.slane %v4893_v23, 1 }
 0x878   :  { %v2048_v37 = vpop.permute.xlu0 %2047  ;;  %v2050_v31 = vpop.permute.xlu1 %2049 }
 0x879   :  { %v2056_v63 = vsel %vm122_vm4, %v2046_v29, %v2048_v37  ;;  %v2058_v36 = vsel %vm122_vm4, %v2050_v31, %v2052_v17  ;;  %v2057_v14 = vsel %vm122_vm4, %v2048_v37, %v2050_v31  ;;  %v2560_v37 = vperm.slane %v4880_v19, 1 }
 0x87a   :  { %v4955_v43 = vadd.f32 %v2056_v63, %v1878_v15  ;;  %v4959_v46 = vadd.f32 %v2058_v36, %v1880_v22  ;;  %v4961_v58 = vadd.f32 %v2057_v14, %v1879_v42  ;;  %v2465_v15 = vperm.slane %v4873_v40, 1 }
 0x87b   :  { %v2561_v17 = vperm.slane %v4880_v19, 2  ;;  %v2091_v63 = vmul.f32 %v4568_v35, %v2081_v5  ;;  %v2095_v22 = vmul.f32 %v4596_v39, %v2081_v5  ;;  %v2656_v40 = vperm.slane %v4893_v23, 2 }
 0x87d   :  { %v2121_v31 = vrot.slane %v2091_v63, 1  ;;  %v2122_v42 = vrot.slane %v2095_v22, 1  ;;  %v6246_v63 = vld [vmem:[#allocation9_spill] sm:$0xff] }
 0x87e   :  { %v1691_v22 = vsel %vm260_vm5, %v4688_v62, %v6246_v63 }
 0x87f   :  { %v2123_v19 = vsel %vm374_vm2, %v2121_v31, %v2122_v42 }
 0x880   :  { %v2077_v30 = vpop.permute.xlu0 %2076  ;;  %v2079_v29 = vpop.permute.xlu1 %2078 }
 0x881   :  { %v2088_v60 = vmul.f32 %v4547_v27, %v2077_v30  ;;  %v2092_v4 = vmul.f32 %v4576_v34, %v2077_v30  ;;  %v2082_v47 = vsel %vm221_vm1, %v2077_v30, %v2079_v29  ;;  %v2083_v33 = vsel %vm221_vm1, %v2079_v29, %v2081_v5 }
 0x882   :  { %v2089_v44 = vmul.f32 %v4552_v55, %v2082_v47  ;;  %v2093_v18 = vmul.f32 %v4581_v56, %v2082_v47  ;;  %v2090_v50 = vmul.f32 %v4559_v28, %v2083_v33  ;;  %v2094_v11 = vmul.f32 %v4591_v12, %v2083_v33 }
 0x883   :  { %v2112_v13 = vrot.slane %v2088_v60, 1  ;;  %v2113_v21 = vrot.slane %v2092_v4, 1  ;;  %v2097_v9 = vmul.f32 %v4776_v52, %v2082_v47  ;;  %v2096_v36 = vmul.f32 %v4760_v25, %v2077_v30 }
 0x884   :  { %v2115_v57 = vrot.slane %v2089_v44, 1  ;;  %v2116_v6 = vrot.slane %v2093_v18, 1  ;;  %v2118_v59 = vrot.slane %v2090_v50, 1  ;;  %v2119_v24 = vrot.slane %v2094_v11, 1  ;;  %v2172_v44 = vpop.permute.xlu2 %2171 }
 0x885   :  { %v2114_v16 = vsel %vm374_vm2, %v2112_v13, %v2113_v21  ;;  %v2126_v10 = vrot.slane %v2097_v9, 1  ;;  %v2124_v14 = vrot.slane %v2096_v36, 1  ;;  %v2098_v60 = vmul.f32 %v4767_v61, %v2083_v33 }
 0x886   :  { %2132 = vrot.lane.b32.xlu0 %v2114_v16, %s3500_s10  ;;  %v2117_v32 = vsel %vm374_vm2, %v2115_v57, %v2116_v6  ;;  %v2120_v49 = vsel %vm374_vm2, %v2118_v59, %v2119_v24  ;;  %v2099_v4 = vmul.f32 %v4785_v41, %v2081_v5  ;;  %v2183_v5 = vmul.f32 %v4547_v27, %v2172_v44  ;;  %v5029_v57 = vld [vmem:[%s6066_s1 + $0x3] ss:$8 sm:$0x7]  ;;  %v5036_v59 = vld [vmem:[%s6066_s1] ss:$8 sm:$0x7] }
 0x887   :  { %2134 = vrot.lane.b32.xlu1 %v2117_v32, %s3500_s10  ;;  %2136 = vrot.lane.b32.xlu2 %v2120_v49, %s3500_s10  ;;  %v2127_v38 = vsel %vm374_vm2, %v2116_v6, %v2126_v10  ;;  %v2125_v29 = vsel %vm374_vm2, %v2113_v21, %v2124_v14  ;;  %v2128_v23 = vrot.slane %v2098_v60, 1  ;;  %v5017_v33 = vmul.f32 %v4576_v34, %v2172_v44 }
 0x888   :  { %v2130_v47 = vrot.slane %v2099_v4, 1  ;;  %v2207_v21 = vrot.slane %v2183_v5, 1  ;;  %v5042_v32 = vperm.slane %v5029_v57, 1  ;;  %v1469_v9 = vperm.slane %v5036_v59, 0 }
 0x889   :  { %v2129_v13 = vsel %vm374_vm2, %v2119_v24, %v2128_v23  ;;  %v2208_v50 = vrot.slane %v5017_v33, 1  ;;  %v5039_v24 = vperm.slane %v5029_v57, 0  ;;  %v6115_v49 = vperm.slane %v5036_v59, 1  ;;  %v6248_v23 = vld [vmem:[#allocation7_spill] sm:$0xff] }
 0x88a   :  { %v2131_v30 = vsel %vm374_vm2, %v2122_v42, %v2130_v47  ;;  %v1784_v10 = vmul.f32 %v4552_v55, %v5042_v32 }
 0x88b   :  { %v2209_v16 = vsel %vm374_vm2, %v2207_v21, %v2208_v50 }
 0x88c   :  { %v5013_v18 = vpop.permute.xlu2 %2372 }
 0x88e   :  { %2173 = vrot.lane.b32.xlu0 %v2169_v0, %s3498_s22  ;;  %v1783_v0 = vmul.f32 %v4547_v27, %v5039_v24 }
 0x88f   :  { %2175 = vrot.lane.b32.xlu1 %v2170_v1, %s3498_s22  ;;  %2142 = vrot.lane.b32.xlu2 %v2127_v38, %s3500_s10  ;;  %v5050_v1 = vmul.f32 %v4576_v34, %v5039_v24  ;;  %v5056_v38 = vmul.f32 %v4581_v56, %v5042_v32 }
 0x894   :  { %v5020_v11 = vpop.permute.xlu2 %2467 }
 0x896   :  { %2374 = vrot.lane.b32.xlu0 %v2370_v8, %s3497_s19  ;;  %v1475_v8 = vmul.f32 %v4547_v27, %v1469_v9  ;;  %v1690_v27 = vsel %vm260_vm5, %v4690_v48, %v4688_v62 }
 0x897   :  { %2376 = vrot.lane.b32.xlu1 %v2371_v54, %s3497_s19  ;;  %2227 = vrot.lane.b32.xlu2 %v2209_v16, %s3500_s10  ;;  %v1476_v54 = vmul.f32 %v4552_v55, %v6115_v49 }
 0x89c   :  { %v5031_v6 = vpop.permute.xlu2 %2562 }
 0x89e   :  { %2469 = vrot.lane.b32.xlu0 %v2465_v15, %s3497_s19  ;;  %v1556_v15 = vsel %vm122_vm4, %v4614_v20, %v4616_v45  ;;  %v6111_v20 = vrot.slane %v5056_v38, 1 }
 0x89f   :  { %2471 = vrot.lane.b32.xlu1 %v2466_v2, %s3497_s19  ;;  %v1557_v2 = vsel %vm122_vm4, %v4616_v45, %v4608_v53  ;;  %v1568_v31 = vadd.f32 %v1556_v15, %v1475_v8 }
 0x8a0   :  { %v1569_v42 = vadd.f32 %v1557_v2, %v1476_v54 }
 0x8a1   :  { %v1702_v36 = vadd.f32 %v1690_v27, %v1568_v31 }
 0x8a2   :  { %v1703_v45 = vadd.f32 %v1691_v22, %v1569_v42 }
 0x8a6   :  { %2564 = vrot.lane.b32.xlu0 %v2560_v37, %s3498_s22  ;;  %v1801_v37 = vrot.slane %v1783_v0, 1 }
 0x8a7   :  { %2566 = vrot.lane.b32.xlu1 %v2561_v17, %s3498_s22  ;;  %v6114_v17 = vrot.slane %v5050_v1, 1 }
 0x8ae   :  { %2659 = vrot.lane.b32.xlu0 %v2655_v3, %s3498_s22  ;;  %v5071_v3 = vpop.permute.xlu2 %2657 }
 0x8af   :  { %2661 = vrot.lane.b32.xlu1 %v2656_v40, %s3498_s22  ;;  %v1804_v40 = vrot.slane %v1784_v10, 1 }
 0x8b1   :  { %v1806_v14 = vsel %vm374_vm2, %v1804_v40, %v6111_v20  ;;  %v6254_v20 = vld [vmem:[#allocation11_spill] sm:$0xff] }
 0x8b2   :  { %v1823_v4 = vadd.f32 %v1806_v14, %v1703_v45  ;;  %v2191_v45 = vmul.f32 %v4760_v25, %v2172_v44 }
 0x8b4   :  { %v1971_v47 = vadd.f32 %v6248_v23, %v1823_v4 }
 0x8b6   :  { %2138 = vrot.lane.b32.xlu0 %v2123_v19, %s3500_s10  ;;  %v1803_v19 = vsel %vm374_vm2, %v1801_v37, %v6114_v17  ;;  %v6256_v17 = vld [vmem:[#allocation20_spill] sm:$0xff] }
 0x8b7   :  { %2140 = vrot.lane.b32.xlu1 %v2125_v29, %s3500_s10  ;;  %v1822_v60 = vadd.f32 %v1803_v19, %v1702_v36  ;;  %v6247_v29 = vld [vmem:[#allocation18_spill] sm:$0xff] }
 0x8b9   :  { %v1970_v62 = vadd.f32 %v6247_v29, %v1822_v60 }
 0x8be   :  { %2144 = vrot.lane.b32.xlu0 %v2129_v13, %s3500_s10 }
 0x8bf   :  { %2146 = vrot.lane.b32.xlu1 %v2131_v30, %s3500_s10 }
 0x8e1   :  { %v5088_v13 = vpop.permute.xlu2 %2136 }
 0x8f8   :  { %v2133_v48 = vpop.permute.xlu0 %2132 }
 0x8f9   :  { %v2135_v30 = vpop.permute.xlu1 %2134 }
 0x8fa   :  { %v2148_v5 = vsel %vm260_vm5, %v2133_v48, %v2135_v30  ;;  %v2149_v21 = vsel %vm260_vm5, %v2135_v30, %v5088_v13 }
 0x8fb   :  { %v5093_v16 = vadd.f32 %v2148_v5, %v1970_v62  ;;  %v5095_v0 = vadd.f32 %v2149_v21, %v1971_v47  ;;  %v5125_v21 = vld [vmem:[%s6065_s0 + $0x60] sm:$0xff] }
 0x8fd   :  { %6249 = vst [vmem:[#allocation19_spill] sm:$0xff] %v5093_v16 }
 0x8fe   :  { %6250 = vst [vmem:[#allocation13_spill] sm:$0xff] %v5095_v0 }
 0x900   :  { %v2174_v10 = vpop.permute.xlu0 %2173 }
 0x901   :  { %v2177_v8 = vsel %vm221_vm1, %v2172_v44, %v2174_v10  ;;  %v2176_v2 = vpop.permute.xlu1 %2175 }
 0x902   :  { %v2184_v54 = vmul.f32 %v4552_v55, %v2177_v8  ;;  %v2188_v15 = vmul.f32 %v4581_v56, %v2177_v8  ;;  %v2178_v22 = vsel %vm221_vm1, %v2174_v10, %v2176_v2  ;;  %v2186_v31 = vmul.f32 %v4568_v35, %v2176_v2 }
 0x903   :  { %v2185_v40 = vmul.f32 %v4559_v28, %v2178_v22  ;;  %v2189_v42 = vmul.f32 %v4591_v12, %v2178_v22  ;;  %v2190_v36 = vmul.f32 %v4596_v39, %v2176_v2  ;;  %v2192_v29 = vmul.f32 %v4776_v52, %v2177_v8 }
 0x904   :  { %v2210_v37 = vrot.slane %v2184_v54, 1  ;;  %v2211_v27 = vrot.slane %v2188_v15, 1  ;;  %v2216_v55 = vrot.slane %v2186_v31, 1  ;;  %v2193_v28 = vmul.f32 %v4767_v61, %v2178_v22  ;;  %v5136_v54 = vld [vmem:[%s6065_s0 + $0x68] sm:$0xff] }
 0x905   :  { %v2217_v14 = vrot.slane %v2190_v36, 1  ;;  %v2213_v48 = vrot.slane %v2185_v40, 1  ;;  %v2214_v60 = vrot.slane %v2189_v42, 1  ;;  %v2219_v39 = vrot.slane %v2191_v45, 1  ;;  %v5158_v45 = vld [vmem:[%s6065_s0 + $0x70] sm:$0xff] }
 0x906   :  { %v2212_v19 = vsel %vm374_vm2, %v2210_v37, %v2211_v27  ;;  %v2221_v23 = vrot.slane %v2192_v29, 1  ;;  %v2223_v47 = vrot.slane %v2193_v28, 1  ;;  %v2194_v30 = vmul.f32 %v4785_v41, %v2176_v2  ;;  %v5183_v28 = vld [vmem:[%s6065_s0 + $0x98] sm:$0xff] }
 0x907   :  { %2229 = vrot.lane.b32.xlu0 %v2212_v19, %s3500_s10  ;;  %v2218_v35 = vsel %vm374_vm2, %v2216_v55, %v2217_v14  ;;  %v2215_v12 = vsel %vm374_vm2, %v2213_v48, %v2214_v60  ;;  %v2220_v5 = vsel %vm374_vm2, %v2208_v50, %v2219_v39  ;;  %v2384_v10 = vmul.f32 %v5125_v21, %v5013_v18  ;;  %v5164_v19 = vld [vmem:[%s6065_s0 + $0x90] sm:$0xff] }
 0x908   :  { %v2375_v4 = vpop.permute.xlu0 %2374  ;;  %2233 = vrot.lane.b32.xlu2 %v2218_v35, %s3500_s10  ;;  %2231 = vrot.lane.b32.xlu1 %v2215_v12, %s3500_s10  ;;  %v5131_v8 = vmul.f32 %v4576_v34, %v5013_v18  ;;  %v2224_v34 = vsel %vm374_vm2, %v2214_v60, %v2223_v47  ;;  %v2222_v37 = vsel %vm374_vm2, %v2211_v27, %v2221_v23  ;;  %v2225_v22 = vrot.slane %v2194_v30, 1 }
 0x909   :  { %v5114_v44 = vpop.permute.xlu1 %2376  ;;  %v2378_v62 = vsel %vm83_vm0, %v5013_v18, %v2375_v4  ;;  %v2408_v40 = vrot.slane %v2384_v10, 2  ;;  %v5170_v48 = vperm.slane %v5029_v57, 2  ;;  %v6110_v12 = vperm.slane %v5036_v59, 2 }
 0x90a   :  { %v2385_v33 = vmul.f32 %v5136_v54, %v2378_v62  ;;  %v5140_v50 = vmul.f32 %v4581_v56, %v2378_v62  ;;  %v2379_v2 = vsel %vm83_vm0, %v2375_v4, %v5114_v44  ;;  %v2409_v56 = vrot.slane %v5131_v8, 2  ;;  %v5176_v4 = vld [vmem:[%s6065_s0 + $0x78] sm:$0xff] }
 0x90b   :  { %v2386_v27 = vmul.f32 %v5158_v45, %v2379_v2  ;;  %v5167_v55 = vmul.f32 %v5164_v19, %v2379_v2  ;;  %v2226_v60 = vsel %vm374_vm2, %v2217_v14, %v2225_v22  ;;  %v2387_v29 = vmul.f32 %v5176_v4, %v5114_v44 }
 0x90c   :  { %v2411_v31 = vrot.slane %v2385_v33, 2  ;;  %v6112_v42 = vrot.slane %v5140_v50, 2  ;;  %v5187_v35 = vmul.f32 %v5183_v28, %v5114_v44  ;;  %v2410_v14 = vsel %vm867_vm3, %v2408_v40, %v2409_v56 }
 0x90d   :  { %v2414_v23 = vrot.slane %v2386_v27, 2  ;;  %v6113_v47 = vrot.slane %v5167_v55, 2  ;;  %v2392_v30 = vmul.f32 %v4760_v25, %v5013_v18  ;;  %v5206_v10 = vmul.f32 %v5164_v19, %v5170_v48 }
 0x90e   :  { %v2413_v57 = vsel %vm867_vm3, %v2411_v31, %v6112_v42  ;;  %v2417_v8 = vrot.slane %v2387_v29, 2  ;;  %v2418_v33 = vrot.slane %v5187_v35, 2  ;;  %v1477_v18 = vmul.f32 %v5158_v45, %v6110_v12  ;;  %v6251_v31 = vld [vmem:[#allocation8_spill] sm:$0xff]  ;;  %v6253_v29 = vld [vmem:[#allocation10_spill] sm:$0xff] }
 0x90f   :  { %2235 = vrot.lane.b32.xlu0 %v2220_v5, %s3500_s10  ;;  %v1785_v5 = vmul.f32 %v5158_v45, %v5170_v48  ;;  %v2416_v40 = vsel %vm867_vm3, %v2414_v23, %v6113_v47  ;;  %v1558_v27 = vsel %vm122_vm4, %v4608_v53, %v6251_v31  ;;  %v2393_v12 = vmul.f32 %v4776_v52, %v2378_v62 }
 0x910   :  { %v5143_v15 = vpop.permute.xlu0 %2469  ;;  %2239 = vrot.lane.b32.xlu2 %v2224_v34, %s3500_s10  ;;  %2237 = vrot.lane.b32.xlu1 %v2222_v37, %s3500_s10  ;;  %v5217_v37 = vld [vmem:[%s6065_s0 + $0x80] sm:$0xff]  ;;  %v6116_v23 = vrot.slane %v5206_v10, 1  ;;  %v2419_v53 = vsel %vm867_vm3, %v2417_v8, %v2418_v33  ;;  %v1570_v31 = vadd.f32 %v1558_v27, %v1477_v18  ;;  %v1790_v62 = vmul.f32 %v4776_v52, %v5042_v32  ;;  %v5254_v8 = vld [vmem:[%s6065_s0 + $0x88] sm:$0xff] }
 0x911   :  { %v5153_v36 = vpop.permute.xlu1 %2471  ;;  %v1478_v22 = vmul.f32 %v5217_v37, %v1469_v9  ;;  %v1692_v9 = vsel %vm260_vm5, %v6246_v63, %v6254_v20  ;;  %v1807_v42 = vrot.slane %v1785_v5, 1  ;;  %v2394_v63 = vmul.f32 %v4767_v61, %v2379_v2  ;;  %v6258_v2 = vld [vmem:[#allocation6_spill] sm:$0xff] }
 0x912   :  { %v2395_v20 = vmul.f32 %v4785_v41, %v5114_v44  ;;  %v1704_v32 = vadd.f32 %v1692_v9, %v1570_v31 }
 0x914   :  { %v2426_v9 = vrot.slane %v2395_v20, 2 }
 0x917   :  { %2241 = vrot.lane.b32.xlu0 %v2226_v60, %s3500_s10  ;;  %v6252_v60 = vld [vmem:[#allocation5_spill] sm:$0xff] }
 0x918   :  { %v5195_v39 = vpop.permute.xlu0 %2564  ;;  %2430 = vrot.lane.b32.xlu2 %v2413_v57, %s3499_s29  ;;  %2428 = vrot.lane.b32.xlu1 %v2410_v14, %s3499_s29  ;;  %v1559_v35 = vsel %vm122_vm4, %v6253_v29, %v6252_v60  ;;  %v1789_v57 = vmul.f32 %v4760_v25, %v5039_v24  ;;  %v2420_v14 = vrot.slane %v2392_v30, 2  ;;  %v6255_v29 = vld [vmem:[#allocation22_spill] sm:$0xff]  ;;  %v1560_v44 = vsel %vm122_vm4, %v6252_v60, %v6258_v2 }
 0x919   :  { %v5209_v34 = vpop.permute.xlu1 %2566  ;;  %v1571_v47 = vadd.f32 %v1559_v35, %v1478_v22  ;;  %v1693_v24 = vsel %vm260_vm5, %v6256_v17, %v6255_v29  ;;  %v6257_v17 = vperm.slane %v5036_v59, 1  ;;  %v2422_v22 = vrot.slane %v2393_v12, 2 }
 0x91a   :  { %v1810_v49 = vrot.slane %v1789_v57, 1  ;;  %v2421_v5 = vsel %vm867_vm3, %v2409_v56, %v2420_v14  ;;  %v2479_v35 = vmul.f32 %v5125_v21, %v5020_v11  ;;  %v5273_v12 = vmul.f32 %v5217_v37, %v5020_v11 }
 0x91b   :  { %v1479_v18 = vmul.f32 %v5254_v8, %v6257_v17  ;;  %v1705_v56 = vadd.f32 %v1693_v24, %v1571_v47  ;;  %v2473_v57 = vsel %vm83_vm0, %v5020_v11, %v5143_v15  ;;  %v2474_v47 = vsel %vm83_vm0, %v5143_v15, %v5153_v36  ;;  %v6260_v24 = vld [vmem:[#allocation23_spill] sm:$0xff] }
 0x91c   :  { %v6259_v60 = vrot.slane %v5050_v1, 1  ;;  %v1812_v14 = vrot.slane %v1790_v62, 1  ;;  %v2480_v16 = vmul.f32 %v5136_v54, %v2473_v57  ;;  %v2484_v15 = vmul.f32 %v5254_v8, %v2473_v57  ;;  %v6262_v62 = vld [vmem:[#allocation36_spill] sm:$0xff] }
 0x91d   :  { %v1572_v31 = vadd.f32 %v1560_v44, %v1479_v18  ;;  %v2481_v1 = vmul.f32 %v5158_v45, %v2474_v47  ;;  %v2504_v18 = vrot.slane %v5273_v12, 2 }
 0x91e   :  { %v2506_v12 = vrot.slane %v2480_v16, 2 }
 0x91f   :  { %2432 = vrot.lane.b32.xlu0 %v2416_v40, %s3499_s29  ;;  %v1809_v40 = vsel %vm374_vm2, %v1807_v42, %v6116_v23  ;;  %v1811_v42 = vsel %vm374_vm2, %v6259_v60, %v1810_v49  ;;  %v6261_v23 = vrot.slane %v5140_v50, 2  ;;  %v5294_v49 = vmul.f32 %v5164_v19, %v2474_v47 }
 0x920   :  { %v5245_v30 = vpop.permute.xlu0 %2659  ;;  %2436 = vrot.lane.b32.xlu2 %v2421_v5, %s3499_s29  ;;  %2434 = vrot.lane.b32.xlu1 %v2419_v53, %s3499_s29  ;;  %v2424_v53 = vrot.slane %v2394_v63, 2  ;;  %v1694_v5 = vsel %vm260_vm5, %v6255_v29, %v6260_v24  ;;  %v1824_v17 = vadd.f32 %v1809_v40, %v1704_v32  ;;  %v1825_v20 = vadd.f32 %v1811_v42, %v1705_v56 }
 0x921   :  { %v5267_v27 = vpop.permute.xlu1 %2661  ;;  %v2423_v0 = vsel %vm867_vm3, %v6261_v23, %v2422_v22  ;;  %v2503_v29 = vrot.slane %v2479_v35, 2  ;;  %v6263_v23 = vrot.slane %v5056_v38, 1  ;;  %v2427_v22 = vsel %vm867_vm3, %v2418_v33, %v2426_v9  ;;  %v2143_v38 = vpop.permute.xlu2 %2142 }
 0x922   :  { %v1972_v63 = vadd.f32 %v6262_v62, %v1824_v17  ;;  %v6264_v40 = vrot.slane %v5167_v55, 2  ;;  %v1706_v60 = vadd.f32 %v1694_v5, %v1572_v31  ;;  %v6265_v17 = vld [vmem:[#allocation34_spill] sm:$0xff]  ;;  %v2507_v42 = vrot.slane %v2484_v15, 2 }
 0x923   :  { %v1813_v32 = vsel %vm374_vm2, %v6263_v23, %v1812_v14  ;;  %v1973_v56 = vadd.f32 %v6265_v17, %v1825_v20  ;;  %v2509_v14 = vrot.slane %v2481_v1, 2  ;;  %v2482_v55 = vmul.f32 %v5176_v4, %v5153_v36  ;;  %v6266_v1 = vld [vmem:[#allocation17_spill] sm:$0xff] }
 0x924   :  { %v2486_v9 = vmul.f32 %v5183_v28, %v5153_v36  ;;  %v2505_v31 = vsel %vm867_vm3, %v2503_v29, %v2504_v18  ;;  %v1826_v62 = vadd.f32 %v1813_v32, %v1706_v60  ;;  %v2508_v15 = vsel %vm867_vm3, %v2506_v12, %v2507_v42 }
 0x925   :  { %v2487_v23 = vmul.f32 %v4760_v25, %v5020_v11  ;;  %v2488_v29 = vmul.f32 %v4776_v52, %v2473_v57  ;;  %v2489_v60 = vmul.f32 %v4767_v61, %v2474_v47  ;;  %v2574_v11 = vmul.f32 %v5125_v21, %v5031_v6 }
 0x926   :  { %v2513_v20 = vrot.slane %v2486_v9, 2  ;;  %v2578_v57 = vmul.f32 %v5217_v37, %v5031_v6  ;;  %v2490_v17 = vmul.f32 %v4785_v41, %v5153_v36 }
 0x927   :  { %2438 = vrot.lane.b32.xlu0 %v2423_v0, %s3499_s29  ;;  %v2425_v0 = vsel %vm867_vm3, %v6264_v40, %v2424_v53  ;;  %v2515_v40 = vrot.slane %v2487_v23, 2  ;;  %v2519_v47 = vrot.slane %v2489_v60, 2 }
 0x928   :  { %v2139_v50 = vpop.permute.xlu0 %2138  ;;  %2442 = vrot.lane.b32.xlu2 %v2427_v22, %s3499_s29  ;;  %2440 = vrot.lane.b32.xlu1 %v2425_v0, %s3499_s29  ;;  %v2517_v0 = vrot.slane %v2488_v29, 2 }
 0x929   :  { %v2150_v44 = vsel %vm260_vm5, %v5088_v13, %v2139_v50  ;;  %v2141_v33 = vpop.permute.xlu1 %2140  ;;  %v2510_v13 = vrot.slane %v5294_v49, 2  ;;  %v1974_v49 = vadd.f32 %v6266_v1, %v1826_v62  ;;  %v2516_v12 = vsel %vm867_vm3, %v2504_v18, %v2515_v40 }
 0x92a   :  { %v5310_v35 = vadd.f32 %v2150_v44, %v1972_v63  ;;  %v2151_v53 = vsel %vm260_vm5, %v2141_v33, %v2143_v38  ;;  %v2512_v63 = vrot.slane %v2482_v55, 2  ;;  %v2598_v33 = vrot.slane %v2574_v11, 2 }
 0x92b   :  { %v5320_v5 = vadd.f32 %v2151_v53, %v1973_v56  ;;  %v2511_v16 = vsel %vm867_vm3, %v2509_v14, %v2510_v13  ;;  %v2568_v56 = vsel %vm221_vm1, %v5031_v6, %v5195_v39  ;;  %v2599_v14 = vrot.slane %v2578_v57, 2 }
 0x92c   :  { %v2514_v44 = vsel %vm867_vm3, %v2512_v63, %v2513_v20  ;;  %v2569_v55 = vsel %vm221_vm1, %v5195_v39, %v5209_v34  ;;  %v2575_v36 = vmul.f32 %v5136_v54, %v2568_v56  ;;  %v2579_v9 = vmul.f32 %v5254_v8, %v2568_v56 }
 0x92d   :  { %v2521_v53 = vrot.slane %v2490_v17, 2  ;;  %v2520_v18 = vsel %vm867_vm3, %v2510_v13, %v2519_v47  ;;  %v2580_v62 = vmul.f32 %v5164_v19, %v2569_v55  ;;  %v2600_v39 = vsel %vm867_vm3, %v2598_v33, %v2599_v14 }
 0x92e   :  { %v2602_v1 = vrot.slane %v2579_v9, 2  ;;  %v2584_v60 = vmul.f32 %v4767_v61, %v2569_v55  ;;  %v2663_v57 = vsel %vm221_vm1, %v5071_v3, %v5245_v30  ;;  %v2585_v17 = vmul.f32 %v4785_v41, %v5209_v34 }
 0x92f   :  { %2523 = vrot.lane.b32.xlu0 %v2505_v31, %s3499_s29  ;;  %v2577_v31 = vmul.f32 %v5176_v4, %v5209_v34  ;;  %v2605_v29 = vrot.slane %v2580_v62, 2  ;;  %v2673_v61 = vmul.f32 %v5217_v37, %v5071_v3  ;;  %v2664_v47 = vsel %vm221_vm1, %v5245_v30, %v5267_v27 }
 0x930   :  { %v5326_v50 = vpop.permute.xlu0 %2144  ;;  %2527 = vrot.lane.b32.xlu2 %v2511_v16, %s3499_s29  ;;  %2525 = vrot.lane.b32.xlu1 %v2508_v15, %s3499_s29  ;;  %v2581_v16 = vmul.f32 %v5183_v28, %v5209_v34  ;;  %v2601_v15 = vrot.slane %v2575_v36, 2  ;;  %v2616_v33 = vrot.slane %v2585_v17, 2  ;;  %v2672_v30 = vmul.f32 %v5176_v4, %v5267_v27  ;;  %v2228_v4 = vpop.permute.xlu2 %2227 }
 0x931   :  { %v2152_v32 = vsel %vm260_vm5, %v2143_v38, %v5326_v50  ;;  %v2518_v38 = vsel %vm867_vm3, %v2507_v42, %v2517_v0  ;;  %v2576_v42 = vmul.f32 %v5158_v45, %v2569_v55  ;;  %v2607_v13 = vrot.slane %v2577_v31, 2 }
 0x932   :  { %v5334_v22 = vadd.f32 %v2152_v32, %v1974_v49  ;;  %v2522_v49 = vsel %vm867_vm3, %v2513_v20, %v2521_v53  ;;  %v2608_v63 = vrot.slane %v2581_v16, 2  ;;  %v2603_v32 = vsel %vm867_vm3, %v2601_v15, %v2602_v1 }
 0x933   :  { %v2604_v23 = vrot.slane %v2576_v42, 2  ;;  %v2583_v20 = vmul.f32 %v4776_v52, %v2568_v56  ;;  %v2669_v52 = vmul.f32 %v5125_v21, %v5071_v3  ;;  %v2670_v56 = vmul.f32 %v5136_v54, %v2663_v57 }
 0x934   :  { %v2609_v40 = vsel %vm867_vm3, %v2607_v13, %v2608_v63  ;;  %v2694_v55 = vrot.slane %v2673_v61, 2  ;;  %v2671_v53 = vmul.f32 %v5158_v45, %v2664_v47  ;;  %v2675_v42 = vmul.f32 %v5164_v19, %v2664_v47  ;;  %v5447_v61 = vpop.permute.xlu1 %2146 }
 0x935   :  { %v2606_v0 = vsel %vm867_vm3, %v2604_v23, %v2605_v29  ;;  %v2696_v36 = vrot.slane %v2670_v56, 2  ;;  %v2676_v31 = vmul.f32 %v5183_v28, %v5267_v27  ;;  %v2702_v28 = vrot.slane %v2672_v30, 2 }
 0x936   :  { %v2700_v15 = vrot.slane %v2675_v42, 2 }
 0x937   :  { %2529 = vrot.lane.b32.xlu0 %v2514_v44, %s3499_s29  ;;  %v2582_v44 = vmul.f32 %v4760_v25, %v5031_v6  ;;  %v2612_v25 = vrot.slane %v2583_v20, 2  ;;  %v2614_v6 = vrot.slane %v2584_v60, 2  ;;  %v2703_v13 = vrot.slane %v2676_v31, 2 }
 0x938   :  { %2533 = vrot.lane.b32.xlu2 %v2518_v38, %s3499_s29  ;;  %2531 = vrot.lane.b32.xlu1 %v2516_v12, %s3499_s29  ;;  %v2674_v12 = vmul.f32 %v5254_v8, %v2663_v57 }
 0x939   :  { %v2610_v11 = vrot.slane %v2582_v44, 2  ;;  %v2615_v41 = vsel %vm867_vm3, %v2605_v29, %v2614_v6  ;;  %v2613_v34 = vsel %vm867_vm3, %v2602_v1, %v2612_v25  ;;  %v5413_v1 = vld [vmem:[%s6065_s0 + $0xa0] sm:$0x3]  ;;  %v5423_v29 = vld [vmem:[%s6065_s0 + $0xa8] sm:$0x3] }
 0x93a   :  { %v2697_v9 = vrot.slane %v2674_v12, 2  ;;  %v5431_v44 = vld [vmem:[%s6065_s0 + $0xb0] sm:$0x3] }
 0x93b   :  { %v2611_v38 = vsel %vm867_vm3, %v2599_v14, %v2610_v11  ;;  %v2693_v14 = vrot.slane %v2669_v52, 2 }
 0x93c   :  { %v2698_v62 = vsel %vm867_vm3, %v2696_v36, %v2697_v9 }
 0x93d   :  { %v2695_v16 = vsel %vm867_vm3, %v2693_v14, %v2694_v55 }
 0x93f   :  { %2535 = vrot.lane.b32.xlu0 %v2520_v18, %s3499_s29  ;;  %v2617_v18 = vsel %vm867_vm3, %v2608_v63, %v2616_v33 }
 0x940   :  { %2618 = vrot.lane.b32.xlu2 %v2600_v39, %s3500_s10  ;;  %2537 = vrot.lane.b32.xlu1 %v2522_v49, %s3499_s29  ;;  %v2699_v39 = vrot.slane %v2671_v53, 2  ;;  %v2677_v49 = vmul.f32 %v5413_v1, %v5071_v3  ;;  %v2704_v3 = vsel %vm867_vm3, %v2702_v28, %v2703_v13  ;;  %v6273_v28 = vld [vmem:[#allocation43_spill] sm:$0xff] }
 0x942   :  { %v2701_v63 = vsel %vm867_vm3, %v2699_v39, %v2700_v15  ;;  %v2705_v23 = vrot.slane %v2677_v49, 2 }
 0x944   :  { %v2706_v60 = vsel %vm867_vm3, %v2694_v55, %v2705_v23 }
 0x947   :  { %2620 = vrot.lane.b32.xlu0 %v2603_v32, %s3500_s10  ;;  %v2678_v32 = vmul.f32 %v5423_v29, %v2663_v57 }
 0x948   :  { %2624 = vrot.lane.b32.xlu2 %v2609_v40, %s3500_s10  ;;  %2622 = vrot.lane.b32.xlu1 %v2606_v0, %s3500_s10  ;;  %v2679_v40 = vmul.f32 %v5431_v44, %v2664_v47  ;;  %v3470_v0 = vld [vmem:[%s6065_s0 + $0xb8] sm:$0x3] }
 0x949   :  { %v2680_v20 = vmul.f32 %v3470_v0, %v5267_v27  ;;  %v2707_v11 = vrot.slane %v2678_v32, 2  ;;  %v6276_v32 = vld [vmem:[#allocation32_spill] sm:$0xff] }
 0x94a   :  { %v2709_v6 = vrot.slane %v2679_v40, 2  ;;  %v6277_v0 = vld [vmem:[#allocation44_spill] sm:$0xff] }
 0x94b   :  { %v2711_v25 = vrot.slane %v2680_v20, 2  ;;  %v2708_v17 = vsel %vm867_vm3, %v2697_v9, %v2707_v11  ;;  %v1340_v20 = vrot.slane %v6277_v0, 4 }
 0x94c   :  { %v2710_v52 = vsel %vm867_vm3, %v2700_v15, %v2709_v6 }
 0x94f   :  { %2626 = vrot.lane.b32.xlu0 %v2611_v38, %s3500_s10  ;;  %v2712_v38 = vsel %vm867_vm3, %v2703_v13, %v2711_v25  ;;  %v1347_v13 = vrot.slane %v6273_v28, 4  ;;  %v6278_v25 = vld [vmem:[#allocation21_spill] sm:$0xff] }
 0x950   :  { %2630 = vrot.lane.b32.xlu2 %v2615_v41, %s3500_s10  ;;  %2628 = vrot.lane.b32.xlu1 %v2613_v34, %s3500_s10  ;;  %v1384_v6 = vrot.slane %v6278_v25, 4 }
 0x951   :  { %v1348_v23 = vadd.f32 %v1347_v13, %v6273_v28 }
 0x957   :  { %2632 = vrot.lane.b32.xlu0 %v2617_v18, %s3500_s10 }
 0x958   :  { %2715 = vrot.lane.b32.xlu2 %v2698_v62, %s3500_s10  ;;  %2713 = vrot.lane.b32.xlu1 %v2695_v16, %s3500_s10 }
 0x95f   :  { %2717 = vrot.lane.b32.xlu0 %v2701_v63, %s3500_s10 }
 0x960   :  { %2721 = vrot.lane.b32.xlu2 %v2706_v60, %s3500_s10  ;;  %2719 = vrot.lane.b32.xlu1 %v2704_v3, %s3500_s10  ;;  %v1354_v3 = vrot.slane %v6276_v32, 4  ;;  %v1349_v60 = vrot.slane %v1348_v23, 2 }
 0x962   :  { %v2234_v57 = vpop.permute.xlu2 %2233  ;;  %v1355_v11 = vadd.f32 %v1354_v3, %v6276_v32 }
 0x967   :  { %2723 = vrot.lane.b32.xlu0 %v2708_v17, %s3500_s10 }
 0x968   :  { %2727 = vrot.lane.b32.xlu2 %v2712_v38, %s3500_s10  ;;  %2725 = vrot.lane.b32.xlu1 %v2710_v52, %s3500_s10  ;;  %v6280_v38 = vld [vmem:[#allocation30_spill] sm:$0xff] }
 0x969   :  { %v1370_v52 = vrot.slane %v6280_v38, 4 }
 0x96a   :  { %v2240_v27 = vpop.permute.xlu2 %2239 }
 0x96b   :  { %v1371_v28 = vadd.f32 %v1370_v52, %v6280_v38 }
 0x972   :  { %v5449_v56 = vpop.permute.xlu2 %2430 }
 0x979   :  { %v2230_v12 = vpop.permute.xlu0 %2229 }
 0x97a   :  { %v2243_v47 = vsel %vm260_vm5, %v2228_v4, %v2230_v12  ;;  %v2232_v34 = vpop.permute.xlu1 %2231  ;;  %v5463_v53 = vpop.permute.xlu2 %2436 }
 0x97b   :  { %v5453_v41 = vadd.f32 %v2243_v47, %v4922_v26  ;;  %v2244_v33 = vsel %vm260_vm5, %v2230_v12, %v2232_v34  ;;  %v2245_v14 = vsel %vm260_vm5, %v2232_v34, %v2234_v57  ;;  %v1341_v57 = vadd.f32 %v1340_v20, %v6277_v0  ;;  %v6285_v20 = vld [vmem:[#allocation14_spill] sm:$0xff] }
 0x97c   :  { %v5458_v55 = vadd.f32 %v2244_v33, %v4943_v51  ;;  %v5461_v36 = vadd.f32 %v2245_v14, %v4947_v7  ;;  %v1350_v47 = vadd.f32 %v1349_v60, %v1348_v23  ;;  %v1791_v34 = vmul.f32 %v5431_v44, %v5170_v48  ;;  %v3419_v33 = vld [vmem:[%s6066_s1 + $0x6] ss:$8 sm:$0x7]  ;;  %v6284_v23 = vld [vmem:[#allocation16_spill] sm:$0xff] }
 0x97d   :  { %v1561_v48 = vsel %vm122_vm4, %v6258_v2, %v6284_v23  ;;  %v2263_v0 = vperm.slane %v3419_v33, 0  ;;  %v1695_v60 = vsel %vm260_vm5, %v6260_v24, %v6285_v20  ;;  %v1372_v2 = vrot.slane %v1371_v28, 2  ;;  %v6290_v20 = vld [vmem:[#allocation47_spill] sm:$0xff] }
 0x97e   :  { %6267 = vst [vmem:[#allocation26_spill] sm:$0xff] %v5458_v55  ;;  %v1351_v32 = vrot.slane %v1350_v47, 1  ;;  %v1814_v3 = vrot.slane %v1791_v34, 1  ;;  %v6288_v34 = vrot.slane %v5206_v10, 1 }
 0x97f   :  { %6268 = vst [vmem:[#allocation25_spill] sm:$0xff] %v5461_v36  ;;  %v2269_v24 = vmul.f32 %v5125_v21, %v2263_v0  ;;  %v2275_v10 = vmul.f32 %v5413_v1, %v2263_v0 }
 0x980   :  { %v1815_v23 = vsel %vm374_vm2, %v6288_v34, %v1814_v3 }
 0x981   :  { %v2236_v9 = vpop.permute.xlu0 %2235 }
 0x982   :  { %v2238_v42 = vpop.permute.xlu1 %2237  ;;  %v5477_v16 = vpop.permute.xlu2 %2442 }
 0x983   :  { %v2246_v18 = vsel %vm260_vm5, %v2236_v9, %v2238_v42  ;;  %v2247_v26 = vsel %vm260_vm5, %v2238_v42, %v2240_v27  ;;  %v1342_v9 = vrot.slane %v1341_v57, 2  ;;  %v6282_v42 = vld [vmem:[#allocation31_spill] sm:$0xff] }
 0x984   :  { %v5468_v30 = vadd.f32 %v2246_v18, %v4955_v43  ;;  %v5471_v31 = vadd.f32 %v2247_v26, %v4961_v58  ;;  %v1377_v18 = vrot.slane %v6282_v42, 4  ;;  %v1385_v26 = vadd.f32 %v1384_v6, %v6278_v25 }
 0x985   :  { %v2265_v25 = vperm.slane %v3419_v33, 2  ;;  %v1343_v38 = vadd.f32 %v1342_v9, %v1341_v57 }
 0x986   :  { %6269 = vst [vmem:[#allocation37_spill] sm:$0xff] %v5468_v30  ;;  %v1386_v6 = vrot.slane %v1385_v26, 2 }
 0x987   :  { %6270 = vst [vmem:[#allocation35_spill] sm:$0xff] %v5471_v31  ;;  %v2287_v31 = vrot.slane %v2269_v24, 2 }
 0x989   :  { %v2242_v62 = vpop.permute.xlu0 %2241 }
 0x98a   :  { %v2248_v51 = vsel %vm260_vm5, %v2240_v27, %v2242_v62  ;;  %v5479_v39 = vpop.permute.xlu1 %2428  ;;  %v5485_v4 = vpop.permute.xlu2 %2527  ;;  %v1356_v27 = vrot.slane %v1355_v11, 2  ;;  %v6283_v62 = vperm.slane %v5036_v59, 2  ;;  %v1378_v59 = vadd.f32 %v1377_v18, %v6282_v42 }
 0x98b   :  { %v5475_v7 = vadd.f32 %v2248_v51, %v4959_v46  ;;  %6272 = vst [vmem:[#allocation24_spill] sm:$0xff] %v5485_v4 }
 0x98c   :  { %v1480_v51 = vmul.f32 %v5164_v19, %v6283_v62  ;;  %v1357_v13 = vadd.f32 %v1356_v27, %v1355_v11  ;;  %v5531_v11 = vadd.f32 %v1351_v32, %v1350_v47  ;;  %v2274_v47 = vmul.f32 %v5164_v19, %v2265_v25 }
 0x98d   :  { %6271 = vst [vmem:[#allocation29_spill] sm:$0xff] %v5475_v7  ;;  %v2264_v7 = vperm.slane %v3419_v33, 1  ;;  %v2272_v33 = vmul.f32 %v5217_v37, %v2263_v0  ;;  %v2277_v32 = vmul.f32 %v5431_v44, %v2265_v25  ;;  %v1379_v3 = vrot.slane %v1378_v59, 2 }
 0x98e   :  { %v1573_v62 = vadd.f32 %v1561_v48, %v1480_v51  ;;  %6287 = vst [vmem:[#allocation38_spill] sm:$0xff] %v5531_v11  ;;  %v1358_v52 = vrot.slane %v1357_v13, 1  ;;  %v2271_v51 = vmul.f32 %v5158_v45, %v2265_v25  ;;  %v6293_v11 = vld [vmem:[#allocation42_spill] sm:$0xff]  ;;  %v2294_v4 = vrot.slane %v2274_v47, 2 }
 0x98f   :  { %v2270_v42 = vmul.f32 %v5136_v54, %v2264_v7  ;;  %v2273_v18 = vmul.f32 %v5254_v8, %v2264_v7  ;;  %v2276_v48 = vmul.f32 %v5423_v29, %v2264_v7  ;;  %v2288_v30 = vrot.slane %v2272_v33, 2  ;;  %v6296_v33 = vld [vmem:[#allocation33_spill] sm:$0xff] }
 0x990   :  { %v1707_v27 = vadd.f32 %v1695_v60, %v1573_v62  ;;  %v1401_v60 = vrot.slane %v6290_v20, 4  ;;  %v1344_v62 = vrot.slane %v1343_v38, 1  ;;  %v5550_v34 = vadd.f32 %v1358_v52, %v1357_v13  ;;  %v6294_v52 = vld [vmem:[#allocation46_spill] sm:$0xff] }
 0x991   :  { %v5481_v15 = vpop.permute.xlu0 %2432  ;;  %v2291_v36 = vrot.slane %v2273_v18, 2  ;;  %v2293_v0 = vrot.slane %v2271_v51, 2  ;;  %v2153_v7 = vsel %vm260_vm5, %v5326_v50, %v5447_v61  ;;  %v2296_v25 = vrot.slane %v2275_v10, 2  ;;  %v3420_v61 = vld [vmem:[%s6066_s1 + $0x1f] ss:$8 sm:$0x7] }
 0x992   :  { %v5483_v49 = vpop.permute.xlu1 %2434  ;;  %v5492_v63 = vpop.permute.xlu2 %2533  ;;  %6291 = vst [vmem:[#allocation48_spill] sm:$0xff] %v5550_v34  ;;  %v2298_v55 = vrot.slane %v2276_v48, 2  ;;  %v5560_v34 = vadd.f32 %v1372_v2, %v1371_v28  ;;  %v5568_v24 = vadd.f32 %v1401_v60, %v6290_v20  ;;  %v1431_v50 = vrot.slane %v6296_v33, 4  ;;  %v6297_v18 = vld [vmem:[#allocation45_spill] sm:$0xff]  ;;  %s3501_s1 = smov 96  }
 0x993   :  { %6274 = vst [vmem:[#allocation27_spill] sm:$0xff] %v5492_v63  ;;  %v1415_v63 = vrot.slane %v6293_v11, 4  ;;  %v2297_v51 = vsel %vm867_vm3, %v2288_v30, %v2296_v25  ;;  %v2445_v25 = vsel %vm122_vm4, %v5449_v56, %v5481_v15 }
 0x994   :  { %v2299_v47 = vsel %vm867_vm3, %v2291_v36, %v2298_v55  ;;  %v2311_v55 = vadd.f32 %v2297_v51, %v5320_v5 }
 0x999   :  { %v5487_v43 = vpop.permute.xlu0 %2438 }
 0x99a   :  { %v5489_v58 = vpop.permute.xlu1 %2440  ;;  %v5507_v12 = vpop.permute.xlu2 %2618 }
 0x9a1   :  { %v5494_v46 = vpop.permute.xlu0 %2523 }
 0x9a2   :  { %6275 = vst [vmem:[#allocation28_spill] sm:$0xff] %v5494_v46  ;;  %v5498_v40 = vpop.permute.xlu1 %2525  ;;  %v5542_v57 = vpop.permute.xlu2 %2624  ;;  %v2300_v46 = vrot.slane %v2277_v32, 2 }
 0x9a4   :  { %v2301_v10 = vsel %vm867_vm3, %v2294_v4, %v2300_v46  ;;  %v2444_v46 = vsel %vm122_vm4, %v5479_v39, %v5449_v56 }
 0x9a9   :  { %v5504_v17 = vpop.permute.xlu0 %2529 }
 0x9aa   :  { %6279 = vst [vmem:[#allocation49_spill] sm:$0xff] %v5504_v17  ;;  %v5514_v14 = vpop.permute.xlu1 %2531  ;;  %v1827_v17 = vadd.f32 %v1815_v23, %v1707_v27  ;;  %v5562_v27 = vadd.f32 %v1379_v3, %v1378_v59  ;;  %v5565_v23 = vadd.f32 %v1415_v63, %v6293_v11  ;;  %v2289_v59 = vsel %vm867_vm3, %v2287_v31, %v2288_v30  ;;  %v2631_v20 = vpop.permute.xlu2 %2630 }
 0x9ab   :  { %6281 = vst [vmem:[#allocation40_spill] sm:$0xff] %v5514_v14  ;;  %v2295_v11 = vsel %vm867_vm3, %v2293_v0, %v2294_v4  ;;  %v2316_v3 = vperm.slane %v3420_v61, 0  ;;  %v1403_v31 = vrot.slane %v5568_v24, 2  ;;  %v2312_v4 = vadd.f32 %v2299_v47, %v5334_v22 }
 0x9ac   :  { %v2310_v30 = vadd.f32 %v2295_v11, %v5310_v35  ;;  %v2448_v35 = vsel %vm122_vm4, %v5487_v43, %v5489_v58 }
 0x9ad   :  { %v2460_v11 = vadd.f32 %v2448_v35, %v2312_v4 }
 0x9b1   :  { %v5529_v14 = vpop.permute.xlu0 %2535 }
 0x9b2   :  { %6286 = vst [vmem:[#allocation39_spill] sm:$0xff] %v5529_v14  ;;  %v5544_v9 = vpop.permute.xlu1 %2537  ;;  %v5552_v14 = vadd.f32 %v1386_v6, %v1385_v26  ;;  %v1408_v26 = vrot.slane %v6294_v52, 4  ;;  %v6295_v6 = vld [vmem:[#allocation12_spill] sm:$0xff] }
 0x9b3   :  { %6289 = vst [vmem:[#allocation41_spill] sm:$0xff] %v5544_v9  ;;  %v2290_v9 = vrot.slane %v2270_v42, 2  ;;  %v5574_v42 = vadd.f32 %v1344_v62, %v1343_v38  ;;  %v6298_v38 = vld [vmem:[#allocation15_spill] sm:$0xff]  ;;  %v6300_v62 = vld [vmem:[#allocation13_spill] sm:$0xff] }
 0x9b4   :  { %6292 = vst [vmem:[#allocation50_spill] sm:$0xff] %v5552_v14  ;;  %v1975_v14 = vadd.f32 %v6295_v6, %v1827_v17  ;;  %v1445_v17 = vrot.slane %v6297_v18, 4  ;;  %v5584_v48 = vadd.f32 %v1408_v26, %v6294_v52  ;;  %v1438_v32 = vrot.slane %v6298_v38, 4 }
 0x9b5   :  { %v2292_v2 = vsel %vm867_vm3, %v2290_v9, %v2291_v36  ;;  %v6299_v9 = vld [vmem:[#allocation19_spill] sm:$0xff]  ;;  %v2447_v52 = vsel %vm122_vm4, %v5463_v53, %v5487_v43  ;;  %v2322_v26 = vmul.f32 %v5125_v21, %v2316_v3  ;;  %v2325_v6 = vmul.f32 %v5217_v37, %v2316_v3 }
 0x9b6   :  { %v2165_v28 = vadd.f32 %v2153_v7, %v1975_v14  ;;  %v2317_v14 = vperm.slane %v3420_v61, 1  ;;  %v2308_v60 = vadd.f32 %v2289_v59, %v6299_v9  ;;  %v2309_v0 = vadd.f32 %v2292_v2, %v6300_v62 }
 0x9b7   :  { %v2318_v7 = vperm.slane %v3420_v61, 2  ;;  %v2459_v2 = vadd.f32 %v2447_v52, %v2311_v55  ;;  %v2340_v47 = vrot.slane %v2322_v26, 2 }
 0x9b8   :  { %v2313_v36 = vadd.f32 %v2301_v10, %v2165_v28  ;;  %v2323_v22 = vmul.f32 %v5136_v54, %v2317_v14  ;;  %v2326_v39 = vmul.f32 %v5254_v8, %v2317_v14  ;;  %v2456_v59 = vadd.f32 %v2444_v46, %v2308_v60 }
 0x9b9   :  { %v2621_v13 = vpop.permute.xlu0 %2620  ;;  %v2324_v61 = vmul.f32 %v5158_v45, %v2318_v7  ;;  %v2327_v56 = vmul.f32 %v5164_v19, %v2318_v7  ;;  %v2457_v43 = vadd.f32 %v2445_v25, %v2309_v0  ;;  %v2328_v54 = vmul.f32 %v5413_v1, %v2316_v3  ;;  %v5633_v3 = vpop.permute.xlu2 %2715 }
 0x9ba   :  { %v2623_v63 = vpop.permute.xlu1 %2622  ;;  %v2634_v53 = vsel %vm260_vm5, %v5507_v12, %v2621_v13  ;;  %v2329_v37 = vmul.f32 %v5423_v29, %v2317_v14  ;;  %v2341_v10 = vrot.slane %v2325_v6, 2  ;;  %v2343_v9 = vrot.slane %v2323_v22, 2 }
 0x9bb   :  { %v2635_v28 = vsel %vm260_vm5, %v2621_v13, %v2623_v63  ;;  %v5618_v51 = vadd.f32 %v2634_v53, %v2456_v59  ;;  %v2330_v60 = vmul.f32 %v5431_v44, %v2318_v7  ;;  %v2446_v1 = vsel %vm122_vm4, %v5481_v15, %v5483_v49  ;;  %v6301_v59 = vld [vmem:[#allocation28_spill] sm:$0xff] }
 0x9bc   :  { %v5620_v19 = vadd.f32 %v2635_v28, %v2457_v43  ;;  %v2449_v29 = vsel %vm122_vm4, %v5489_v58, %v5477_v16  ;;  %v2344_v0 = vrot.slane %v2326_v39, 2  ;;  %v2346_v55 = vrot.slane %v2324_v61, 2 }
 0x9bd   :  { %v2347_v4 = vrot.slane %v2327_v56, 2  ;;  %v2349_v44 = vrot.slane %v2328_v54, 2  ;;  %v2351_v46 = vrot.slane %v2329_v37, 2  ;;  %v2636_v15 = vsel %vm260_vm5, %v2623_v63, %v5542_v57  ;;  %v6303_v37 = vld [vmem:[#allocation24_spill] sm:$0xff] }
 0x9be   :  { %v2458_v16 = vadd.f32 %v2446_v1, %v2310_v30  ;;  %v2461_v58 = vadd.f32 %v2449_v29, %v2313_v36  ;;  %v2353_v52 = vrot.slane %v2330_v60, 2  ;;  %v2342_v26 = vsel %vm867_vm3, %v2340_v47, %v2341_v10  ;;  %v6306_v1 = vld [vmem:[#allocation35_spill] sm:$0xff] }
 0x9bf   :  { %v2345_v61 = vsel %vm867_vm3, %v2343_v9, %v2344_v0  ;;  %v2348_v56 = vsel %vm867_vm3, %v2346_v55, %v2347_v4  ;;  %v2350_v63 = vsel %vm867_vm3, %v2341_v10, %v2349_v44  ;;  %v2352_v30 = vsel %vm867_vm3, %v2344_v0, %v2351_v46  ;;  %v6304_v10 = vld [vmem:[#allocation25_spill] sm:$0xff] }
 0x9c0   :  { %v5646_v53 = vadd.f32 %v2636_v15, %v2458_v16  ;;  %v2361_v28 = vadd.f32 %v2342_v26, %v5453_v41  ;;  %v2539_v43 = vsel %vm122_vm4, %v6301_v59, %v5498_v40  ;;  %v2363_v9 = vadd.f32 %v2348_v56, %v6304_v10  ;;  %v6305_v41 = vld [vmem:[#allocation37_spill] sm:$0xff] }
 0x9c1   :  { %v2627_v5 = vpop.permute.xlu0 %2626  ;;  %v2364_v60 = vadd.f32 %v2350_v63, %v6305_v41  ;;  %v2365_v29 = vadd.f32 %v2352_v30, %v6306_v1  ;;  %v2722_v55 = vpop.permute.xlu2 %2721  ;;  %v6307_v26 = vld [vmem:[#allocation49_spill] sm:$0xff]  ;;  %v2779_v63 = vmul.f32 %v5620_v19, %v5620_v19 }
 0x9c2   :  { %v2629_v21 = vpop.permute.xlu1 %2628  ;;  %v2551_v0 = vadd.f32 %v2539_v43, %v2361_v28  ;;  %v6311_v43 = vld [vmem:[#allocation39_spill] sm:$0xff]  ;;  %v6312_v1 = vld [vmem:[#allocation41_spill] sm:$0xff] }
 0x9c3   :  { %v2637_v8 = vsel %vm260_vm5, %v2627_v5, %v2629_v21  ;;  %v2638_v45 = vsel %vm260_vm5, %v2629_v21, %v2631_v20  ;;  %v1417_v5 = vrot.slane %v5565_v23, 2  ;;  %v6302_v21 = vld [vmem:[#allocation26_spill] sm:$0xff] }
 0x9c4   :  { %v5622_v12 = vadd.f32 %v2637_v8, %v2459_v2  ;;  %v5624_v13 = vadd.f32 %v2638_v45, %v2460_v11  ;;  %v2354_v2 = vsel %vm867_vm3, %v2347_v4, %v2353_v52  ;;  %v2362_v54 = vadd.f32 %v2345_v61, %v6302_v21  ;;  %v6309_v61 = vld [vmem:[#allocation40_spill] sm:$0xff] }
 0x9c5   :  { %v2540_v8 = vsel %vm122_vm4, %v5498_v40, %v6303_v37  ;;  %v2778_v40 = vmul.f32 %v5618_v51, %v5618_v51 }
 0x9c6   :  { %v2754_v14 = vadd.f32 %v5622_v12, %v5618_v51  ;;  %v2761_v62 = vadd.f32 %v5624_v13, %v5620_v19  ;;  %v2781_v4 = vmul.f32 %v5622_v12, %v5622_v12  ;;  %v2552_v46 = vadd.f32 %v2540_v8, %v2362_v54 }
 0x9c7   :  { %v2782_v15 = vmul.f32 %v5624_v13, %v5624_v13  ;;  %v1410_v8 = vrot.slane %v5584_v48, 2 }
 0x9c8   :  { %v2755_v49 = vrot.slane %v2754_v14, 4  ;;  %v2762_v25 = vrot.slane %v2761_v62, 4 }
 0x9c9   :  { %v2633_v7 = vpop.permute.xlu0 %2632  ;;  %v2791_v21 = vadd.f32 %v2782_v15, %v2779_v63 }
 0x9ca   :  { %v2639_v35 = vsel %vm260_vm5, %v2631_v20, %v2633_v7  ;;  %v2756_v22 = vadd.f32 %v2755_v49, %v2754_v14  ;;  %v2763_v6 = vadd.f32 %v2762_v25, %v2761_v62  ;;  %v2714_v39 = vpop.permute.xlu1 %2713 }
 0x9cb   :  { %v5648_v57 = vadd.f32 %v2639_v35, %v2461_v58  ;;  %v2729_v16 = vsel %vm260_vm5, %v2714_v39, %v5633_v3  ;;  %v6310_v39 = vld [vmem:[#allocation38_spill] sm:$0xff] }
 0x9cc   :  { %v2757_v20 = vrot.slane %v2756_v22, 2  ;;  %v2764_v36 = vrot.slane %v2763_v6, 2 }
 0x9cd   :  { %v2768_v11 = vadd.f32 %v5648_v57, %v5646_v53  ;;  %v2783_v25 = vmul.f32 %v5648_v57, %v5648_v57 }
 0x9ce   :  { %v2758_v45 = vadd.f32 %v2757_v20, %v2756_v22  ;;  %v2765_v47 = vadd.f32 %v2764_v36, %v2763_v6  ;;  %v2541_v22 = vsel %vm122_vm4, %v6303_v37, %v6307_v26  ;;  %v6308_v6 = vld [vmem:[#allocation27_spill] sm:$0xff]  ;;  %v2780_v20 = vmul.f32 %v5646_v53, %v5646_v53 }
 0x9cf   :  { %v2769_v14 = vrot.slane %v2768_v11, 4  ;;  %v2542_v56 = vsel %vm122_vm4, %v6309_v61, %v6308_v6  ;;  %v2784_v36 = vadd.f32 %v2781_v4, %v2778_v40  ;;  %v5695_v37 = vadd.f32 %v2729_v16, %v2551_v0  ;;  %v2728_v16 = vpop.permute.xlu2 %2727 }
 0x9d0   :  { %v2766_v44 = vrot.slane %v2765_v47, 1  ;;  %v2759_v7 = vrot.slane %v2758_v45, 1  ;;  %v2554_v41 = vadd.f32 %v2542_v56, %v2364_v60  ;;  %v6314_v56 = vld [vmem:[#allocation48_spill] sm:$0xff] }
 0x9d1   :  { %v2718_v62 = vpop.permute.xlu0 %2717  ;;  %v2770_v49 = vadd.f32 %v2769_v14, %v2768_v11  ;;  %v2543_v11 = vsel %vm122_vm4, %v6308_v6, %v6311_v43  ;;  %v2544_v14 = vsel %vm122_vm4, %v6311_v43, %v6312_v1  ;;  %v1404_v1 = vadd.f32 %v1403_v31, %v5568_v24 }
 0x9d2   :  { %v2720_v58 = vpop.permute.xlu1 %2719  ;;  %v2767_v52 = vadd.f32 %v2766_v44, %v2765_v47  ;;  %v2760_v35 = vadd.f32 %v2759_v7, %v2758_v45  ;;  %v2798_v45 = vadd.f32 %v2783_v25, %v2780_v20  ;;  %v2730_v47 = vsel %vm260_vm5, %v5633_v3, %v2718_v62  ;;  %v6313_v7 = vld [vmem:[#allocation29_spill] sm:$0xff] }
 0x9d3   :  { %v2771_v30 = vrot.slane %v2770_v49, 2  ;;  %v2731_v10 = vsel %vm260_vm5, %v2718_v62, %v2720_v58  ;;  %v2555_v44 = vadd.f32 %v2543_v11, %v2365_v29  ;;  %v2366_v40 = vadd.f32 %v2354_v2, %v6313_v7 }
 0x9d4   :  { %v5687_v28 = vadd.f32 %v2767_v52, %v6310_v39  ;;  %v5690_v59 = vadd.f32 %v2760_v35, %v5574_v42  ;;  %v2553_v42 = vadd.f32 %v2541_v22, %v2363_v9  ;;  %v2785_v3 = vrot.slane %v2784_v36, 4 }
 0x9d5   :  { %v2772_v54 = vadd.f32 %v2771_v30, %v2770_v49  ;;  %v5710_v15 = vadd.f32 %v2730_v47, %v2552_v46  ;;  %v2556_v60 = vadd.f32 %v2544_v14, %v2366_v40  ;;  %v2792_v58 = vrot.slane %v2791_v21, 4 }
 0x9d6   :  { %2871 = vrot.lane.b32.xlu1 %v5687_v28, %s3497_s19  ;;  %2869 = vrot.lane.b32.xlu0 %v5690_v59, %s3497_s19  ;;  %v5712_v49 = vadd.f32 %v2731_v10, %v2553_v42  ;;  %v2799_v52 = vrot.slane %v2798_v45, 4  ;;  %v2839_v35 = vmul.f32 %v5695_v37, %v5695_v37  ;;  %v2786_v22 = vadd.f32 %v2785_v3, %v2784_v36 }
 0x9d7   :  { %v2773_v4 = vrot.slane %v2772_v54, 1  ;;  %v2840_v30 = vmul.f32 %v5710_v15, %v5710_v15  ;;  %v2793_v10 = vadd.f32 %v2792_v58, %v2791_v21  ;;  %v1432_v7 = vadd.f32 %v1431_v50, %v6296_v33 }
 0x9d8   :  { %v2841_v20 = vmul.f32 %v5712_v49, %v5712_v49  ;;  %v2800_v42 = vadd.f32 %v2799_v52, %v2798_v45  ;;  %v2787_v40 = vrot.slane %v2786_v22, 2  ;;  %v1411_v21 = vadd.f32 %v1410_v8, %v5584_v48 }
 0x9d9   :  { %v2724_v0 = vpop.permute.xlu0 %2723  ;;  %v2774_v9 = vadd.f32 %v2773_v4, %v2772_v54  ;;  %v1418_v45 = vadd.f32 %v1417_v5, %v5565_v23  ;;  %v2794_v24 = vrot.slane %v2793_v10, 2  ;;  %v1405_v58 = vrot.slane %v1404_v1, 1 }
 0x9da   :  { %v2732_v62 = vsel %vm260_vm5, %v2722_v55, %v2724_v0  ;;  %v2726_v29 = vpop.permute.xlu1 %2725  ;;  %v2801_v31 = vrot.slane %v2800_v42, 2  ;;  %v1446_v33 = vadd.f32 %v1445_v17, %v6297_v18 }
 0x9db   :  { %v5714_v25 = vadd.f32 %v2732_v62, %v2554_v41  ;;  %v2733_v46 = vsel %vm260_vm5, %v2724_v0, %v2726_v29  ;;  %v2734_v26 = vsel %vm260_vm5, %v2726_v29, %v2728_v16  ;;  %v5729_v63 = vadd.f32 %v2774_v9, %v6314_v56 }
 0x9dc   :  { %v5724_v6 = vadd.f32 %v2733_v46, %v2555_v44  ;;  %v5726_v61 = vadd.f32 %v2734_v26, %v2556_v60  ;;  %v2788_v46 = vadd.f32 %v2787_v40, %v2786_v22  ;;  %v1412_v26 = vrot.slane %v1411_v21, 1 }
 0x9dd   :  { %v2815_v2 = vadd.f32 %v5714_v25, %v5695_v37  ;;  %v2842_v55 = vmul.f32 %v5714_v25, %v5714_v25  ;;  %2873 = vrot.lane.b32.xlu2 %v5729_v63, %s3497_s19  ;;  %v1419_v56 = vrot.slane %v1418_v45, 1  ;;  %v1406_v23 = vadd.f32 %v1405_v58, %v1404_v1 }
 0x9de   :  { %v2822_v11 = vadd.f32 %v5724_v6, %v5710_v15  ;;  %v2829_v36 = vadd.f32 %v5726_v61, %v5712_v49  ;;  %v2843_v54 = vmul.f32 %v5724_v6, %v5724_v6  ;;  %v2844_v47 = vmul.f32 %v5726_v61, %v5726_v61 }
 0x9df   :  { %v2816_v39 = vrot.slane %v2815_v2, 4  ;;  %v2845_v43 = vadd.f32 %v2842_v55, %v2839_v35  ;;  %v2789_v22 = vrot.slane %v2788_v46, 1 }
 0x9e0   :  { %v2823_v14 = vrot.slane %v2822_v11, 4  ;;  %v2830_v0 = vrot.slane %v2829_v36, 4  ;;  %v2852_v4 = vadd.f32 %v2843_v54, %v2840_v30  ;;  %v2859_v44 = vadd.f32 %v2844_v47, %v2841_v20 }
 0x9e1   :  { %v2817_v41 = vadd.f32 %v2816_v39, %v2815_v2  ;;  %v2846_v62 = vrot.slane %v2845_v43, 4  ;;  %v2795_v30 = vadd.f32 %v2794_v24, %v2793_v10  ;;  %v2802_v20 = vadd.f32 %v2801_v31, %v2800_v42 }
 0x9e2   :  { %v2824_v9 = vadd.f32 %v2823_v14, %v2822_v11  ;;  %v2831_v60 = vadd.f32 %v2830_v0, %v2829_v36  ;;  %v2853_v29 = vrot.slane %v2852_v4, 4  ;;  %v2860_v2 = vrot.slane %v2859_v44, 4 }
 0x9e3   :  { %v2818_v3 = vrot.slane %v2817_v41, 2  ;;  %v2847_v50 = vadd.f32 %v2846_v62, %v2845_v43  ;;  %v1439_v47 = vadd.f32 %v1438_v32, %v6298_v38  ;;  %v1413_v43 = vadd.f32 %v1412_v26, %v1411_v21 }
 0x9e4   :  { %v2825_v52 = vrot.slane %v2824_v9, 2  ;;  %v2832_v35 = vrot.slane %v2831_v60, 2  ;;  %v2854_v39 = vadd.f32 %v2853_v29, %v2852_v4  ;;  %v2861_v11 = vadd.f32 %v2860_v2, %v2859_v44 }
 0x9e5   :  { %v2819_v16 = vadd.f32 %v2818_v3, %v2817_v41  ;;  %v2848_v18 = vrot.slane %v2847_v50, 2  ;;  %v1420_v14 = vadd.f32 %v1419_v56, %v1418_v45  ;;  %v1374_v10 = vrot.slane %v5560_v34, 1 }
 0x9e6   :  { %v2826_v48 = vadd.f32 %v2825_v52, %v2824_v9  ;;  %v2833_v8 = vadd.f32 %v2832_v35, %v2831_v60  ;;  %v2796_v42 = vrot.slane %v2795_v30, 1  ;;  %v2803_v1 = vrot.slane %v2802_v20, 1  ;;  %v6315_v60 = vld [vmem:[#allocation50_spill] sm:$0xff] }
 0x9e7   :  { %v2820_v55 = vrot.slane %v2819_v16, 1  ;;  %v1433_v4 = vrot.slane %v1432_v7, 2  ;;  %v2855_v44 = vrot.slane %v2854_v39, 2  ;;  %v2862_v40 = vrot.slane %v2861_v11, 2 }
 0x9e8   :  { %v2827_v36 = vrot.slane %v2826_v48, 1  ;;  %v2834_v54 = vrot.slane %v2833_v8, 1  ;;  %v2790_v32 = vadd.f32 %v2789_v22, %v2788_v46  ;;  %v2849_v62 = vadd.f32 %v2848_v18, %v2847_v50 }
 0x9e9   :  { %v2821_v5 = vadd.f32 %v2820_v55, %v2819_v16  ;;  %v1381_v9 = vrot.slane %v5562_v27, 1  ;;  %v1388_v21 = vrot.slane %v6315_v60, 1  ;;  %v1440_v45 = vrot.slane %v1439_v47, 2 }
 0x9ea   :  { %v2828_v41 = vadd.f32 %v2827_v36, %v2826_v48  ;;  %v2835_v0 = vadd.f32 %v2834_v54, %v2833_v8  ;;  %v1447_v24 = vrot.slane %v1446_v33, 2  ;;  %v1375_v31 = vadd.f32 %v1374_v10, %v5560_v34 }
 0x9eb   :  { %v5761_v17 = vadd.f32 %v2821_v5, %v1406_v23  ;;  %v1434_v16 = vadd.f32 %v1433_v4, %v1432_v7  ;;  %v2797_v58 = vadd.f32 %v2796_v42, %v2795_v30  ;;  %v2804_v52 = vadd.f32 %v2803_v1, %v2802_v20 }
 0x9ec   :  { %v5766_v3 = vadd.f32 %v2828_v41, %v1413_v43  ;;  %v5768_v38 = vadd.f32 %v2835_v0, %v1420_v14  ;;  %v2856_v35 = vadd.f32 %v2855_v44, %v2854_v39  ;;  %v2863_v29 = vadd.f32 %v2862_v40, %v2861_v11 }
 0x9ed   :  { %3118 = vrot.lane.b32.xlu0 %v5761_v17, %s3497_s19  ;;  %v2805_v2 = vadd.f32 %v2790_v32, %v1375_v31  ;;  %v2850_v50 = vrot.slane %v2849_v62, 1  ;;  %v1382_v55 = vadd.f32 %v1381_v9, %v5562_v27  ;;  %v1389_v46 = vadd.f32 %v1388_v21, %v6315_v60 }
 0x9ee   :  { %3120 = vrot.lane.b32.xlu1 %v5766_v3, %s3497_s19  ;;  %3122 = vrot.lane.b32.xlu2 %v5768_v38, %s3497_s19  ;;  %v1441_v48 = vadd.f32 %v1440_v45, %v1439_v47  ;;  %v1448_v8 = vadd.f32 %v1447_v24, %v1446_v33  ;;  %v1435_v26 = vrot.slane %v1434_v16, 1  ;;  %v2857_v5 = vrot.slane %v2856_v35, 1 }
 0x9ef   :  { %v2806_v56 = vadd.f32 %v2797_v58, %v1382_v55  ;;  %v2807_v23 = vadd.f32 %v2804_v52, %v1389_v46  ;;  %v2864_v34 = vrot.slane %v2863_v29, 1  ;;  %v2851_v7 = vadd.f32 %v2850_v50, %v2849_v62 }
 0x9f0   :  { %v1442_v30 = vrot.slane %v1441_v48, 1  ;;  %v1449_v20 = vrot.slane %v1448_v8, 1  ;;  %v1436_v39 = vadd.f32 %v1435_v26, %v1434_v16  ;;  %v2858_v27 = vadd.f32 %v2857_v5, %v2856_v35 }
 0x9f1   :  { %v2865_v11 = vadd.f32 %v2864_v34, %v2863_v29  ;;  %v2875_v22 = vlaneseq }
 0x9f2   :  { %v2866_v36 = vadd.f32 %v2851_v7, %v1436_v39  ;;  %v1443_v54 = vadd.f32 %v1442_v30, %v1441_v48  ;;  %v1450_v33 = vadd.f32 %v1449_v20, %v1448_v8 }
 0x9f3   :  { %v5785_v43 = vand.u32 127, %v2875_v22 }
 0x9f4   :  { %v2867_v47 = vadd.f32 %v2858_v27, %v1443_v54  ;;  %v2868_v18 = vadd.f32 %v2865_v11, %v1450_v33 }
 0x9f5   :  { %2926 = vrot.lane.b32.xlu0 %v2805_v2, %s3497_s19  ;;  %vm2877_vm6 = vcmp.lt.s32.totalorder %v5785_v43, 24  ;;  %vm2890_vm7 = vcmp.lt.s32.totalorder %v5785_v43, 48  ;;  %vm2903_vm8 = vcmp.lt.s32.totalorder %v5785_v43, 96  ;;  %vm2916_vm9 = vcmp.lt.s32.totalorder %v5785_v43, 64 }
 0x9f6   :  { %2928 = vrot.lane.b32.xlu1 %v2806_v56, %s3497_s19  ;;  %2930 = vrot.lane.b32.xlu2 %v2807_v23, %s3497_s19 }
 0x9fd   :  { %3169 = vrot.lane.b32.xlu0 %v2866_v36, %s3497_s19 }
 0x9fe   :  { %3171 = vrot.lane.b32.xlu1 %v2867_v47, %s3497_s19  ;;  %3173 = vrot.lane.b32.xlu2 %v2868_v18, %s3497_s19 }
 0xa37   :  { %v2874_v41 = vpop.permute.xlu2 %2873 }
 0xa48   :  { %v2872_v14 = vpop.permute.xlu1 %2871  ;;  %v2870_v10 = vpop.permute.xlu0 %2869 }
 0xa49   :  { %v2878_v0 = vsel %vm2877_vm6, %v2872_v14, %v2874_v41  ;;  %v2879_v1 = vsel %vm2877_vm6, %v2870_v10, %v2872_v14  ;;  %v2880_v4 = vsel %vm2877_vm6, %v2874_v41, %v2870_v10  ;;  %v3123_v32 = vpop.permute.xlu2 %3122 }
 0xa4a   :  { %v2883_v42 = vadd.f32 %v2878_v0, %v5729_v63  ;;  %v2881_v44 = vadd.f32 %v2880_v4, %v5690_v59  ;;  %v2882_v40 = vadd.f32 %v2879_v1, %v5687_v28 }
 0xa4c   :  { %2888 = vrot.lane.b32.xlu2 %v2883_v42, %s3498_s22  ;;  %2884 = vrot.lane.b32.xlu0 %v2881_v44, %s3498_s22 }
 0xa4d   :  { %2886 = vrot.lane.b32.xlu1 %v2882_v40, %s3498_s22 }
 0xa51   :  { %v2931_v24 = vpop.permute.xlu2 %2930 }
 0xa59   :  { %v3174_v29 = vpop.permute.xlu2 %3173 }
 0xa5f   :  { %v3119_v62 = vpop.permute.xlu0 %3118 }
 0xa60   :  { %v3126_v63 = vsel %vm2877_vm6, %v3123_v32, %v3119_v62  ;;  %v3121_v60 = vpop.permute.xlu1 %3120 }
 0xa61   :  { %v3127_v9 = vadd.f32 %v3126_v63, %v5761_v17  ;;  %v3124_v21 = vsel %vm2877_vm6, %v3121_v60, %v3123_v32  ;;  %v3125_v28 = vsel %vm2877_vm6, %v3119_v62, %v3121_v60 }
 0xa62   :  { %v3128_v59 = vadd.f32 %v3125_v28, %v5766_v3  ;;  %v3129_v45 = vadd.f32 %v3124_v21, %v5768_v38 }
 0xa63   :  { %3130 = vrot.lane.b32.xlu0 %v3127_v9, %s3498_s22 }
 0xa64   :  { %3134 = vrot.lane.b32.xlu2 %v3129_v45, %s3498_s22  ;;  %3132 = vrot.lane.b32.xlu1 %v3128_v59, %s3498_s22 }
 0xa67   :  { %v2927_v31 = vpop.permute.xlu0 %2926 }
 0xa68   :  { %v2934_v17 = vsel %vm2877_vm6, %v2931_v24, %v2927_v31  ;;  %v2929_v58 = vpop.permute.xlu1 %2928 }
 0xa69   :  { %v2935_v16 = vadd.f32 %v2934_v17, %v2805_v2  ;;  %v2932_v52 = vsel %vm2877_vm6, %v2929_v58, %v2931_v24  ;;  %v2933_v35 = vsel %vm2877_vm6, %v2927_v31, %v2929_v58 }
 0xa6a   :  { %v2936_v3 = vadd.f32 %v2933_v35, %v2806_v56  ;;  %v2937_v38 = vadd.f32 %v2932_v52, %v2807_v23 }
 0xa6b   :  { %2938 = vrot.lane.b32.xlu0 %v2935_v16, %s3498_s22 }
 0xa6c   :  { %2942 = vrot.lane.b32.xlu2 %v2937_v38, %s3498_s22  ;;  %2940 = vrot.lane.b32.xlu1 %v2936_v3, %s3498_s22 }
 0xa6f   :  { %v3170_v50 = vpop.permute.xlu0 %3169 }
 0xa70   :  { %v3177_v2 = vsel %vm2877_vm6, %v3174_v29, %v3170_v50  ;;  %v3172_v46 = vpop.permute.xlu1 %3171 }
 0xa71   :  { %v3178_v55 = vadd.f32 %v3177_v2, %v2866_v36  ;;  %v3175_v48 = vsel %vm2877_vm6, %v3172_v46, %v3174_v29  ;;  %v3176_v8 = vsel %vm2877_vm6, %v3170_v50, %v3172_v46 }
 0xa72   :  { %v3179_v26 = vadd.f32 %v3176_v8, %v2867_v47  ;;  %v3180_v56 = vadd.f32 %v3175_v48, %v2868_v18 }
 0xa73   :  { %3181 = vrot.lane.b32.xlu0 %v3178_v55, %s3498_s22 }
 0xa74   :  { %3185 = vrot.lane.b32.xlu2 %v3180_v56, %s3498_s22  ;;  %3183 = vrot.lane.b32.xlu1 %v3179_v26, %s3498_s22  ;;  %s3502_s22 = smov 64  }
 0xaa6   :  { %v2889_v23 = vpop.permute.xlu2 %2888 }
 0xabe   :  { %v2885_v34 = vpop.permute.xlu0 %2884  ;;  %v3135_v36 = vpop.permute.xlu2 %3134 }
 0xabf   :  { %v2887_v5 = vpop.permute.xlu1 %2886  ;;  %v2893_v20 = vsel %vm2890_vm7, %v2889_v23, %v2885_v34 }
 0xac0   :  { %v2891_v7 = vsel %vm2890_vm7, %v2887_v5, %v2889_v23  ;;  %v2892_v30 = vsel %vm2890_vm7, %v2885_v34, %v2887_v5  ;;  %v2894_v27 = vadd.f32 %v2893_v20, %v2881_v44 }
 0xac1   :  { %v2896_v39 = vadd.f32 %v2891_v7, %v2883_v42  ;;  %v2895_v11 = vadd.f32 %v2892_v30, %v2882_v40 }
 0xac2   :  { %2897 = vrot.lane.b32.xlu0 %v2894_v27, %s3501_s1 }
 0xac3   :  { %2901 = vrot.lane.b32.xlu2 %v2896_v39, %s3501_s1  ;;  %2899 = vrot.lane.b32.xlu1 %v2895_v11, %s3501_s1 }
 0xac6   :  { %v2943_v10 = vpop.permute.xlu2 %2942 }
 0xad5   :  { %v3131_v54 = vpop.permute.xlu0 %3130 }
 0xad6   :  { %v3138_v33 = vsel %vm2890_vm7, %v3135_v36, %v3131_v54  ;;  %v3133_v18 = vpop.permute.xlu1 %3132 }
 0xad7   :  { %v3139_v47 = vadd.f32 %v3138_v33, %v3127_v9  ;;  %v3136_v22 = vsel %vm2890_vm7, %v3133_v18, %v3135_v36  ;;  %v3137_v41 = vsel %vm2890_vm7, %v3131_v54, %v3133_v18  ;;  %v3186_v9 = vpop.permute.xlu2 %3185 }
 0xad8   :  { %v3140_v14 = vadd.f32 %v3137_v41, %v3128_v59  ;;  %v3141_v0 = vadd.f32 %v3136_v22, %v3129_v45 }
 0xad9   :  { %3142 = vrot.lane.b32.xlu0 %v3139_v47, %s3501_s1 }
 0xada   :  { %3146 = vrot.lane.b32.xlu2 %v3141_v0, %s3501_s1  ;;  %3144 = vrot.lane.b32.xlu1 %v3140_v14, %s3501_s1 }
 0xadd   :  { %v2939_v42 = vpop.permute.xlu0 %2938 }
 0xade   :  { %v2946_v1 = vsel %vm2890_vm7, %v2943_v10, %v2939_v42  ;;  %v2941_v44 = vpop.permute.xlu1 %2940 }
 0xadf   :  { %v2947_v4 = vadd.f32 %v2946_v1, %v2935_v16  ;;  %v2944_v40 = vsel %vm2890_vm7, %v2941_v44, %v2943_v10  ;;  %v2945_v32 = vsel %vm2890_vm7, %v2939_v42, %v2941_v44 }
 0xae0   :  { %v2948_v62 = vadd.f32 %v2945_v32, %v2936_v3  ;;  %v2949_v63 = vadd.f32 %v2944_v40, %v2937_v38 }
 0xae1   :  { %2950 = vrot.lane.b32.xlu0 %v2947_v4, %s3501_s1 }
 0xae2   :  { %2954 = vrot.lane.b32.xlu2 %v2949_v63, %s3501_s1  ;;  %2952 = vrot.lane.b32.xlu1 %v2948_v62, %s3501_s1 }
 0xae5   :  { %v3182_v60 = vpop.permute.xlu0 %3181 }
 0xae6   :  { %v3189_v21 = vsel %vm2890_vm7, %v3186_v9, %v3182_v60  ;;  %v3184_v59 = vpop.permute.xlu1 %3183 }
 0xae7   :  { %v3190_v28 = vadd.f32 %v3189_v21, %v3178_v55  ;;  %v3187_v45 = vsel %vm2890_vm7, %v3184_v59, %v3186_v9  ;;  %v3188_v24 = vsel %vm2890_vm7, %v3182_v60, %v3184_v59 }
 0xae8   :  { %v3191_v31 = vadd.f32 %v3188_v24, %v3179_v26  ;;  %v3192_v17 = vadd.f32 %v3187_v45, %v3180_v56 }
 0xae9   :  { %3193 = vrot.lane.b32.xlu0 %v3190_v28, %s3501_s1 }
 0xaea   :  { %3197 = vrot.lane.b32.xlu2 %v3192_v17, %s3501_s1  ;;  %3195 = vrot.lane.b32.xlu1 %v3191_v31, %s3501_s1 }
 0xb1d   :  { %v2902_v16 = vpop.permute.xlu2 %2901 }
 0xb34   :  { %v2898_v58 = vpop.permute.xlu0 %2897  ;;  %v3147_v55 = vpop.permute.xlu2 %3146 }
 0xb35   :  { %v2900_v52 = vpop.permute.xlu1 %2899  ;;  %v2906_v35 = vsel %vm2903_vm8, %v2902_v16, %v2898_v58 }
 0xb36   :  { %v2904_v3 = vsel %vm2903_vm8, %v2900_v52, %v2902_v16  ;;  %v5872_v38 = vadd.f32 %v2906_v35, %v2894_v27  ;;  %v2905_v50 = vsel %vm2903_vm8, %v2898_v58, %v2900_v52 }
 0xb37   :  { %v5874_v29 = vadd.f32 %v2904_v3, %v2896_v39  ;;  %v2908_v2 = vadd.f32 %v2905_v50, %v2895_v11 }
 0xb38   :  { %2910 = vrot.lane.b32.xlu0 %v5872_v38, %s3502_s22 }
 0xb39   :  { %2914 = vrot.lane.b32.xlu1 %v5874_v29, %s3502_s22 }
 0xb3c   :  { %v2955_v5 = vpop.permute.xlu2 %2954 }
 0xb41   :  { %2912 = vrot.lane.b32.xlu1 %v2908_v2, %s3502_s22 }
 0xb44   :  { %v3198_v54 = vpop.permute.xlu2 %3197 }
 0xb4b   :  { %v3143_v46 = vpop.permute.xlu0 %3142 }
 0xb4c   :  { %v3150_v48 = vsel %vm2903_vm8, %v3147_v55, %v3143_v46  ;;  %v3145_v26 = vpop.permute.xlu1 %3144 }
 0xb4d   :  { %v5885_v8 = vadd.f32 %v3150_v48, %v3139_v47  ;;  %v3148_v56 = vsel %vm2903_vm8, %v3145_v26, %v3147_v55  ;;  %v3149_v34 = vsel %vm2903_vm8, %v3143_v46, %v3145_v26 }
 0xb4e   :  { %v3153_v23 = vadd.f32 %v3148_v56, %v3141_v0  ;;  %v3152_v20 = vadd.f32 %v3149_v34, %v3140_v14 }
 0xb4f   :  { %3154 = vrot.lane.b32.xlu2 %v5885_v8, %s3502_s22 }
 0xb50   :  { %3158 = vrot.lane.b32.xlu0 %v3153_v23, %s3502_s22 }
 0xb53   :  { %v2951_v7 = vpop.permute.xlu0 %2950 }
 0xb54   :  { %v2958_v30 = vsel %vm2903_vm8, %v2955_v5, %v2951_v7  ;;  %v2953_v27 = vpop.permute.xlu1 %2952 }
 0xb55   :  { %v5896_v39 = vadd.f32 %v2958_v30, %v2947_v4  ;;  %v2956_v11 = vsel %vm2903_vm8, %v2953_v27, %v2955_v5  ;;  %v2957_v18 = vsel %vm2903_vm8, %v2951_v7, %v2953_v27 }
 0xb56   :  { %v5901_v36 = vadd.f32 %v2956_v11, %v2949_v63  ;;  %v2960_v0 = vadd.f32 %v2957_v18, %v2948_v62 }
 0xb57   :  { %3156 = vrot.lane.b32.xlu2 %v3152_v20, %s3502_s22 }
 0xb58   :  { %2966 = vrot.lane.b32.xlu1 %v5901_v36, %s3502_s22  ;;  %2962 = vrot.lane.b32.xlu0 %v5896_v39, %s3502_s22 }
 0xb5b   :  { %v3194_v33 = vpop.permute.xlu0 %3193 }
 0xb5c   :  { %v3201_v47 = vsel %vm2903_vm8, %v3198_v54, %v3194_v33  ;;  %v3196_v41 = vpop.permute.xlu1 %3195 }
 0xb5d   :  { %v5911_v22 = vadd.f32 %v3201_v47, %v3190_v28  ;;  %v3199_v14 = vsel %vm2903_vm8, %v3196_v41, %v3198_v54  ;;  %v3200_v42 = vsel %vm2903_vm8, %v3194_v33, %v3196_v41 }
 0xb5e   :  { %v3204_v10 = vadd.f32 %v3199_v14, %v3192_v17  ;;  %v3203_v1 = vadd.f32 %v3200_v42, %v3191_v31 }
 0xb5f   :  { %3205 = vrot.lane.b32.xlu2 %v5911_v22, %s3502_s22 }
 0xb60   :  { %3209 = vrot.lane.b32.xlu0 %v3204_v10, %s3502_s22  ;;  %2964 = vrot.lane.b32.xlu1 %v2960_v0, %s3502_s22 }
 0xb67   :  { %3207 = vrot.lane.b32.xlu2 %v3203_v1, %s3502_s22 }
 0xba9   :  { %v3155_v4 = vpop.permute.xlu2 %3154 }
 0xbaa   :  { %v2911_v63 = vpop.permute.xlu0 %2910 }
 0xbab   :  { %v2915_v32 = vpop.permute.xlu1 %2914 }
 0xbac   :  { %v2919_v45 = vsel %vm2916_vm9, %v2915_v32, %v2911_v63 }
 0xbad   :  { %v2921_v58 = vadd.f32 %v2919_v45, %v2908_v2 }
 0xbaf   :  { %v5933_v35 = vmul.f32 0.001953125, %v2921_v58 }
 0xbb1   :  { %v3157_v44 = vpop.permute.xlu2 %3156  ;;  %v2978_v5 = vmul.f32 %v5933_v35, %v5933_v35 }
 0xbb2   :  { %v3161_v62 = vsel %vm2916_vm9, %v3155_v4, %v3157_v44 }
 0xbb3   :  { %v3165_v9 = vadd.f32 %v3161_v62, %v3153_v23  ;;  %v2913_v24 = vpop.permute.xlu1 %2912 }
 0xbb4   :  { %v2917_v3 = vsel %vm2916_vm9, %v2913_v24, %v2915_v32  ;;  %v2918_v50 = vsel %vm2916_vm9, %v2911_v63, %v2913_v24 }
 0xbb5   :  { %v5925_v21 = vmul.f32 0.001953125, %v3165_v9  ;;  %v2920_v34 = vadd.f32 %v2917_v3, %v5872_v38  ;;  %v2922_v7 = vadd.f32 %v2918_v50, %v5874_v29 }
 0xbb7   :  { %v3222_v16 = vmul.f32 %v5925_v21, %v5925_v21  ;;  %v5952_v47 = vmul.f32 0.001953125, %v2920_v34  ;;  %v5954_v18 = vmul.f32 0.001953125, %v2922_v7 }
 0xbb9   :  { %v3206_v40 = vpop.permute.xlu2 %3205  ;;  %v2977_v62 = vmul.f32 %v5952_v47, %v5952_v47 }
 0xbc1   :  { %v3208_v60 = vpop.permute.xlu2 %3207 }
 0xbc2   :  { %v3212_v28 = vsel %vm2916_vm9, %v3206_v40, %v3208_v60  ;;  %v3159_v31 = vpop.permute.xlu0 %3158 }
 0xbc3   :  { %v3216_v59 = vadd.f32 %v3212_v28, %v3204_v10  ;;  %v3160_v26 = vsel %vm2916_vm9, %v3157_v44, %v3159_v31  ;;  %v3162_v56 = vsel %vm2916_vm9, %v3159_v31, %v3155_v4  ;;  %v2979_v28 = vmul.f32 %v5954_v18, %v5954_v18 }
 0xbc4   :  { %v3163_v27 = vadd.f32 %v3160_v26, %v5885_v8  ;;  %v3164_v11 = vadd.f32 %v3162_v56, %v3152_v20 }
 0xbc5   :  { %v3219_v17 = vmul.f32 0.001953125, %v3216_v59 }
 0xbc6   :  { %v5957_v41 = vmul.f32 0.001953125, %v3163_v27  ;;  %v5959_v14 = vmul.f32 0.001953125, %v3164_v11 }
 0xbc7   :  { %v3225_v52 = vsub.f32 %v3219_v17, %v3222_v16 }
 0xbc9   :  { %v3228_v55 = vmax.f32 %v3225_v52, 0.0 }
 0xbca   :  { %v2967_v46 = vpop.permute.xlu1 %2966  ;;  %v2963_v48 = vpop.permute.xlu0 %2962 }
 0xbcb   :  { %v2970_v2 = vsel %vm2916_vm9, %v2967_v46, %v2963_v48  ;;  %v5949_v30 = vadd.f32 1e-05, %v3228_v55 }
 0xbcc   :  { %v2972_v23 = vadd.f32 %v2970_v2, %v2960_v0 }
 0xbcd   :  { %3435 = vrsqrt.f32 %v5949_v30  ;;  %vm3258_vm6 = vweird.f32 %v5949_v30 }
 0xbce   :  { %v2975_v54 = vmul.f32 0.001953125, %v2972_v23 }
 0xbd0   :  { %v2981_v33 = vsub.f32 %v2975_v54, %v2978_v5 }
 0xbd2   :  { %v2984_v38 = vmax.f32 %v2981_v33, 0.0  ;;  %v2965_v0 = vpop.permute.xlu1 %2964  ;;  %v3210_v29 = vpop.permute.xlu0 %3209 }
 0xbd3   :  { %v2968_v10 = vsel %vm2916_vm9, %v2965_v0, %v2967_v46  ;;  %v2969_v8 = vsel %vm2916_vm9, %v2963_v48, %v2965_v0  ;;  %v3211_v20 = vsel %vm2916_vm9, %v3208_v60, %v3210_v29  ;;  %v3213_v42 = vsel %vm2916_vm9, %v3210_v29, %v3206_v40  ;;  %v5980_v45 = vpop.eup %3435 }
 0xbd4   :  { %v2987_v4 = vadd.f32 1e-05, %v2984_v38  ;;  %v2971_v44 = vadd.f32 %v2968_v10, %v5896_v39  ;;  %v2973_v32 = vadd.f32 %v2969_v8, %v5901_v36  ;;  %v3214_v63 = vadd.f32 %v3211_v20, %v5911_v22 }
 0xbd5   :  { %v3215_v9 = vadd.f32 %v3213_v42, %v3203_v1  ;;  %v3220_v60 = vmul.f32 %v5957_v41, %v5957_v41  ;;  %v3221_v40 = vmul.f32 %v5959_v14, %v5959_v14  ;;  %v3253_v50 = vmul.f32 %v5980_v45, %v5949_v30 }
 0xbd6   :  { %3437 = vrsqrt.f32 %v2987_v4  ;;  %v2974_v43 = vmul.f32 0.001953125, %v2971_v44  ;;  %v2976_v39 = vmul.f32 0.001953125, %v2973_v32  ;;  %v3217_v59 = vmul.f32 0.001953125, %v3214_v63 }
 0xbd7   :  { %v3218_v36 = vmul.f32 0.001953125, %v3215_v9  ;;  %v3254_v23 = vmul.f32 %v5980_v45, %v3253_v50  ;;  %vm3005_vm11 = vweird.f32 %v2987_v4  ;;  %vm3259_vm13 = vweird.f32 %v5980_v45 }
 0xbd8   :  { %v2980_v24 = vsub.f32 %v2974_v43, %v2977_v62  ;;  %v2982_v31 = vsub.f32 %v2976_v39, %v2979_v28  ;;  %v3223_v22 = vsub.f32 %v3217_v59, %v3220_v60 }
 0xbd9   :  { %v3224_v1 = vsub.f32 %v3218_v36, %v3221_v40  ;;  %v3255_v27 = vmul.f32 0.5, %v3254_v23 }
 0xbda   :  { %v2983_v17 = vmax.f32 %v2980_v24, 0.0  ;;  %v2985_v16 = vmax.f32 %v2982_v31, 0.0  ;;  %v3226_v58 = vmax.f32 %v3223_v22, 0.0 }
 0xbdb   :  { %v3227_v52 = vmax.f32 %v3224_v1, 0.0  ;;  %v3256_v20 = vsub.f32 1.5, %v3255_v27 }
 0xbdc   :  { %v3438_v3 = vpop.eup %3437  ;;  %v2986_v55 = vadd.f32 1e-05, %v2983_v17  ;;  %v2988_v48 = vadd.f32 1e-05, %v2985_v16  ;;  %v5984_v26 = vadd.f32 1e-05, %v3226_v58 }
 0xbdd   :  { %v3000_v46 = vmul.f32 %v3438_v3, %v2987_v4  ;;  %v3230_v56 = vadd.f32 1e-05, %v3227_v52  ;;  %vm3006_vm10 = vweird.f32 %v3438_v3  ;;  %v3257_v4 = vmul.f32 %v5980_v45, %v3256_v20 }
 0xbde   :  { %3439 = vrsqrt.f32 %v2986_v55  ;;  %vm5990_vm14 = vmor %vm3005_vm11, %vm3006_vm10  ;;  %vm2995_vm2 = vweird.f32 %v2986_v55  ;;  %vm3015_vm3 = vweird.f32 %v2988_v48 }
 0xbdf   :  { %v3001_v2 = vmul.f32 %v3438_v3, %v3000_v46  ;;  %3441 = vrsqrt.f32 %v2988_v48  ;;  %vm3248_vm9 = vweird.f32 %v3230_v56  ;;  %vm3260_vm10 = vmor %vm3258_vm6, %vm3259_vm13 }
 0xbe0   :  { %3443 = vrsqrt.f32 %v5984_v26  ;;  %v3261_v50 = vsel %vm3260_vm10, %v5980_v45, %v3257_v4  ;;  %v3425_v45 = vld [vmem:[%s6067_s2 + $0x1] ss:$2 sm:$0x7] }
 0xbe1   :  { %v3002_v5 = vmul.f32 0.5, %v3001_v2  ;;  %3445 = vrsqrt.f32 %v3230_v56  ;;  %v3268_v2 = vrot.slane %v3261_v50, 6 }
 0xbe3   :  { %v3003_v34 = vsub.f32 1.5, %v3002_v5 }
 0xbe4   :  { %v3440_v7 = vpop.eup %3439 }
 0xbe5   :  { %v3442_v11 = vpop.eup %3441  ;;  %v2990_v54 = vmul.f32 %v3440_v7, %v2986_v55  ;;  %v3004_v29 = vmul.f32 %v3438_v3, %v3003_v34  ;;  %vm2996_vm0 = vweird.f32 %v3440_v7  ;;  %v3019_v55 = vld [vmem:[%s6067_s2] ss:$2 sm:$0x7] }
 0xbe6   :  { %v3444_v33 = vpop.eup %3443  ;;  %v3010_v38 = vmul.f32 %v3442_v11, %v2988_v48  ;;  %vm3016_vm1 = vweird.f32 %v3442_v11  ;;  %vm2997_vm4 = vmor %vm2995_vm2, %vm2996_vm0 }
 0xbe7   :  { %v3446_v0 = vpop.eup %3445  ;;  %v2991_v10 = vmul.f32 %v3440_v7, %v2990_v54  ;;  %v3233_v8 = vmul.f32 %v3444_v33, %v5984_v26  ;;  %v3008_v60 = vsel %vm5990_vm14, %v3438_v3, %v3004_v29  ;;  %vm3017_vm7 = vmor %vm3015_vm3, %vm3016_vm1  ;;  %vm3239_vm8 = vweird.f32 %v3444_v33 }
 0xbe8   :  { %v3011_v42 = vmul.f32 %v3442_v11, %v3010_v38  ;;  %v3243_v44 = vmul.f32 %v3446_v0, %v3230_v56  ;;  %v3023_v31 = vrot.slane %v3008_v60, 7  ;;  %vm3249_vm5 = vweird.f32 %v3446_v0 }
 0xbe9   :  { %v2992_v32 = vmul.f32 0.5, %v2991_v10  ;;  %v3234_v62 = vmul.f32 %v3444_v33, %v3233_v8  ;;  %vm3250_vm11 = vmor %vm3248_vm9, %vm3249_vm5  ;;  %vm3238_vm14 = vweird.f32 %v5984_v26  ;;  %v3031_v8 = vld [vmem:[%s6068_s3] ss:$2 sm:$0x7] }
 0xbea   :  { %v3012_v9 = vmul.f32 0.5, %v3011_v42  ;;  %v3244_v28 = vmul.f32 %v3446_v0, %v3243_v44  ;;  %vm3240_vm0 = vmor %vm3238_vm14, %vm3239_vm8  ;;  %v3052_v44 = vld [vmem:[#allocation2 + $0x8] sm:$0xff] }
 0xbeb   :  { %v2993_v43 = vsub.f32 1.5, %v2992_v32  ;;  %v3235_v40 = vmul.f32 0.5, %v3234_v62  ;;  %v3053_v32 = vld [vmem:[#allocation2 + $0x10] sm:$0xff] }
 0xbec   :  { %v3013_v39 = vsub.f32 1.5, %v3012_v9  ;;  %v3245_v59 = vmul.f32 0.5, %v3244_v28  ;;  %v3055_v9 = vld [vmem:[#allocation2 + $0x20] sm:$0xff] }
 0xbed   :  { %v2994_v36 = vmul.f32 %v3440_v7, %v2993_v43  ;;  %v3236_v24 = vsub.f32 1.5, %v3235_v40  ;;  %v3056_v40 = vld [vmem:[#allocation2 + $0x28] sm:$0xff] }
 0xbee   :  { %v3014_v22 = vmul.f32 %v3442_v11, %v3013_v39  ;;  %v3246_v1 = vsub.f32 1.5, %v3245_v59 }
 0xbef   :  { %v2998_v17 = vsel %vm2997_vm4, %v3440_v7, %v2994_v36  ;;  %v3237_v52 = vmul.f32 %v3444_v33, %v3236_v24 }
 0xbf0   :  { %v3018_v16 = vsel %vm3017_vm7, %v3442_v11, %v3014_v22  ;;  %v3026_v58 = vsel %vm3025_vm12, %v2998_v17, %v3023_v31  ;;  %v3247_v3 = vmul.f32 %v3446_v0, %v3246_v1 }
 0xbf1   :  { %v3024_v46 = vrot.slane %v3018_v16, 6  ;;  %v3241_v5 = vsel %vm3240_vm0, %v3444_v33, %v3237_v52 }
 0xbf2   :  { %v3251_v30 = vsel %vm3250_vm11, %v3446_v0, %v3247_v3 }
 0xbf3   :  { %v3028_v48 = vsel %vm3027_vm15, %v3026_v58, %v3024_v46  ;;  %v3267_v56 = vrot.slane %v3251_v30, 7 }
 0xbf4   :  { %v3030_v23 = vmul.f32 %v3028_v48, %v3019_v55 }
 0xbf5   :  { %v3269_v34 = vsel %vm3025_vm12, %v3241_v5, %v3267_v56 }
 0xbf6   :  { %v3033_v7 = vperm.slane %v3030_v23, 0  ;;  %v3034_v27 = vperm.slane %v3030_v23, 1  ;;  %v3035_v11 = vperm.slane %v3030_v23, 2  ;;  %v3270_v54 = vsel %vm3027_vm15, %v3269_v34, %v3268_v2 }
 0xbf7   :  { %v3272_v0 = vmul.f32 %v3425_v45, %v3270_v54 }
 0xbf8   :  { %v3040_v26 = vmul.f32 %v3034_v27, %v5933_v35  ;;  %v3041_v38 = vmul.f32 %v3035_v11, %v5954_v18  ;;  %v3039_v29 = vmul.f32 %v3033_v7, %v5952_v47  ;;  %v3051_v35 = vld [vmem:[#allocation2] sm:$0xff]  ;;  %v3054_v18 = vld [vmem:[#allocation2 + $0x18] sm:$0xff]  ;;  %v3058_v60 = vmul.f32 %v3052_v44, %v3034_v27 }
 0xbf9   :  { %v6019_v42 = vperm.slane %v3272_v0, 1  ;;  %v6022_v63 = vperm.slane %v3272_v0, 2  ;;  %v3057_v28 = vmul.f32 %v3051_v35, %v3033_v7  ;;  %v3059_v43 = vmul.f32 %v3053_v32, %v3035_v11  ;;  %v3299_v35 = vld [vmem:[#allocation2 + $0x58] sm:$0xff] }
 0xbfa   :  { %v3045_v10 = vrot.slane %v3040_v26, 7  ;;  %v3046_v33 = vrot.slane %v3041_v38, 6  ;;  %v3060_v4 = vmul.f32 %v3054_v18, %v3033_v7  ;;  %v3061_v39 = vmul.f32 %v3055_v9, %v3034_v27 }
 0xbfb   :  { %v3283_v59 = vmul.f32 %v6019_v42, %v5959_v14  ;;  %v3284_v36 = vmul.f32 %v6022_v63, %v5925_v21  ;;  %v3062_v24 = vmul.f32 %v3056_v40, %v3035_v11  ;;  %v3094_v17 = vmul.f32 %v3033_v7, %v5618_v51 }
 0xbfc   :  { %v3047_v20 = vsel %vm3025_vm12, %v3039_v29, %v3045_v10  ;;  %v3095_v16 = vmul.f32 %v3034_v27, %v5620_v19  ;;  %v3096_v58 = vmul.f32 %v3035_v11, %v5646_v53  ;;  %v6031_v52 = vperm.slane %v3272_v0, 0  ;;  %v3426_v0 = vld [vmem:[%s6068_s3 + $0x1] ss:$2 sm:$0x7]  ;;  %s3503_s3 = smov [#allocation2]  }
 0xbfd   :  { %v3048_v62 = vsel %vm3027_vm15, %v3047_v20, %v3046_v33  ;;  %v3288_v48 = vrot.slane %v3283_v59, 7  ;;  %v3289_v21 = vrot.slane %v3284_v36, 6  ;;  %v3097_v51 = vmul.f32 %v3033_v7, %v5622_v12  ;;  %s3365_s11 = sshll.u32 %s3503_s3, 4  ;;  %s3366_s11 = int_to_ptr.vmem [resolvable:$true] %s3365_s11 }
 0xbfe   :  { %v3050_v47 = vsub.f32 %v3031_v8, %v3048_v62  ;;  %v3282_v53 = vmul.f32 %v6031_v52, %v5957_v41  ;;  %v3098_v54 = vmul.f32 %v3034_v27, %v5624_v13  ;;  %v3099_v26 = vmul.f32 %v3035_v11, %v5648_v57  ;;  %v3294_v8 = vld [vmem:[#allocation2 + $0x30] sm:$0xff]  ;;  %v3295_v57 = vld [vmem:[#allocation2 + $0x38] sm:$0xff]  ;;  %v3296_v27 = vld [vmem:[#allocation2 + $0x40] sm:$0xff] }
 0xbff   :  { %v3297_v11 = vld [vmem:[#allocation2 + $0x48] sm:$0xff]  ;;  %v3300_v32 = vmul.f32 %v3294_v8, %v6031_v52  ;;  %v3301_v18 = vmul.f32 %v3295_v57, %v6019_v42  ;;  %v3302_v9 = vmul.f32 %v3296_v27, %v6022_v63 }
 0xc00   :  { %v3064_v31 = vperm.slane %v3050_v47, 0  ;;  %v3065_v22 = vperm.slane %v3050_v47, 1  ;;  %v3066_v1 = vperm.slane %v3050_v47, 2  ;;  %v3290_v12 = vsel %vm3025_vm12, %v3282_v53, %v3288_v48 }
 0xc01   :  { %v3291_v20 = vsel %vm3027_vm15, %v3290_v12, %v3289_v21  ;;  %v3303_v47 = vmul.f32 %v3297_v11, %v6031_v52 }
 0xc02   :  { %v3070_v3 = vadd.f32 %v3064_v31, %v3057_v28  ;;  %v3071_v50 = vadd.f32 %v3065_v22, %v3058_v60  ;;  %v3072_v55 = vadd.f32 %v3066_v1, %v3059_v43  ;;  %v3073_v46 = vadd.f32 %v3064_v31, %v3060_v4  ;;  %v3298_v60 = vld [vmem:[#allocation2 + $0x50] sm:$0xff] }
 0xc03   :  { %v3074_v14 = vadd.f32 %v3065_v22, %v3061_v39  ;;  %v3075_v30 = vadd.f32 %v3066_v1, %v3062_v24  ;;  %v3100_v5 = vadd.f32 %v3094_v17, %v3064_v31  ;;  %v3101_v19 = vadd.f32 %v3095_v16, %v3065_v22 }
 0xc04   :  { %v3076_v56 = vmax.f32 %v3070_v3, 0.0  ;;  %v3077_v2 = vmax.f32 %v3071_v50, 0.0  ;;  %v3078_v23 = vmax.f32 %v3072_v55, 0.0  ;;  %v3079_v45 = vmax.f32 %v3073_v46, 0.0 }
 0xc05   :  { %v3080_v34 = vmax.f32 %v3074_v14, 0.0  ;;  %v3102_v38 = vadd.f32 %v3096_v58, %v3066_v1  ;;  %v3081_v29 = vmax.f32 %v3075_v30, 0.0  ;;  %v3103_v10 = vadd.f32 %v3097_v51, %v3064_v31 }
 0xc06   :  { %3082 = vst [vmem:[#allocation2] sm:$0xff] %v3076_v56  ;;  %v3104_v7 = vadd.f32 %v3098_v54, %v3065_v22  ;;  %v3105_v33 = vadd.f32 %v3099_v26, %v3066_v1  ;;  %v3106_v41 = vmax.f32 %v3100_v5, 0.0  ;;  %v3107_v13 = vmax.f32 %v3101_v19, 0.0 }
 0xc07   :  { %3083 = vst [vmem:[#allocation2 + $0x8] sm:$0xff] %v3077_v2  ;;  %v3293_v44 = vsub.f32 %v3426_v0, %v3291_v20  ;;  %v3108_v62 = vmax.f32 %v3102_v38, 0.0  ;;  %v3109_v28 = vmax.f32 %v3103_v10, 0.0  ;;  %v3304_v36 = vmul.f32 %v3298_v60, %v6019_v42 }
 0xc08   :  { %3084 = vst [vmem:[#allocation2 + $0x10] sm:$0xff] %v3078_v23  ;;  %v3110_v39 = vmax.f32 %v3104_v7, 0.0  ;;  %v3111_v59 = vmax.f32 %v3105_v33, 0.0  ;;  %v3305_v24 = vmul.f32 %v3299_v35, %v6022_v63  ;;  %v3337_v58 = vmul.f32 %v6031_v52, %v5695_v37 }
 0xc09   :  { %3085 = vst [vmem:[#allocation2 + $0x18] sm:$0xff] %v3079_v45  ;;  %v3307_v43 = vperm.slane %v3293_v44, 0  ;;  %v3308_v40 = vperm.slane %v3293_v44, 1  ;;  %v3309_v4 = vperm.slane %v3293_v44, 2  ;;  %v3338_v46 = vmul.f32 %v6019_v42, %v5710_v15 }
 0xc0a   :  { %3086 = vst [vmem:[#allocation2 + $0x20] sm:$0xff] %v3080_v34  ;;  %v3339_v30 = vmul.f32 %v6022_v63, %v5712_v49  ;;  %v3340_v56 = vmul.f32 %v6031_v52, %v5714_v25  ;;  %v3341_v23 = vmul.f32 %v6019_v42, %v5724_v6  ;;  %v3342_v15 = vmul.f32 %v6022_v63, %v5726_v61 }
 0xc0b   :  { %3087 = vst [vmem:[#allocation2 + $0x28] sm:$0xff] %v3081_v29  ;;  %v3313_v31 = vadd.f32 %v3307_v43, %v3300_v32  ;;  %v3314_v22 = vadd.f32 %v3308_v40, %v3301_v18  ;;  %v3315_v1 = vadd.f32 %v3309_v4, %v3302_v9  ;;  %v3316_v17 = vadd.f32 %v3307_v43, %v3303_v47 }
 0xc0c   :  { %3112 = vst [vmem:[#allocation2 + $0x60] sm:$0xff] %v3106_v41  ;;  %v3317_v16 = vadd.f32 %v3308_v40, %v3304_v36  ;;  %v3318_v3 = vadd.f32 %v3309_v4, %v3305_v24  ;;  %v3343_v48 = vadd.f32 %v3337_v58, %v3307_v43  ;;  %v3344_v2 = vadd.f32 %v3338_v46, %v3308_v40 }
 0xc0d   :  { %3113 = vst [vmem:[#allocation2 + $0x68] sm:$0xff] %v3107_v13  ;;  %v3319_v50 = vmax.f32 %v3313_v31, 0.0  ;;  %v3320_v55 = vmax.f32 %v3314_v22, 0.0  ;;  %v3321_v14 = vmax.f32 %v3315_v1, 0.0  ;;  %v3322_v21 = vmax.f32 %v3316_v17, 0.0 }
 0xc0e   :  { %3114 = vst [vmem:[#allocation2 + $0x70] sm:$0xff] %v3108_v62  ;;  %v3323_v37 = vmax.f32 %v3317_v16, 0.0  ;;  %v3345_v5 = vadd.f32 %v3339_v30, %v3309_v4  ;;  %v3324_v45 = vmax.f32 %v3318_v3, 0.0  ;;  %v3346_v51 = vadd.f32 %v3340_v56, %v3307_v43 }
 0xc0f   :  { %3115 = vst [vmem:[#allocation2 + $0x78] sm:$0xff] %v3109_v28  ;;  %v3347_v49 = vadd.f32 %v3341_v23, %v3308_v40  ;;  %v3349_v19 = vmax.f32 %v3343_v48, 0.0  ;;  %v3348_v53 = vadd.f32 %v3342_v15, %v3309_v4  ;;  %v3350_v34 = vmax.f32 %v3344_v2, 0.0 }
 0xc10   :  { %3116 = vst [vmem:[#allocation2 + $0x80] sm:$0xff] %v3110_v39  ;;  %v3351_v25 = vmax.f32 %v3345_v5, 0.0  ;;  %v3352_v52 = vmax.f32 %v3346_v51, 0.0 }
 0xc11   :  { %3117 = vst [vmem:[#allocation2 + $0x88] sm:$0xff] %v3111_v59  ;;  %v3353_v6 = vmax.f32 %v3347_v49, 0.0  ;;  %v3354_v61 = vmax.f32 %v3348_v53, 0.0 }
 0xc12   :  { %3325 = vst [vmem:[#allocation2 + $0x30] sm:$0xff] %v3319_v50 }
 0xc13   :  { %3326 = vst [vmem:[#allocation2 + $0x38] sm:$0xff] %v3320_v55 }
 0xc14   :  { %3327 = vst [vmem:[#allocation2 + $0x40] sm:$0xff] %v3321_v14 }
 0xc15   :  { %3328 = vst [vmem:[#allocation2 + $0x48] sm:$0xff] %v3322_v21 }
 0xc16   :  { %3329 = vst [vmem:[#allocation2 + $0x50] sm:$0xff] %v3323_v37 }
 0xc17   :  { %3330 = vst [vmem:[#allocation2 + $0x58] sm:$0xff] %v3324_v45 }
 0xc18   :  { %3355 = vst [vmem:[#allocation2 + $0x90] sm:$0xff] %v3349_v19 }
 0xc19   :  { %3356 = vst [vmem:[#allocation2 + $0x98] sm:$0xff] %v3350_v34 }
 0xc1a   :  { %3357 = vst [vmem:[#allocation2 + $0xa0] sm:$0xff] %v3351_v25 }
 0xc1b   :  { %3358 = vst [vmem:[#allocation2 + $0xa8] sm:$0xff] %v3352_v52 }
 0xc1c   :  { %3359 = vst [vmem:[#allocation2 + $0xb0] sm:$0xff] %v3353_v6 }
 0xc1d   :  { %3360 = vst [vmem:[#allocation2 + $0xb8] sm:$0xff] %v3354_v61 }
 0xc1e   :  { %3373 = dma.vmem_to_hbm [thread:$0]  %s3366_s11, 3072, %s3368_s14, [#allocation3], %s3504_s15, %s3504_s15, %s3497_s19  }
 0xc1f   :  { %3495 = dma.done.wait [#allocation3], 3072  }
 0xc20   :  { %3496 = vsyncadd [#allocation3], 4294964224 }
 0xc21   :  { %3378 = vsyncpa [#allocation3], 1 }

</bundles_post_ra>
